<compile_context>
chip_gen: v7x
topology: tpu7x:2x2x1
jax: 0.10.0
libtpu: 0.0.40
codegen_flags: <defaults>
</compile_context>

<pallas_src>
import functools

import jax
import jax.numpy as jnp
from jax import lax
from jax.experimental import pallas as pl
from jax.experimental.pallas import tpu as pltpu

EPS = 1e-5
LANE = 128


# ------------------------------ small helpers ------------------------------

def _round_up(x, m):
    return (x + m - 1) // m * m


def _row_tile(m):
    for t in (256, 128, 64, 32, 16, 8):
        if m % t == 0:
            return t
    return m


def _col_tile(c):
    return 256 if c % 256 == 0 else 128


def _compiler_params(semantics):
    return pltpu.CompilerParams(dimension_semantics=semantics,
                                vmem_limit_bytes=32 * 1024 * 1024)


def _identity_sb(k):
    # Folded-BN "do nothing" coefficients: scale=1, bias=0.
    return jnp.concatenate([jnp.ones((1, k), jnp.float32),
                            jnp.zeros((1, k), jnp.float32)], axis=0)


# ------------------- kernel A: (1x1 conv) matmul + BN stats -----------------

def _matmul_bn_kernel(x_ref, sbin_ref, w_ref, g_ref, b_ref,
                      y_ref, sb_ref, stat_ref, *, apply_act, rows_total):
    m = pl.program_id(1)

    x = x_ref[...]
    if apply_act:                      # fused BN+ReLU of the producing layer
        x = jnp.maximum(x * sbin_ref[0:1, :] + sbin_ref[1:2, :], 0.0)

    y = jnp.dot(x.astype(jnp.bfloat16), w_ref[...],
                preferred_element_type=jnp.float32)
    y_ref[...] = y

    @pl.when(m == 0)
    def _():
        stat_ref[...] = jnp.zeros_like(stat_ref)

    stat_ref[0:1, :] += jnp.sum(y, axis=0, keepdims=True)
    stat_ref[1:2, :] += jnp.sum(y * y, axis=0, keepdims=True)

    @pl.when(m == pl.num_programs(1) - 1)
    def _():
        inv_n = 1.0 / rows_total
        mean = stat_ref[0:1, :] * inv_n
        var = jnp.maximum(stat_ref[1:2, :] * inv_n - mean * mean, 0.0)
        scale = g_ref[...] * lax.rsqrt(var + EPS)
        sb_ref[0:1, :] = scale
        sb_ref[1:2, :] = b_ref[...] - mean * scale


def matmul_bn(x, sb_in, w_bf16, gamma, beta, *, apply_act):
    """1x1 conv (as matmul) + training-mode BN statistics.

    x: (M, K) f32; sb_in: (2, K) folded BN of the producer (applied with ReLU
    iff apply_act); w_bf16: (K, C) bf16; gamma/beta: (1, C) f32.
    Returns (raw conv output y (M, C) f32, folded (scale, bias) (2, C) f32).
    """
    M, K = x.shape
    C = w_bf16.shape[1]
    mt, ct = _row_tile(M), _col_tile(C)
    grid = (C // ct, M // mt)          # channel tiles parallel, rows reduce
    kernel = functools.partial(_matmul_bn_kernel, apply_act=apply_act,
                               rows_total=float(M))
    return pl.pallas_call(
        kernel,
        grid=grid,
        in_specs=[
            pl.BlockSpec((mt, K), lambda c, m: (m, 0)),
            pl.BlockSpec((2, K), lambda c, m: (0, 0)),
            pl.BlockSpec((K, ct), lambda c, m: (0, c)),
            pl.BlockSpec((1, ct), lambda c, m: (0, c)),
            pl.BlockSpec((1, ct), lambda c, m: (0, c)),
        ],
        out_specs=[
            pl.BlockSpec((mt, ct), lambda c, m: (m, c)),
            pl.BlockSpec((2, ct), lambda c, m: (0, c)),
        ],
        out_shape=[
            jax.ShapeDtypeStruct((M, C), jnp.float32),
            jax.ShapeDtypeStruct((2, C), jnp.float32),
        ],
        scratch_shapes=[pltpu.VMEM((2, ct), jnp.float32)],
        compiler_params=_compiler_params(("parallel", "arbitrary")),
    )(x, sb_in, w_bf16, gamma, beta)


# ------------- kernel B: 3x3 conv (9 shifted matmuls) + BN stats ------------

def _conv3x3_bn_kernel(ph_ref, w_ref, g_ref, b_ref, y_ref, sb_ref,
                       acc_ref, stat_ref, *, stride, Ho, Wo, PH, rows_total):
    n = pl.program_id(1)

    acc_ref[...] = jnp.zeros_like(acc_ref)
    for dy in range(3):
        for dx in range(3):
            phase = (dy % stride) * stride + (dx % stride)
            oy, ox = dy // stride, dx // stride
            xt = ph_ref[phase * PH + oy: phase * PH + oy + Ho,
                        ox: ox + Wo, :]                     # (Ho, Wo, K) bf16
            xt = xt.reshape(Ho * Wo, xt.shape[-1])
            acc_ref[...] += jnp.dot(xt, w_ref[dy * 3 + dx],
                                    preferred_element_type=jnp.float32)
    y = acc_ref[...]
    y_ref[...] = y

    @pl.when(n == 0)
    def _():
        stat_ref[...] = jnp.zeros_like(stat_ref)

    stat_ref[0:1, :] += jnp.sum(y, axis=0, keepdims=True)
    stat_ref[1:2, :] += jnp.sum(y * y, axis=0, keepdims=True)

    @pl.when(n == pl.num_programs(1) - 1)
    def _():
        inv_n = 1.0 / rows_total
        mean = stat_ref[0:1, :] * inv_n
        var = jnp.maximum(stat_ref[1:2, :] * inv_n - mean * mean, 0.0)
        scale = g_ref[...] * lax.rsqrt(var + EPS)
        sb_ref[0:1, :] = scale
        sb_ref[1:2, :] = b_ref[...] - mean * scale


def conv3x3_bn(act_nhwc, w_taps_bf16, gamma, beta, *, stride):
    """3x3 conv, pad=1, stride s, + BN stats; taps as in-kernel matmuls.

    act_nhwc: (N, H, W, K) f32 post-BN/ReLU activation (K lane-padded).
    w_taps_bf16: (9, K, C) bf16 in (kh*3+kw) order.
    Returns (y (N*Ho*Wo, C) f32, folded (scale, bias) (2, C) f32).
    """
    N, H, W, K = act_nhwc.shape
    C = w_taps_bf16.shape[-1]
    s = stride
    Ho = (H - 1) // s + 1
    Wo = (W - 1) // s + 1
    # TODO(synk): pad Wo to a multiple of 8 (sublane) for widths like 28/14/7.
    assert (Ho * Wo) % 8 == 0, "output spatial tile must be sublane-aligned"

    # Wrapper-side space-to-batch phase split (one fused XLA copy); the
    # padding zeros are inserted *after* the activation so they stay zero.
    PH = -(-(H + 2) // s)
    PW = -(-(W + 2) // s)
    a = jnp.pad(act_nhwc, ((0, 0), (1, 1), (1, 1), (0, 0)))
    a = jnp.pad(a, ((0, 0), (0, s * PH - (H + 2)), (0, s * PW - (W + 2)), (0, 0)))
    a = a.reshape(N, PH, s, PW, s, K)
    a = jnp.transpose(a, (0, 2, 4, 1, 3, 5))
    phases = a.reshape(N, s * s * PH, PW, K).astype(jnp.bfloat16)

    ct = _col_tile(C)
    grid = (C // ct, N)                # channel tiles parallel, images reduce
    kernel = functools.partial(_conv3x3_bn_kernel, stride=s, Ho=Ho, Wo=Wo,
                               PH=PH, rows_total=float(N * Ho * Wo))
    return pl.pallas_call(
        kernel,
        grid=grid,
        in_specs=[
            pl.BlockSpec((None, s * s * PH, PW, K), lambda c, n: (n, 0, 0, 0)),
            pl.BlockSpec((9, K, ct), lambda c, n: (0, 0, c)),
            pl.BlockSpec((1, ct), lambda c, n: (0, c)),
            pl.BlockSpec((1, ct), lambda c, n: (0, c)),
        ],
        out_specs=[
            pl.BlockSpec((Ho * Wo, ct), lambda c, n: (n, c)),
            pl.BlockSpec((2, ct), lambda c, n: (0, c)),
        ],
        out_shape=[
            jax.ShapeDtypeStruct((N * Ho * Wo, C), jnp.float32),
            jax.ShapeDtypeStruct((2, C), jnp.float32),
        ],
        scratch_shapes=[pltpu.VMEM((Ho * Wo, ct), jnp.float32),
                        pltpu.VMEM((2, ct), jnp.float32)],
        compiler_params=_compiler_params(("parallel", "arbitrary")),
    )(phases, w_taps_bf16, gamma, beta)


# ----------- kernel C: bn3 + bn_shortcut + residual add + final ReLU --------

def _bn_add_relu_kernel(y_ref, sb_ref, r_ref, sbr_ref, o_ref):
    y = y_ref[...] * sb_ref[0:1, :] + sb_ref[1:2, :]
    r = r_ref[...] * sbr_ref[0:1, :] + sbr_ref[1:2, :]
    o_ref[...] = jnp.maximum(y + r, 0.0)


def bn_add_relu(y, sb, res, sb_res):
    M, C = y.shape
    mt, ct = _row_tile(M), _col_tile(C)
    grid = (C // ct, M // mt)
    return pl.pallas_call(
        _bn_add_relu_kernel,
        grid=grid,
        in_specs=[
            pl.BlockSpec((mt, ct), lambda c, m: (m, c)),
            pl.BlockSpec((2, ct), lambda c, m: (0, c)),
            pl.BlockSpec((mt, ct), lambda c, m: (m, c)),
            pl.BlockSpec((2, ct), lambda c, m: (0, c)),
        ],
        out_specs=pl.BlockSpec((mt, ct), lambda c, m: (m, c)),
        out_shape=jax.ShapeDtypeStruct((M, C), jnp.float32),
        input_output_aliases={2: 0},   # write result into the residual buffer
        compiler_params=_compiler_params(("parallel", "parallel")),
    )(y, sb, res, sb_res)


# ------------------------------- glue (JAX) ---------------------------------

def _pad_cols(a, c_to):
    return jnp.pad(a, ((0, 0),) * (a.ndim - 1) + ((0, c_to - a.shape[-1]),))


def bottleneck_forward(x_nchw, params, stride):
    x = jnp.transpose(x_nchw, (0, 2, 3, 1)).astype(jnp.float32)   # NHWC
    N, H, W, Cin = x.shape
    planes = params["w1"].shape[0]
    expp = params["w3"].shape[0]

    Cin_p = _round_up(Cin, LANE)
    P_p = _round_up(planes, LANE)
    E_p = _round_up(expp, LANE)

    xp = _pad_cols(x, Cin_p)
    x_flat = xp.reshape(N * H * W, Cin_p)

    def prep_w1x1(w):     # torch (Cout, Cin, 1, 1) -> (Cin_p, Cout_p) bf16
        cout, cin = w.shape[:2]
        w2d = w.reshape(cout, cin).T
        w2d = jnp.pad(w2d, ((0, _round_up(cin, LANE) - cin),
                            (0, _round_up(cout, LANE) - cout)))
        return w2d.astype(jnp.bfloat16)

    def prep_gb(g, b):
        c = g.shape[0]
        cp = _round_up(c, LANE)
        return (jnp.pad(g, (0, cp - c))[None, :].astype(jnp.float32),
                jnp.pad(b, (0, cp - c))[None, :].astype(jnp.float32))

    # ---- conv1 (1x1) + bn1 statistics --------------------------------------
    g1, b1 = prep_gb(params["g1"], params["b1"])
    y1, sb1 = matmul_bn(x_flat, _identity_sb(Cin_p), prep_w1x1(params["w1"]),
                        g1, b1, apply_act=False)

    # bn1 + ReLU applied here so that conv2's pad/phase zeros are
    # post-activation; XLA fuses this FMA into the space-to-batch copy below.
    a1 = jnp.maximum(y1 * sb1[0:1, :] + sb1[1:2, :], 0.0).reshape(N, H, W, P_p)

    # ---- conv2 (3x3, stride, pad=1) + bn2 statistics ------------------------
    w2 = jnp.transpose(params["w2"], (2, 3, 1, 0)).reshape(9, planes, planes)
    w2 = jnp.pad(w2, ((0, 0), (0, P_p - planes),
                      (0, P_p - planes))).astype(jnp.bfloat16)
    g2, b2 = prep_gb(params["g2"], params["b2"])
    y2, sb2 = conv3x3_bn(a1, w2, g2, b2, stride=stride)
    Ho = (H - 1) // stride + 1
    Wo = (W - 1) // stride + 1

    # ---- conv3 (1x1) + bn3 statistics; bn2+ReLU fused into this kernel ------
    g3, b3 = prep_gb(params["g3"], params["b3"])
    y3, sb3 = matmul_bn(y2, sb2, prep_w1x1(params["w3"]), g3, b3,
                        apply_act=True)

    # ---- shortcut ------------------------------------------------------------
    if stride != 1 or Cin != expp:
        # TODO(synk): the strided shortcut gather could be folded into the
        # input BlockSpec instead of a wrapper-side slice.
        xs = xp[:, ::stride, ::stride, :].reshape(N * Ho * Wo, Cin_p)
        gs, bs = prep_gb(params["gs"], params["bs"])
        res, sb_res = matmul_bn(xs, _identity_sb(Cin_p),
                                prep_w1x1(params["ws"]), gs, bs,
                                apply_act=False)
    else:
        assert Cin == expp and Cin_p == E_p, "identity shortcut shape mismatch"
        res, sb_res = x_flat, _identity_sb(E_p)

    # ---- bn3 + residual(bn_s) + final ReLU (output aliases `res`) ----------
    out = bn_add_relu(y3, sb3, res, sb_res)
    out = out.reshape(N, Ho, Wo, E_p)[..., :expp]
    return jnp.transpose(out, (0, 3, 1, 2))          # back to NCHW


# ------------------------------ param init ----------------------------------

def init_bottleneck_params(key, in_planes, planes, stride):
    exp = 4
    ks = jax.random.split(key, 12)

    def conv_w(k, cout, cin, kh, kw):
        fan = cin * kh * kw
        return jax.random.normal(k, (cout, cin, kh, kw), jnp.float32) * (2.0 / fan) ** 0.5

    def bn(kg, kb, c):
        g = 1.0 + 0.1 * jax.random.normal(kg, (c,), jnp.float32)
        b = 0.1 * jax.random.normal(kb, (c,), jnp.float32)
        return g, b

    p = {}
    p["w1"] = conv_w(ks[0], planes, in_planes, 1, 1)
    p["g1"], p["b1"] = bn(ks[1], ks[2], planes)
    p["w2"] = conv_w(ks[3], planes, planes, 3, 3)
    p["g2"], p["b2"] = bn(ks[4], ks[5], planes)
    p["w3"] = conv_w(ks[6], exp * planes, planes, 1, 1)
    p["g3"], p["b3"] = bn(ks[7], ks[8], exp * planes)
    if stride != 1 or in_planes != exp * planes:
        p["ws"] = conv_w(ks[9], exp * planes, in_planes, 1, 1)
        p["gs"], p["bs"] = bn(ks[10], ks[11], exp * planes)
    return p


# --------------------------- pure-JAX reference ------------------------------

def reference_forward(x_nchw, params, stride):
    x = jnp.transpose(x_nchw, (0, 2, 3, 1)).astype(jnp.float32)

    def conv(inp, w_oihw, s, pad):
        w = jnp.transpose(w_oihw, (2, 3, 1, 0)).astype(jnp.bfloat16)
        return lax.conv_general_dilated(
            inp.astype(jnp.bfloat16), w, (s, s), ((pad, pad), (pad, pad)),
            dimension_numbers=("NHWC", "HWIO", "NHWC"),
            preferred_element_type=jnp.float32)

    def bn(y, g, b):
        m = jnp.mean(y, axis=(0, 1, 2), keepdims=True)
        v = jnp.mean(jnp.square(y - m), axis=(0, 1, 2), keepdims=True)
        return (y - m) * lax.rsqrt(v + EPS) * g[None, None, None, :] + b[None, None, None, :]

    out = jax.nn.relu(bn(conv(x, params["w1"], 1, 0), params["g1"], params["b1"]))
    out = jax.nn.relu(bn(conv(out, params["w2"], stride, 1), params["g2"], params["b2"]))
    out = bn(conv(out, params["w3"], 1, 0), params["g3"], params["b3"])
    if "ws" in params:
        sc = bn(conv(x, params["ws"], stride, 0), params["gs"], params["bs"])
    else:
        sc = x
    return jnp.transpose(jax.nn.relu(out + sc), (0, 3, 1, 2))


# ---------------------------------- main -------------------------------------

if __name__ == "__main__":
    in_planes, planes, stride = 4, 4, 2
    N, H, W = 2, 16, 16

    key = jax.random.PRNGKey(0)
    kx, kp = jax.random.split(key)
    x = jax.random.normal(kx, (N, in_planes, H, W), jnp.float32)  # NCHW, like PyTorch
    params = init_bottleneck_params(kp, in_planes, planes, stride)

    fwd = jax.jit(bottleneck_forward, static_argnames=("stride",))
    out = jax.block_until_ready(fwd(x, params, stride=stride))

    expected_shape = (N, 4 * planes, H // stride, W // stride)
    assert out.shape == expected_shape, (out.shape, expected_shape)
    assert bool(jnp.all(out >= 0.0)), "final ReLU violated"
    assert bool(jnp.all(jnp.isfinite(out))), "non-finite output"

    ref = reference_forward(x, params, stride)
    max_err = float(jnp.max(jnp.abs(out - ref)))
    assert max_err < 1e-1, f"mismatch vs JAX reference: {max_err}"

    print("KERNEL_OK")
</pallas_src>

<mosaic_0001>
module attributes {stable_mosaic.version = 11 : i64} {
  func.func @_matmul_bn_kernel(%arg0: i32, %arg1: i32, %arg2: memref<256x128xf32, #tpu.memory_space<vmem>>, %arg3: memref<2x128xf32, #tpu.memory_space<vmem>>, %arg4: memref<128x128xbf16, #tpu.memory_space<vmem>>, %arg5: memref<1x128xf32, #tpu.memory_space<vmem>>, %arg6: memref<1x128xf32, #tpu.memory_space<vmem>>, %arg7: memref<256x128xf32, #tpu.memory_space<vmem>>, %arg8: memref<2x128xf32, #tpu.memory_space<vmem>>, %arg9: memref<2x128xf32, #tpu.memory_space<vmem>>) attributes {dimension_semantics = [#tpu.dimension_semantics<parallel>, #tpu.dimension_semantics<arbitrary>], iteration_bounds = array<i64: 1, 2>, scalar_prefetch = 0 : i64, scratch_operands = 1 : i64, tpu.core_type = #tpu.core_type<tc>, window_params = [{transform_indices = @transform_0, window_bounds = array<i64: 256, 128>}, {pipeline_mode = #tpu.pipeline_mode<synchronous>, transform_indices = @transform_1, window_bounds = array<i64: 2, 128>}, {transform_indices = @transform_2, window_bounds = array<i64: 128, 128>}, {transform_indices = @transform_3, window_bounds = array<i64: 1, 128>}, {transform_indices = @transform_4, window_bounds = array<i64: 1, 128>}, {transform_indices = @transform_5, window_bounds = array<i64: 256, 128>}, {transform_indices = @transform_6, window_bounds = array<i64: 2, 128>}]} {
    %c0 = arith.constant 0 : index
    %c0_0 = arith.constant 0 : index
    %0 = vector.load %arg2[%c0, %c0_0] : memref<256x128xf32, #tpu.memory_space<vmem>>, vector<256x128xf32>
    %1 = arith.truncf %0 : vector<256x128xf32> to vector<256x128xbf16>
    %c0_1 = arith.constant 0 : index
    %c0_2 = arith.constant 0 : index
    %2 = vector.load %arg4[%c0_1, %c0_2] : memref<128x128xbf16, #tpu.memory_space<vmem>>, vector<128x128xbf16>
    %cst = arith.constant dense<0.000000e+00> : vector<256x128xf32>
    %3 = tpu.matmul %1, %2, %cst {dimension_numbers = #tpu.dot_dimension_numbers<[1], [0], [0], [1], [0, 0, 1, 1], [], []>} : vector<256x128xbf16>, vector<128x128xbf16>, vector<256x128xf32> -> vector<256x128xf32>
    %c0_3 = arith.constant 0 : index
    %c0_4 = arith.constant 0 : index
    %4 = vector.load %arg7[%c0_3, %c0_4] : memref<256x128xf32, #tpu.memory_space<vmem>>, vector<256x128xf32>
    tpu.vector_store %arg7[%c0_3, %c0_4], %3 {strides = array<i32>} : memref<256x128xf32, #tpu.memory_space<vmem>>, vector<256x128xf32>,
    %c0_i32 = arith.constant 0 : i32
    %5 = arith.cmpi eq, %arg1, %c0_i32 : i32
    %6 = arith.extui %5 : i1 to i32
    %c0_i32_5 = arith.constant 0 : i32
    %7 = arith.cmpi ne, %6, %c0_i32_5 : i32
    scf.if %7 {
      %cst_16 = arith.constant 0.000000e+00 : f32
      %22 = vector.broadcast %cst_16 : f32 to vector<2x128xf32>
      %c0_17 = arith.constant 0 : index
      %c0_18 = arith.constant 0 : index
      %23 = vector.load %arg9[%c0_17, %c0_18] : memref<2x128xf32, #tpu.memory_space<vmem>>, vector<2x128xf32>
      tpu.vector_store %arg9[%c0_17, %c0_18], %22 {strides = array<i32>} : memref<2x128xf32, #tpu.memory_space<vmem>>, vector<2x128xf32>,
    } else {
    }
    %c0_6 = arith.constant 0 : index
    %c0_7 = arith.constant 0 : index
    %8 = vector.load %arg9[%c0_6, %c0_7] : memref<2x128xf32, #tpu.memory_space<vmem>>, vector<1x128xf32>
    %cst_8 = arith.constant dense<0.000000e+00> : vector<128xf32>
    %9 = vector.multi_reduction <add>, %3, %cst_8 [0] : vector<256x128xf32> to vector<128xf32>
    %10 = vector.shape_cast %9 : vector<128xf32> to vector<1x128xf32>
    %11 = arith.addf %8, %10 : vector<1x128xf32>
    %c0_9 = arith.constant 0 : index
    %c0_10 = arith.constant 0 : index
    %12 = vector.load %arg9[%c0_9, %c0_10] : memref<2x128xf32, #tpu.memory_space<vmem>>, vector<1x128xf32>
    tpu.vector_store %arg9[%c0_9, %c0_10], %11 {strides = array<i32>} : memref<2x128xf32, #tpu.memory_space<vmem>>, vector<1x128xf32>,
    %c1 = arith.constant 1 : index
    %c0_11 = arith.constant 0 : index
    %13 = vector.load %arg9[%c1, %c0_11] : memref<2x128xf32, #tpu.memory_space<vmem>>, vector<1x128xf32>
    %14 = arith.mulf %3, %3 : vector<256x128xf32>
    %cst_12 = arith.constant dense<0.000000e+00> : vector<128xf32>
    %15 = vector.multi_reduction <add>, %14, %cst_12 [0] : vector<256x128xf32> to vector<128xf32>
    %16 = vector.shape_cast %15 : vector<128xf32> to vector<1x128xf32>
    %17 = arith.addf %13, %16 : vector<1x128xf32>
    %c1_13 = arith.constant 1 : index
    %c0_14 = arith.constant 0 : index
    %18 = vector.load %arg9[%c1_13, %c0_14] : memref<2x128xf32, #tpu.memory_space<vmem>>, vector<1x128xf32>
    tpu.vector_store %arg9[%c1_13, %c0_14], %17 {strides = array<i32>} : memref<2x128xf32, #tpu.memory_space<vmem>>, vector<1x128xf32>,
    %c1_i32 = arith.constant 1 : i32
    %19 = arith.cmpi eq, %arg1, %c1_i32 : i32
    %20 = arith.extui %19 : i1 to i32
    %c0_i32_15 = arith.constant 0 : i32
    %21 = arith.cmpi ne, %20, %c0_i32_15 : i32
    scf.if %21 {
      %c0_16 = arith.constant 0 : index
      %c0_17 = arith.constant 0 : index
      %22 = vector.load %arg9[%c0_16, %c0_17] : memref<2x128xf32, #tpu.memory_space<vmem>>, vector<1x128xf32>
      %cst_18 = arith.constant 0.001953125 : f32
      %23 = vector.broadcast %cst_18 : f32 to vector<1x128xf32>
      %24 = arith.mulf %22, %23 : vector<1x128xf32>
      %c1_19 = arith.constant 1 : index
      %c0_20 = arith.constant 0 : index
      %25 = vector.load %arg9[%c1_19, %c0_20] : memref<2x128xf32, #tpu.memory_space<vmem>>, vector<1x128xf32>
      %cst_21 = arith.constant 0.001953125 : f32
      %26 = vector.broadcast %cst_21 : f32 to vector<1x128xf32>
      %27 = arith.mulf %25, %26 : vector<1x128xf32>
      %28 = arith.mulf %24, %24 : vector<1x128xf32>
      %29 = arith.subf %27, %28 : vector<1x128xf32>
      %cst_22 = arith.constant 0.000000e+00 : f32
      %30 = vector.broadcast %cst_22 : f32 to vector<1x128xf32>
      %31 = arith.maximumf %29, %30 : vector<1x128xf32>
      %c0_23 = arith.constant 0 : index
      %c0_24 = arith.constant 0 : index
      %32 = vector.load %arg5[%c0_23, %c0_24] : memref<1x128xf32, #tpu.memory_space<vmem>>, vector<1x128xf32>
      %cst_25 = arith.constant 9.99999974E-6 : f32
      %33 = vector.broadcast %cst_25 : f32 to vector<1x128xf32>
      %34 = arith.addf %31, %33 : vector<1x128xf32>
      %35 = math.rsqrt %34 : vector<1x128xf32>
      %36 = arith.mulf %32, %35 : vector<1x128xf32>
      %c0_26 = arith.constant 0 : index
      %c0_27 = arith.constant 0 : index
      %37 = vector.load %arg8[%c0_26, %c0_27] : memref<2x128xf32, #tpu.memory_space<vmem>>, vector<1x128xf32>
      tpu.vector_store %arg8[%c0_26, %c0_27], %36 {strides = array<i32>} : memref<2x128xf32, #tpu.memory_space<vmem>>, vector<1x128xf32>,
      %c0_28 = arith.constant 0 : index
      %c0_29 = arith.constant 0 : index
      %38 = vector.load %arg6[%c0_28, %c0_29] : memref<1x128xf32, #tpu.memory_space<vmem>>, vector<1x128xf32>
      %39 = arith.mulf %24, %36 : vector<1x128xf32>
      %40 = arith.subf %38, %39 : vector<1x128xf32>
      %c1_30 = arith.constant 1 : index
      %c0_31 = arith.constant 0 : index
      %41 = vector.load %arg8[%c1_30, %c0_31] : memref<2x128xf32, #tpu.memory_space<vmem>>, vector<1x128xf32>
      tpu.vector_store %arg8[%c1_30, %c0_31], %40 {strides = array<i32>} : memref<2x128xf32, #tpu.memory_space<vmem>>, vector<1x128xf32>,
    } else {
    }
    return
  }
  func.func @transform_0(%arg0: i32, %arg1: i32) -> (i32, i32) {
    %c0_i32 = arith.constant 0 : i32
    %c0_i32_0 = arith.constant 0 : i32
    return %arg1, %c0_i32 : i32, i32
  }
  func.func @transform_1(%arg0: i32, %arg1: i32) -> (i32, i32) {
    %c0_i32 = arith.constant 0 : i32
    %c0_i32_0 = arith.constant 0 : i32
    %c0_i32_1 = arith.constant 0 : i32
    return %c0_i32, %c0_i32_0 : i32, i32
  }
  func.func @transform_2(%arg0: i32, %arg1: i32) -> (i32, i32) {
    %c0_i32 = arith.constant 0 : i32
    %c0_i32_0 = arith.constant 0 : i32
    return %c0_i32, %arg0 : i32, i32
  }
  func.func @transform_3(%arg0: i32, %arg1: i32) -> (i32, i32) {
    %c0_i32 = arith.constant 0 : i32
    %c0_i32_0 = arith.constant 0 : i32
    return %c0_i32, %arg0 : i32, i32
  }
  func.func @transform_4(%arg0: i32, %arg1: i32) -> (i32, i32) {
    %c0_i32 = arith.constant 0 : i32
    %c0_i32_0 = arith.constant 0 : i32
    return %c0_i32, %arg0 : i32, i32
  }
  func.func @transform_5(%arg0: i32, %arg1: i32) -> (i32, i32) {
    %c0_i32 = arith.constant 0 : i32
    return %arg1, %arg0 : i32, i32
  }
  func.func @transform_6(%arg0: i32, %arg1: i32) -> (i32, i32) {
    %c0_i32 = arith.constant 0 : i32
    %c0_i32_0 = arith.constant 0 : i32
    return %c0_i32, %arg0 : i32, i32
  }
}

module attributes {stable_mosaic.version = 11 : i64} {
  func.func @_conv3x3_bn_kernel(%arg0: i32, %arg1: i32, %arg2: memref<1x36x9x128xbf16, #tpu.memory_space<vmem>>, %arg3: memref<9x128x128xbf16, #tpu.memory_space<vmem>>, %arg4: memref<1x128xf32, #tpu.memory_space<vmem>>, %arg5: memref<1x128xf32, #tpu.memory_space<vmem>>, %arg6: memref<64x128xf32, #tpu.memory_space<vmem>>, %arg7: memref<2x128xf32, #tpu.memory_space<vmem>>, %arg8: memref<64x128xf32, #tpu.memory_space<vmem>>, %arg9: memref<2x128xf32, #tpu.memory_space<vmem>>) attributes {dimension_semantics = [#tpu.dimension_semantics<parallel>, #tpu.dimension_semantics<arbitrary>], iteration_bounds = array<i64: 1, 2>, scalar_prefetch = 0 : i64, scratch_operands = 2 : i64, tpu.core_type = #tpu.core_type<tc>, window_params = [{transform_indices = @transform_0, window_bounds = array<i64: 1, 36, 9, 128>}, {transform_indices = @transform_1, window_bounds = array<i64: 9, 128, 128>}, {transform_indices = @transform_2, window_bounds = array<i64: 1, 128>}, {transform_indices = @transform_3, window_bounds = array<i64: 1, 128>}, {transform_indices = @transform_4, window_bounds = array<i64: 64, 128>}, {transform_indices = @transform_5, window_bounds = array<i64: 2, 128>}]} {
    %cst = arith.constant 0.000000e+00 : f32
    %0 = vector.broadcast %cst : f32 to vector<64x128xf32>
    %c0 = arith.constant 0 : index
    %c0_0 = arith.constant 0 : index
    %1 = vector.load %arg8[%c0, %c0_0] : memref<64x128xf32, #tpu.memory_space<vmem>>, vector<64x128xf32>
    tpu.vector_store %arg8[%c0, %c0_0], %0 {strides = array<i32>} : memref<64x128xf32, #tpu.memory_space<vmem>>, vector<64x128xf32>,
    %c0_1 = arith.constant 0 : index
    %c0_2 = arith.constant 0 : index
    %c0_3 = arith.constant 0 : index
    %c0_4 = arith.constant 0 : index
    %2 = vector.load %arg2[%c0_1, %c0_2, %c0_3, %c0_4] : memref<1x36x9x128xbf16, #tpu.memory_space<vmem>>, vector<1x8x8x128xbf16>
    %3 = vector.shape_cast %2 : vector<1x8x8x128xbf16> to vector<8x8x128xbf16>
    %4 = vector.shape_cast %3 : vector<8x8x128xbf16> to vector<64x128xbf16>
    %c0_5 = arith.constant 0 : index
    %c0_6 = arith.constant 0 : index
    %5 = vector.load %arg8[%c0_5, %c0_6] : memref<64x128xf32, #tpu.memory_space<vmem>>, vector<64x128xf32>
    %c0_7 = arith.constant 0 : index
    %c0_8 = arith.constant 0 : index
    %c0_9 = arith.constant 0 : index
    %6 = vector.load %arg3[%c0_7, %c0_8, %c0_9] : memref<9x128x128xbf16, #tpu.memory_space<vmem>>, vector<1x128x128xbf16>
    %7 = vector.shape_cast %6 : vector<1x128x128xbf16> to vector<128x128xbf16>
    %cst_10 = arith.constant dense<0.000000e+00> : vector<64x128xf32>
    %8 = tpu.matmul %4, %7, %cst_10 {dimension_numbers = #tpu.dot_dimension_numbers<[1], [0], [0], [1], [0, 0, 1, 1], [], []>} : vector<64x128xbf16>, vector<128x128xbf16>, vector<64x128xf32> -> vector<64x128xf32>
    %9 = arith.addf %5, %8 : vector<64x128xf32>
    %c0_11 = arith.constant 0 : index
    %c0_12 = arith.constant 0 : index
    %10 = vector.load %arg8[%c0_11, %c0_12] : memref<64x128xf32, #tpu.memory_space<vmem>>, vector<64x128xf32>
    tpu.vector_store %arg8[%c0_11, %c0_12], %9 {strides = array<i32>} : memref<64x128xf32, #tpu.memory_space<vmem>>, vector<64x128xf32>,
    %c0_13 = arith.constant 0 : index
    %c9 = arith.constant 9 : index
    %c0_14 = arith.constant 0 : index
    %c0_15 = arith.constant 0 : index
    %11 = vector.load %arg2[%c0_13, %c9, %c0_14, %c0_15] : memref<1x36x9x128xbf16, #tpu.memory_space<vmem>>, vector<1x8x8x128xbf16>
    %12 = vector.shape_cast %11 : vector<1x8x8x128xbf16> to vector<8x8x128xbf16>
    %13 = vector.shape_cast %12 : vector<8x8x128xbf16> to vector<64x128xbf16>
    %c0_16 = arith.constant 0 : index
    %c0_17 = arith.constant 0 : index
    %14 = vector.load %arg8[%c0_16, %c0_17] : memref<64x128xf32, #tpu.memory_space<vmem>>, vector<64x128xf32>
    %c1 = arith.constant 1 : index
    %c0_18 = arith.constant 0 : index
    %c0_19 = arith.constant 0 : index
    %15 = vector.load %arg3[%c1, %c0_18, %c0_19] : memref<9x128x128xbf16, #tpu.memory_space<vmem>>, vector<1x128x128xbf16>
    %16 = vector.shape_cast %15 : vector<1x128x128xbf16> to vector<128x128xbf16>
    %cst_20 = arith.constant dense<0.000000e+00> : vector<64x128xf32>
    %17 = tpu.matmul %13, %16, %cst_20 {dimension_numbers = #tpu.dot_dimension_numbers<[1], [0], [0], [1], [0, 0, 1, 1], [], []>} : vector<64x128xbf16>, vector<128x128xbf16>, vector<64x128xf32> -> vector<64x128xf32>
    %18 = arith.addf %14, %17 : vector<64x128xf32>
    %c0_21 = arith.constant 0 : index
    %c0_22 = arith.constant 0 : index
    %19 = vector.load %arg8[%c0_21, %c0_22] : memref<64x128xf32, #tpu.memory_space<vmem>>, vector<64x128xf32>
    tpu.vector_store %arg8[%c0_21, %c0_22], %18 {strides = array<i32>} : memref<64x128xf32, #tpu.memory_space<vmem>>, vector<64x128xf32>,
    %c0_23 = arith.constant 0 : index
    %c0_24 = arith.constant 0 : index
    %c1_25 = arith.constant 1 : index
    %c0_26 = arith.constant 0 : index
    %20 = vector.load %arg2[%c0_23, %c0_24, %c1_25, %c0_26] : memref<1x36x9x128xbf16, #tpu.memory_space<vmem>>, vector<1x8x8x128xbf16>
    %21 = vector.shape_cast %20 : vector<1x8x8x128xbf16> to vector<8x8x128xbf16>
    %22 = vector.shape_cast %21 : vector<8x8x128xbf16> to vector<64x128xbf16>
    %c0_27 = arith.constant 0 : index
    %c0_28 = arith.constant 0 : index
    %23 = vector.load %arg8[%c0_27, %c0_28] : memref<64x128xf32, #tpu.memory_space<vmem>>, vector<64x128xf32>
    %c2 = arith.constant 2 : index
    %c0_29 = arith.constant 0 : index
    %c0_30 = arith.constant 0 : index
    %24 = vector.load %arg3[%c2, %c0_29, %c0_30] : memref<9x128x128xbf16, #tpu.memory_space<vmem>>, vector<1x128x128xbf16>
    %25 = vector.shape_cast %24 : vector<1x128x128xbf16> to vector<128x128xbf16>
    %cst_31 = arith.constant dense<0.000000e+00> : vector<64x128xf32>
    %26 = tpu.matmul %22, %25, %cst_31 {dimension_numbers = #tpu.dot_dimension_numbers<[1], [0], [0], [1], [0, 0, 1, 1], [], []>} : vector<64x128xbf16>, vector<128x128xbf16>, vector<64x128xf32> -> vector<64x128xf32>
    %27 = arith.addf %23, %26 : vector<64x128xf32>
    %c0_32 = arith.constant 0 : index
    %c0_33 = arith.constant 0 : index
    %28 = vector.load %arg8[%c0_32, %c0_33] : memref<64x128xf32, #tpu.memory_space<vmem>>, vector<64x128xf32>
    tpu.vector_store %arg8[%c0_32, %c0_33], %27 {strides = array<i32>} : memref<64x128xf32, #tpu.memory_space<vmem>>, vector<64x128xf32>,
    %c0_34 = arith.constant 0 : index
    %c18 = arith.constant 18 : index
    %c0_35 = arith.constant 0 : index
    %c0_36 = arith.constant 0 : index
    %29 = vector.load %arg2[%c0_34, %c18, %c0_35, %c0_36] : memref<1x36x9x128xbf16, #tpu.memory_space<vmem>>, vector<1x8x8x128xbf16>
    %30 = vector.shape_cast %29 : vector<1x8x8x128xbf16> to vector<8x8x128xbf16>
    %31 = vector.shape_cast %30 : vector<8x8x128xbf16> to vector<64x128xbf16>
    %c0_37 = arith.constant 0 : index
    %c0_38 = arith.constant 0 : index
    %32 = vector.load %arg8[%c0_37, %c0_38] : memref<64x128xf32, #tpu.memory_space<vmem>>, vector<64x128xf32>
    %c3 = arith.constant 3 : index
    %c0_39 = arith.constant 0 : index
    %c0_40 = arith.constant 0 : index
    %33 = vector.load %arg3[%c3, %c0_39, %c0_40] : memref<9x128x128xbf16, #tpu.memory_space<vmem>>, vector<1x128x128xbf16>
    %34 = vector.shape_cast %33 : vector<1x128x128xbf16> to vector<128x128xbf16>
    %cst_41 = arith.constant dense<0.000000e+00> : vector<64x128xf32>
    %35 = tpu.matmul %31, %34, %cst_41 {dimension_numbers = #tpu.dot_dimension_numbers<[1], [0], [0], [1], [0, 0, 1, 1], [], []>} : vector<64x128xbf16>, vector<128x128xbf16>, vector<64x128xf32> -> vector<64x128xf32>
    %36 = arith.addf %32, %35 : vector<64x128xf32>
    %c0_42 = arith.constant 0 : index
    %c0_43 = arith.constant 0 : index
    %37 = vector.load %arg8[%c0_42, %c0_43] : memref<64x128xf32, #tpu.memory_space<vmem>>, vector<64x128xf32>
    tpu.vector_store %arg8[%c0_42, %c0_43], %36 {strides = array<i32>} : memref<64x128xf32, #tpu.memory_space<vmem>>, vector<64x128xf32>,
    %c0_44 = arith.constant 0 : index
    %c27 = arith.constant 27 : index
    %c0_45 = arith.constant 0 : index
    %c0_46 = arith.constant 0 : index
    %38 = vector.load %arg2[%c0_44, %c27, %c0_45, %c0_46] : memref<1x36x9x128xbf16, #tpu.memory_space<vmem>>, vector<1x8x8x128xbf16>
    %39 = vector.shape_cast %38 : vector<1x8x8x128xbf16> to vector<8x8x128xbf16>
    %40 = vector.shape_cast %39 : vector<8x8x128xbf16> to vector<64x128xbf16>
    %c0_47 = arith.constant 0 : index
    %c0_48 = arith.constant 0 : index
    %41 = vector.load %arg8[%c0_47, %c0_48] : memref<64x128xf32, #tpu.memory_space<vmem>>, vector<64x128xf32>
    %c4 = arith.constant 4 : index
    %c0_49 = arith.constant 0 : index
    %c0_50 = arith.constant 0 : index
    %42 = vector.load %arg3[%c4, %c0_49, %c0_50] : memref<9x128x128xbf16, #tpu.memory_space<vmem>>, vector<1x128x128xbf16>
    %43 = vector.shape_cast %42 : vector<1x128x128xbf16> to vector<128x128xbf16>
    %cst_51 = arith.constant dense<0.000000e+00> : vector<64x128xf32>
    %44 = tpu.matmul %40, %43, %cst_51 {dimension_numbers = #tpu.dot_dimension_numbers<[1], [0], [0], [1], [0, 0, 1, 1], [], []>} : vector<64x128xbf16>, vector<128x128xbf16>, vector<64x128xf32> -> vector<64x128xf32>
    %45 = arith.addf %41, %44 : vector<64x128xf32>
    %c0_52 = arith.constant 0 : index
    %c0_53 = arith.constant 0 : index
    %46 = vector.load %arg8[%c0_52, %c0_53] : memref<64x128xf32, #tpu.memory_space<vmem>>, vector<64x128xf32>
    tpu.vector_store %arg8[%c0_52, %c0_53], %45 {strides = array<i32>} : memref<64x128xf32, #tpu.memory_space<vmem>>, vector<64x128xf32>,
    %c0_54 = arith.constant 0 : index
    %c18_55 = arith.constant 18 : index
    %c1_56 = arith.constant 1 : index
    %c0_57 = arith.constant 0 : index
    %47 = vector.load %arg2[%c0_54, %c18_55, %c1_56, %c0_57] : memref<1x36x9x128xbf16, #tpu.memory_space<vmem>>, vector<1x8x8x128xbf16>
    %48 = vector.shape_cast %47 : vector<1x8x8x128xbf16> to vector<8x8x128xbf16>
    %49 = vector.shape_cast %48 : vector<8x8x128xbf16> to vector<64x128xbf16>
    %c0_58 = arith.constant 0 : index
    %c0_59 = arith.constant 0 : index
    %50 = vector.load %arg8[%c0_58, %c0_59] : memref<64x128xf32, #tpu.memory_space<vmem>>, vector<64x128xf32>
    %c5 = arith.constant 5 : index
    %c0_60 = arith.constant 0 : index
    %c0_61 = arith.constant 0 : index
    %51 = vector.load %arg3[%c5, %c0_60, %c0_61] : memref<9x128x128xbf16, #tpu.memory_space<vmem>>, vector<1x128x128xbf16>
    %52 = vector.shape_cast %51 : vector<1x128x128xbf16> to vector<128x128xbf16>
    %cst_62 = arith.constant dense<0.000000e+00> : vector<64x128xf32>
    %53 = tpu.matmul %49, %52, %cst_62 {dimension_numbers = #tpu.dot_dimension_numbers<[1], [0], [0], [1], [0, 0, 1, 1], [], []>} : vector<64x128xbf16>, vector<128x128xbf16>, vector<64x128xf32> -> vector<64x128xf32>
    %54 = arith.addf %50, %53 : vector<64x128xf32>
    %c0_63 = arith.constant 0 : index
    %c0_64 = arith.constant 0 : index
    %55 = vector.load %arg8[%c0_63, %c0_64] : memref<64x128xf32, #tpu.memory_space<vmem>>, vector<64x128xf32>
    tpu.vector_store %arg8[%c0_63, %c0_64], %54 {strides = array<i32>} : memref<64x128xf32, #tpu.memory_space<vmem>>, vector<64x128xf32>,
    %c0_65 = arith.constant 0 : index
    %c1_66 = arith.constant 1 : index
    %c0_67 = arith.constant 0 : index
    %c0_68 = arith.constant 0 : index
    %56 = vector.load %arg2[%c0_65, %c1_66, %c0_67, %c0_68] : memref<1x36x9x128xbf16, #tpu.memory_space<vmem>>, vector<1x8x8x128xbf16>
    %57 = vector.shape_cast %56 : vector<1x8x8x128xbf16> to vector<8x8x128xbf16>
    %58 = vector.shape_cast %57 : vector<8x8x128xbf16> to vector<64x128xbf16>
    %c0_69 = arith.constant 0 : index
    %c0_70 = arith.constant 0 : index
    %59 = vector.load %arg8[%c0_69, %c0_70] : memref<64x128xf32, #tpu.memory_space<vmem>>, vector<64x128xf32>
    %c6 = arith.constant 6 : index
    %c0_71 = arith.constant 0 : index
    %c0_72 = arith.constant 0 : index
    %60 = vector.load %arg3[%c6, %c0_71, %c0_72] : memref<9x128x128xbf16, #tpu.memory_space<vmem>>, vector<1x128x128xbf16>
    %61 = vector.shape_cast %60 : vector<1x128x128xbf16> to vector<128x128xbf16>
    %cst_73 = arith.constant dense<0.000000e+00> : vector<64x128xf32>
    %62 = tpu.matmul %58, %61, %cst_73 {dimension_numbers = #tpu.dot_dimension_numbers<[1], [0], [0], [1], [0, 0, 1, 1], [], []>} : vector<64x128xbf16>, vector<128x128xbf16>, vector<64x128xf32> -> vector<64x128xf32>
    %63 = arith.addf %59, %62 : vector<64x128xf32>
    %c0_74 = arith.constant 0 : index
    %c0_75 = arith.constant 0 : index
    %64 = vector.load %arg8[%c0_74, %c0_75] : memref<64x128xf32, #tpu.memory_space<vmem>>, vector<64x128xf32>
    tpu.vector_store %arg8[%c0_74, %c0_75], %63 {strides = array<i32>} : memref<64x128xf32, #tpu.memory_space<vmem>>, vector<64x128xf32>,
    %c0_76 = arith.constant 0 : index
    %c10 = arith.constant 10 : index
    %c0_77 = arith.constant 0 : index
    %c0_78 = arith.constant 0 : index
    %65 = vector.load %arg2[%c0_76, %c10, %c0_77, %c0_78] : memref<1x36x9x128xbf16, #tpu.memory_space<vmem>>, vector<1x8x8x128xbf16>
    %66 = vector.shape_cast %65 : vector<1x8x8x128xbf16> to vector<8x8x128xbf16>
    %67 = vector.shape_cast %66 : vector<8x8x128xbf16> to vector<64x128xbf16>
    %c0_79 = arith.constant 0 : index
    %c0_80 = arith.constant 0 : index
    %68 = vector.load %arg8[%c0_79, %c0_80] : memref<64x128xf32, #tpu.memory_space<vmem>>, vector<64x128xf32>
    %c7 = arith.constant 7 : index
    %c0_81 = arith.constant 0 : index
    %c0_82 = arith.constant 0 : index
    %69 = vector.load %arg3[%c7, %c0_81, %c0_82] : memref<9x128x128xbf16, #tpu.memory_space<vmem>>, vector<1x128x128xbf16>
    %70 = vector.shape_cast %69 : vector<1x128x128xbf16> to vector<128x128xbf16>
    %cst_83 = arith.constant dense<0.000000e+00> : vector<64x128xf32>
    %71 = tpu.matmul %67, %70, %cst_83 {dimension_numbers = #tpu.dot_dimension_numbers<[1], [0], [0], [1], [0, 0, 1, 1], [], []>} : vector<64x128xbf16>, vector<128x128xbf16>, vector<64x128xf32> -> vector<64x128xf32>
    %72 = arith.addf %68, %71 : vector<64x128xf32>
    %c0_84 = arith.constant 0 : index
    %c0_85 = arith.constant 0 : index
    %73 = vector.load %arg8[%c0_84, %c0_85] : memref<64x128xf32, #tpu.memory_space<vmem>>, vector<64x128xf32>
    tpu.vector_store %arg8[%c0_84, %c0_85], %72 {strides = array<i32>} : memref<64x128xf32, #tpu.memory_space<vmem>>, vector<64x128xf32>,
    %c0_86 = arith.constant 0 : index
    %c1_87 = arith.constant 1 : index
    %c1_88 = arith.constant 1 : index
    %c0_89 = arith.constant 0 : index
    %74 = vector.load %arg2[%c0_86, %c1_87, %c1_88, %c0_89] : memref<1x36x9x128xbf16, #tpu.memory_space<vmem>>, vector<1x8x8x128xbf16>
    %75 = vector.shape_cast %74 : vector<1x8x8x128xbf16> to vector<8x8x128xbf16>
    %76 = vector.shape_cast %75 : vector<8x8x128xbf16> to vector<64x128xbf16>
    %c0_90 = arith.constant 0 : index
    %c0_91 = arith.constant 0 : index
    %77 = vector.load %arg8[%c0_90, %c0_91] : memref<64x128xf32, #tpu.memory_space<vmem>>, vector<64x128xf32>
    %c8 = arith.constant 8 : index
    %c0_92 = arith.constant 0 : index
    %c0_93 = arith.constant 0 : index
    %78 = vector.load %arg3[%c8, %c0_92, %c0_93] : memref<9x128x128xbf16, #tpu.memory_space<vmem>>, vector<1x128x128xbf16>
    %79 = vector.shape_cast %78 : vector<1x128x128xbf16> to vector<128x128xbf16>
    %cst_94 = arith.constant dense<0.000000e+00> : vector<64x128xf32>
    %80 = tpu.matmul %76, %79, %cst_94 {dimension_numbers = #tpu.dot_dimension_numbers<[1], [0], [0], [1], [0, 0, 1, 1], [], []>} : vector<64x128xbf16>, vector<128x128xbf16>, vector<64x128xf32> -> vector<64x128xf32>
    %81 = arith.addf %77, %80 : vector<64x128xf32>
    %c0_95 = arith.constant 0 : index
    %c0_96 = arith.constant 0 : index
    %82 = vector.load %arg8[%c0_95, %c0_96] : memref<64x128xf32, #tpu.memory_space<vmem>>, vector<64x128xf32>
    tpu.vector_store %arg8[%c0_95, %c0_96], %81 {strides = array<i32>} : memref<64x128xf32, #tpu.memory_space<vmem>>, vector<64x128xf32>,
    %c0_97 = arith.constant 0 : index
    %c0_98 = arith.constant 0 : index
    %83 = vector.load %arg8[%c0_97, %c0_98] : memref<64x128xf32, #tpu.memory_space<vmem>>, vector<64x128xf32>
    %c0_99 = arith.constant 0 : index
    %c0_100 = arith.constant 0 : index
    %84 = vector.load %arg6[%c0_99, %c0_100] : memref<64x128xf32, #tpu.memory_space<vmem>>, vector<64x128xf32>
    tpu.vector_store %arg6[%c0_99, %c0_100], %83 {strides = array<i32>} : memref<64x128xf32, #tpu.memory_space<vmem>>, vector<64x128xf32>,
    %c0_i32 = arith.constant 0 : i32
    %85 = arith.cmpi eq, %arg1, %c0_i32 : i32
    %86 = arith.extui %85 : i1 to i32
    %c0_i32_101 = arith.constant 0 : i32
    %87 = arith.cmpi ne, %86, %c0_i32_101 : i32
    scf.if %87 {
      %cst_113 = arith.constant 0.000000e+00 : f32
      %102 = vector.broadcast %cst_113 : f32 to vector<2x128xf32>
      %c0_114 = arith.constant 0 : index
      %c0_115 = arith.constant 0 : index
      %103 = vector.load %arg9[%c0_114, %c0_115] : memref<2x128xf32, #tpu.memory_space<vmem>>, vector<2x128xf32>
      tpu.vector_store %arg9[%c0_114, %c0_115], %102 {strides = array<i32>} : memref<2x128xf32, #tpu.memory_space<vmem>>, vector<2x128xf32>,
    } else {
    }
    %c0_102 = arith.constant 0 : index
    %c0_103 = arith.constant 0 : index
    %88 = vector.load %arg9[%c0_102, %c0_103] : memref<2x128xf32, #tpu.memory_space<vmem>>, vector<1x128xf32>
    %cst_104 = arith.constant dense<0.000000e+00> : vector<128xf32>
    %89 = vector.multi_reduction <add>, %83, %cst_104 [0] : vector<64x128xf32> to vector<128xf32>
    %90 = vector.shape_cast %89 : vector<128xf32> to vector<1x128xf32>
    %91 = arith.addf %88, %90 : vector<1x128xf32>
    %c0_105 = arith.constant 0 : index
    %c0_106 = arith.constant 0 : index
    %92 = vector.load %arg9[%c0_105, %c0_106] : memref<2x128xf32, #tpu.memory_space<vmem>>, vector<1x128xf32>
    tpu.vector_store %arg9[%c0_105, %c0_106], %91 {strides = array<i32>} : memref<2x128xf32, #tpu.memory_space<vmem>>, vector<1x128xf32>,
    %c1_107 = arith.constant 1 : index
    %c0_108 = arith.constant 0 : index
    %93 = vector.load %arg9[%c1_107, %c0_108] : memref<2x128xf32, #tpu.memory_space<vmem>>, vector<1x128xf32>
    %94 = arith.mulf %83, %83 : vector<64x128xf32>
    %cst_109 = arith.constant dense<0.000000e+00> : vector<128xf32>
    %95 = vector.multi_reduction <add>, %94, %cst_109 [0] : vector<64x128xf32> to vector<128xf32>
    %96 = vector.shape_cast %95 : vector<128xf32> to vector<1x128xf32>
    %97 = arith.addf %93, %96 : vector<1x128xf32>
    %c1_110 = arith.constant 1 : index
    %c0_111 = arith.constant 0 : index
    %98 = vector.load %arg9[%c1_110, %c0_111] : memref<2x128xf32, #tpu.memory_space<vmem>>, vector<1x128xf32>
    tpu.vector_store %arg9[%c1_110, %c0_111], %97 {strides = array<i32>} : memref<2x128xf32, #tpu.memory_space<vmem>>, vector<1x128xf32>,
    %c1_i32 = arith.constant 1 : i32
    %99 = arith.cmpi eq, %arg1, %c1_i32 : i32
    %100 = arith.extui %99 : i1 to i32
    %c0_i32_112 = arith.constant 0 : i32
    %101 = arith.cmpi ne, %100, %c0_i32_112 : i32
    scf.if %101 {
      %c0_113 = arith.constant 0 : index
      %c0_114 = arith.constant 0 : index
      %102 = vector.load %arg9[%c0_113, %c0_114] : memref<2x128xf32, #tpu.memory_space<vmem>>, vector<1x128xf32>
      %cst_115 = arith.constant 7.812500e-03 : f32
      %103 = vector.broadcast %cst_115 : f32 to vector<1x128xf32>
      %104 = arith.mulf %102, %103 : vector<1x128xf32>
      %c1_116 = arith.constant 1 : index
      %c0_117 = arith.constant 0 : index
      %105 = vector.load %arg9[%c1_116, %c0_117] : memref<2x128xf32, #tpu.memory_space<vmem>>, vector<1x128xf32>
      %cst_118 = arith.constant 7.812500e-03 : f32
      %106 = vector.broadcast %cst_118 : f32 to vector<1x128xf32>
      %107 = arith.mulf %105, %106 : vector<1x128xf32>
      %108 = arith.mulf %104, %104 : vector<1x128xf32>
      %109 = arith.subf %107, %108 : vector<1x128xf32>
      %cst_119 = arith.constant 0.000000e+00 : f32
      %110 = vector.broadcast %cst_119 : f32 to vector<1x128xf32>
      %111 = arith.maximumf %109, %110 : vector<1x128xf32>
      %c0_120 = arith.constant 0 : index
      %c0_121 = arith.constant 0 : index
      %112 = vector.load %arg4[%c0_120, %c0_121] : memref<1x128xf32, #tpu.memory_space<vmem>>, vector<1x128xf32>
      %cst_122 = arith.constant 9.99999974E-6 : f32
      %113 = vector.broadcast %cst_122 : f32 to vector<1x128xf32>
      %114 = arith.addf %111, %113 : vector<1x128xf32>
      %115 = math.rsqrt %114 : vector<1x128xf32>
      %116 = arith.mulf %112, %115 : vector<1x128xf32>
      %c0_123 = arith.constant 0 : index
      %c0_124 = arith.constant 0 : index
      %117 = vector.load %arg7[%c0_123, %c0_124] : memref<2x128xf32, #tpu.memory_space<vmem>>, vector<1x128xf32>
      tpu.vector_store %arg7[%c0_123, %c0_124], %116 {strides = array<i32>} : memref<2x128xf32, #tpu.memory_space<vmem>>, vector<1x128xf32>,
      %c0_125 = arith.constant 0 : index
      %c0_126 = arith.constant 0 : index
      %118 = vector.load %arg5[%c0_125, %c0_126] : memref<1x128xf32, #tpu.memory_space<vmem>>, vector<1x128xf32>
      %119 = arith.mulf %104, %116 : vector<1x128xf32>
      %120 = arith.subf %118, %119 : vector<1x128xf32>
      %c1_127 = arith.constant 1 : index
      %c0_128 = arith.constant 0 : index
      %121 = vector.load %arg7[%c1_127, %c0_128] : memref<2x128xf32, #tpu.memory_space<vmem>>, vector<1x128xf32>
      tpu.vector_store %arg7[%c1_127, %c0_128], %120 {strides = array<i32>} : memref<2x128xf32, #tpu.memory_space<vmem>>, vector<1x128xf32>,
    } else {
    }
    return
  }
  func.func @transform_0(%arg0: i32, %arg1: i32) -> (i32, i32, i32, i32) {
    %c0_i32 = arith.constant 0 : i32
    %c0_i32_0 = arith.constant 0 : i32
    %c0_i32_1 = arith.constant 0 : i32
    %c0_i32_2 = arith.constant 0 : i32
    return %arg1, %c0_i32, %c0_i32_0, %c0_i32_1 : i32, i32, i32, i32
  }
  func.func @transform_1(%arg0: i32, %arg1: i32) -> (i32, i32, i32) {
    %c0_i32 = arith.constant 0 : i32
    %c0_i32_0 = arith.constant 0 : i32
    %c0_i32_1 = arith.constant 0 : i32
    return %c0_i32, %c0_i32_0, %arg0 : i32, i32, i32
  }
  func.func @transform_2(%arg0: i32, %arg1: i32) -> (i32, i32) {
    %c0_i32 = arith.constant 0 : i32
    %c0_i32_0 = arith.constant 0 : i32
    return %c0_i32, %arg0 : i32, i32
  }
  func.func @transform_3(%arg0: i32, %arg1: i32) -> (i32, i32) {
    %c0_i32 = arith.constant 0 : i32
    %c0_i32_0 = arith.constant 0 : i32
    return %c0_i32, %arg0 : i32, i32
  }
  func.func @transform_4(%arg0: i32, %arg1: i32) -> (i32, i32) {
    %c0_i32 = arith.constant 0 : i32
    return %arg1, %arg0 : i32, i32
  }
  func.func @transform_5(%arg0: i32, %arg1: i32) -> (i32, i32) {
    %c0_i32 = arith.constant 0 : i32
    %c0_i32_0 = arith.constant 0 : i32
    return %c0_i32, %arg0 : i32, i32
  }
}

module attributes {stable_mosaic.version = 11 : i64} {
  func.func @_matmul_bn_kernel(%arg0: i32, %arg1: i32, %arg2: memref<128x128xf32, #tpu.memory_space<vmem>>, %arg3: memref<2x128xf32, #tpu.memory_space<vmem>>, %arg4: memref<128x128xbf16, #tpu.memory_space<vmem>>, %arg5: memref<1x128xf32, #tpu.memory_space<vmem>>, %arg6: memref<1x128xf32, #tpu.memory_space<vmem>>, %arg7: memref<128x128xf32, #tpu.memory_space<vmem>>, %arg8: memref<2x128xf32, #tpu.memory_space<vmem>>, %arg9: memref<2x128xf32, #tpu.memory_space<vmem>>) attributes {dimension_semantics = [#tpu.dimension_semantics<parallel>, #tpu.dimension_semantics<arbitrary>], iteration_bounds = array<i64: 1, 1>, scalar_prefetch = 0 : i64, scratch_operands = 1 : i64, tpu.core_type = #tpu.core_type<tc>, window_params = [{transform_indices = @transform_0, window_bounds = array<i64: 128, 128>}, {pipeline_mode = #tpu.pipeline_mode<synchronous>, transform_indices = @transform_1, window_bounds = array<i64: 2, 128>}, {transform_indices = @transform_2, window_bounds = array<i64: 128, 128>}, {transform_indices = @transform_3, window_bounds = array<i64: 1, 128>}, {transform_indices = @transform_4, window_bounds = array<i64: 1, 128>}, {transform_indices = @transform_5, window_bounds = array<i64: 128, 128>}, {transform_indices = @transform_6, window_bounds = array<i64: 2, 128>}]} {
    %c0 = arith.constant 0 : index
    %c0_0 = arith.constant 0 : index
    %0 = vector.load %arg2[%c0, %c0_0] : memref<128x128xf32, #tpu.memory_space<vmem>>, vector<128x128xf32>
    %c0_1 = arith.constant 0 : index
    %c0_2 = arith.constant 0 : index
    %1 = vector.load %arg3[%c0_1, %c0_2] : memref<2x128xf32, #tpu.memory_space<vmem>>, vector<1x128xf32>
    %2 = vector.broadcast %1 : vector<1x128xf32> to vector<128x128xf32>
    %3 = arith.mulf %0, %2 : vector<128x128xf32>
    %c1 = arith.constant 1 : index
    %c0_3 = arith.constant 0 : index
    %4 = vector.load %arg3[%c1, %c0_3] : memref<2x128xf32, #tpu.memory_space<vmem>>, vector<1x128xf32>
    %5 = vector.broadcast %4 : vector<1x128xf32> to vector<128x128xf32>
    %6 = arith.addf %3, %5 : vector<128x128xf32>
    %cst = arith.constant 0.000000e+00 : f32
    %7 = vector.broadcast %cst : f32 to vector<128x128xf32>
    %8 = arith.maximumf %6, %7 : vector<128x128xf32>
    %9 = arith.truncf %8 : vector<128x128xf32> to vector<128x128xbf16>
    %c0_4 = arith.constant 0 : index
    %c0_5 = arith.constant 0 : index
    %10 = vector.load %arg4[%c0_4, %c0_5] : memref<128x128xbf16, #tpu.memory_space<vmem>>, vector<128x128xbf16>
    %cst_6 = arith.constant dense<0.000000e+00> : vector<128x128xf32>
    %11 = tpu.matmul %9, %10, %cst_6 {dimension_numbers = #tpu.dot_dimension_numbers<[1], [0], [0], [1], [0, 0, 1, 1], [], []>} : vector<128x128xbf16>, vector<128x128xbf16>, vector<128x128xf32> -> vector<128x128xf32>
    %c0_7 = arith.constant 0 : index
    %c0_8 = arith.constant 0 : index
    %12 = vector.load %arg7[%c0_7, %c0_8] : memref<128x128xf32, #tpu.memory_space<vmem>>, vector<128x128xf32>
    tpu.vector_store %arg7[%c0_7, %c0_8], %11 {strides = array<i32>} : memref<128x128xf32, #tpu.memory_space<vmem>>, vector<128x128xf32>,
    %c0_i32 = arith.constant 0 : i32
    %13 = arith.cmpi eq, %arg1, %c0_i32 : i32
    %14 = arith.extui %13 : i1 to i32
    %c0_i32_9 = arith.constant 0 : i32
    %15 = arith.cmpi ne, %14, %c0_i32_9 : i32
    scf.if %15 {
      %cst_22 = arith.constant 0.000000e+00 : f32
      %30 = vector.broadcast %cst_22 : f32 to vector<2x128xf32>
      %c0_23 = arith.constant 0 : index
      %c0_24 = arith.constant 0 : index
      %31 = vector.load %arg9[%c0_23, %c0_24] : memref<2x128xf32, #tpu.memory_space<vmem>>, vector<2x128xf32>
      tpu.vector_store %arg9[%c0_23, %c0_24], %30 {strides = array<i32>} : memref<2x128xf32, #tpu.memory_space<vmem>>, vector<2x128xf32>,
    } else {
    }
    %c0_10 = arith.constant 0 : index
    %c0_11 = arith.constant 0 : index
    %16 = vector.load %arg9[%c0_10, %c0_11] : memref<2x128xf32, #tpu.memory_space<vmem>>, vector<1x128xf32>
    %cst_12 = arith.constant dense<0.000000e+00> : vector<128xf32>
    %17 = vector.multi_reduction <add>, %11, %cst_12 [0] : vector<128x128xf32> to vector<128xf32>
    %18 = vector.shape_cast %17 : vector<128xf32> to vector<1x128xf32>
    %19 = arith.addf %16, %18 : vector<1x128xf32>
    %c0_13 = arith.constant 0 : index
    %c0_14 = arith.constant 0 : index
    %20 = vector.load %arg9[%c0_13, %c0_14] : memref<2x128xf32, #tpu.memory_space<vmem>>, vector<1x128xf32>
    tpu.vector_store %arg9[%c0_13, %c0_14], %19 {strides = array<i32>} : memref<2x128xf32, #tpu.memory_space<vmem>>, vector<1x128xf32>,
    %c1_15 = arith.constant 1 : index
    %c0_16 = arith.constant 0 : index
    %21 = vector.load %arg9[%c1_15, %c0_16] : memref<2x128xf32, #tpu.memory_space<vmem>>, vector<1x128xf32>
    %22 = arith.mulf %11, %11 : vector<128x128xf32>
    %cst_17 = arith.constant dense<0.000000e+00> : vector<128xf32>
    %23 = vector.multi_reduction <add>, %22, %cst_17 [0] : vector<128x128xf32> to vector<128xf32>
    %24 = vector.shape_cast %23 : vector<128xf32> to vector<1x128xf32>
    %25 = arith.addf %21, %24 : vector<1x128xf32>
    %c1_18 = arith.constant 1 : index
    %c0_19 = arith.constant 0 : index
    %26 = vector.load %arg9[%c1_18, %c0_19] : memref<2x128xf32, #tpu.memory_space<vmem>>, vector<1x128xf32>
    tpu.vector_store %arg9[%c1_18, %c0_19], %25 {strides = array<i32>} : memref<2x128xf32, #tpu.memory_space<vmem>>, vector<1x128xf32>,
    %c0_i32_20 = arith.constant 0 : i32
    %27 = arith.cmpi eq, %arg1, %c0_i32_20 : i32
    %28 = arith.extui %27 : i1 to i32
    %c0_i32_21 = arith.constant 0 : i32
    %29 = arith.cmpi ne, %28, %c0_i32_21 : i32
    scf.if %29 {
      %c0_22 = arith.constant 0 : index
      %c0_23 = arith.constant 0 : index
      %30 = vector.load %arg9[%c0_22, %c0_23] : memref<2x128xf32, #tpu.memory_space<vmem>>, vector<1x128xf32>
      %cst_24 = arith.constant 7.812500e-03 : f32
      %31 = vector.broadcast %cst_24 : f32 to vector<1x128xf32>
      %32 = arith.mulf %30, %31 : vector<1x128xf32>
      %c1_25 = arith.constant 1 : index
      %c0_26 = arith.constant 0 : index
      %33 = vector.load %arg9[%c1_25, %c0_26] : memref<2x128xf32, #tpu.memory_space<vmem>>, vector<1x128xf32>
      %cst_27 = arith.constant 7.812500e-03 : f32
      %34 = vector.broadcast %cst_27 : f32 to vector<1x128xf32>
      %35 = arith.mulf %33, %34 : vector<1x128xf32>
      %36 = arith.mulf %32, %32 : vector<1x128xf32>
      %37 = arith.subf %35, %36 : vector<1x128xf32>
      %cst_28 = arith.constant 0.000000e+00 : f32
      %38 = vector.broadcast %cst_28 : f32 to vector<1x128xf32>
      %39 = arith.maximumf %37, %38 : vector<1x128xf32>
      %c0_29 = arith.constant 0 : index
      %c0_30 = arith.constant 0 : index
      %40 = vector.load %arg5[%c0_29, %c0_30] : memref<1x128xf32, #tpu.memory_space<vmem>>, vector<1x128xf32>
      %cst_31 = arith.constant 9.99999974E-6 : f32
      %41 = vector.broadcast %cst_31 : f32 to vector<1x128xf32>
      %42 = arith.addf %39, %41 : vector<1x128xf32>
      %43 = math.rsqrt %42 : vector<1x128xf32>
      %44 = arith.mulf %40, %43 : vector<1x128xf32>
      %c0_32 = arith.constant 0 : index
      %c0_33 = arith.constant 0 : index
      %45 = vector.load %arg8[%c0_32, %c0_33] : memref<2x128xf32, #tpu.memory_space<vmem>>, vector<1x128xf32>
      tpu.vector_store %arg8[%c0_32, %c0_33], %44 {strides = array<i32>} : memref<2x128xf32, #tpu.memory_space<vmem>>, vector<1x128xf32>,
      %c0_34 = arith.constant 0 : index
      %c0_35 = arith.constant 0 : index
      %46 = vector.load %arg6[%c0_34, %c0_35] : memref<1x128xf32, #tpu.memory_space<vmem>>, vector<1x128xf32>
      %47 = arith.mulf %32, %44 : vector<1x128xf32>
      %48 = arith.subf %46, %47 : vector<1x128xf32>
      %c1_36 = arith.constant 1 : index
      %c0_37 = arith.constant 0 : index
      %49 = vector.load %arg8[%c1_36, %c0_37] : memref<2x128xf32, #tpu.memory_space<vmem>>, vector<1x128xf32>
      tpu.vector_store %arg8[%c1_36, %c0_37], %48 {strides = array<i32>} : memref<2x128xf32, #tpu.memory_space<vmem>>, vector<1x128xf32>,
    } else {
    }
    return
  }
  func.func @transform_0(%arg0: i32, %arg1: i32) -> (i32, i32) {
    %c0_i32 = arith.constant 0 : i32
    %c0_i32_0 = arith.constant 0 : i32
    return %arg1, %c0_i32 : i32, i32
  }
  func.func @transform_1(%arg0: i32, %arg1: i32) -> (i32, i32) {
    %c0_i32 = arith.constant 0 : i32
    %c0_i32_0 = arith.constant 0 : i32
    %c0_i32_1 = arith.constant 0 : i32
    return %c0_i32, %c0_i32_0 : i32, i32
  }
  func.func @transform_2(%arg0: i32, %arg1: i32) -> (i32, i32) {
    %c0_i32 = arith.constant 0 : i32
    %c0_i32_0 = arith.constant 0 : i32
    return %c0_i32, %arg0 : i32, i32
  }
  func.func @transform_3(%arg0: i32, %arg1: i32) -> (i32, i32) {
    %c0_i32 = arith.constant 0 : i32
    %c0_i32_0 = arith.constant 0 : i32
    return %c0_i32, %arg0 : i32, i32
  }
  func.func @transform_4(%arg0: i32, %arg1: i32) -> (i32, i32) {
    %c0_i32 = arith.constant 0 : i32
    %c0_i32_0 = arith.constant 0 : i32
    return %c0_i32, %arg0 : i32, i32
  }
  func.func @transform_5(%arg0: i32, %arg1: i32) -> (i32, i32) {
    %c0_i32 = arith.constant 0 : i32
    return %arg1, %arg0 : i32, i32
  }
  func.func @transform_6(%arg0: i32, %arg1: i32) -> (i32, i32) {
    %c0_i32 = arith.constant 0 : i32
    %c0_i32_0 = arith.constant 0 : i32
    return %c0_i32, %arg0 : i32, i32
  }
}

module attributes {stable_mosaic.version = 11 : i64} {
  func.func @_matmul_bn_kernel(%arg0: i32, %arg1: i32, %arg2: memref<128x128xf32, #tpu.memory_space<vmem>>, %arg3: memref<2x128xf32, #tpu.memory_space<vmem>>, %arg4: memref<128x128xbf16, #tpu.memory_space<vmem>>, %arg5: memref<1x128xf32, #tpu.memory_space<vmem>>, %arg6: memref<1x128xf32, #tpu.memory_space<vmem>>, %arg7: memref<128x128xf32, #tpu.memory_space<vmem>>, %arg8: memref<2x128xf32, #tpu.memory_space<vmem>>, %arg9: memref<2x128xf32, #tpu.memory_space<vmem>>) attributes {dimension_semantics = [#tpu.dimension_semantics<parallel>, #tpu.dimension_semantics<arbitrary>], iteration_bounds = array<i64: 1, 1>, scalar_prefetch = 0 : i64, scratch_operands = 1 : i64, tpu.core_type = #tpu.core_type<tc>, window_params = [{transform_indices = @transform_0, window_bounds = array<i64: 128, 128>}, {pipeline_mode = #tpu.pipeline_mode<synchronous>, transform_indices = @transform_1, window_bounds = array<i64: 2, 128>}, {transform_indices = @transform_2, window_bounds = array<i64: 128, 128>}, {transform_indices = @transform_3, window_bounds = array<i64: 1, 128>}, {transform_indices = @transform_4, window_bounds = array<i64: 1, 128>}, {transform_indices = @transform_5, window_bounds = array<i64: 128, 128>}, {transform_indices = @transform_6, window_bounds = array<i64: 2, 128>}]} {
    %c0 = arith.constant 0 : index
    %c0_0 = arith.constant 0 : index
    %0 = vector.load %arg2[%c0, %c0_0] : memref<128x128xf32, #tpu.memory_space<vmem>>, vector<128x128xf32>
    %1 = arith.truncf %0 : vector<128x128xf32> to vector<128x128xbf16>
    %c0_1 = arith.constant 0 : index
    %c0_2 = arith.constant 0 : index
    %2 = vector.load %arg4[%c0_1, %c0_2] : memref<128x128xbf16, #tpu.memory_space<vmem>>, vector<128x128xbf16>
    %cst = arith.constant dense<0.000000e+00> : vector<128x128xf32>
    %3 = tpu.matmul %1, %2, %cst {dimension_numbers = #tpu.dot_dimension_numbers<[1], [0], [0], [1], [0, 0, 1, 1], [], []>} : vector<128x128xbf16>, vector<128x128xbf16>, vector<128x128xf32> -> vector<128x128xf32>
    %c0_3 = arith.constant 0 : index
    %c0_4 = arith.constant 0 : index
    %4 = vector.load %arg7[%c0_3, %c0_4] : memref<128x128xf32, #tpu.memory_space<vmem>>, vector<128x128xf32>
    tpu.vector_store %arg7[%c0_3, %c0_4], %3 {strides = array<i32>} : memref<128x128xf32, #tpu.memory_space<vmem>>, vector<128x128xf32>,
    %c0_i32 = arith.constant 0 : i32
    %5 = arith.cmpi eq, %arg1, %c0_i32 : i32
    %6 = arith.extui %5 : i1 to i32
    %c0_i32_5 = arith.constant 0 : i32
    %7 = arith.cmpi ne, %6, %c0_i32_5 : i32
    scf.if %7 {
      %cst_17 = arith.constant 0.000000e+00 : f32
      %22 = vector.broadcast %cst_17 : f32 to vector<2x128xf32>
      %c0_18 = arith.constant 0 : index
      %c0_19 = arith.constant 0 : index
      %23 = vector.load %arg9[%c0_18, %c0_19] : memref<2x128xf32, #tpu.memory_space<vmem>>, vector<2x128xf32>
      tpu.vector_store %arg9[%c0_18, %c0_19], %22 {strides = array<i32>} : memref<2x128xf32, #tpu.memory_space<vmem>>, vector<2x128xf32>,
    } else {
    }
    %c0_6 = arith.constant 0 : index
    %c0_7 = arith.constant 0 : index
    %8 = vector.load %arg9[%c0_6, %c0_7] : memref<2x128xf32, #tpu.memory_space<vmem>>, vector<1x128xf32>
    %cst_8 = arith.constant dense<0.000000e+00> : vector<128xf32>
    %9 = vector.multi_reduction <add>, %3, %cst_8 [0] : vector<128x128xf32> to vector<128xf32>
    %10 = vector.shape_cast %9 : vector<128xf32> to vector<1x128xf32>
    %11 = arith.addf %8, %10 : vector<1x128xf32>
    %c0_9 = arith.constant 0 : index
    %c0_10 = arith.constant 0 : index
    %12 = vector.load %arg9[%c0_9, %c0_10] : memref<2x128xf32, #tpu.memory_space<vmem>>, vector<1x128xf32>
    tpu.vector_store %arg9[%c0_9, %c0_10], %11 {strides = array<i32>} : memref<2x128xf32, #tpu.memory_space<vmem>>, vector<1x128xf32>,
    %c1 = arith.constant 1 : index
    %c0_11 = arith.constant 0 : index
    %13 = vector.load %arg9[%c1, %c0_11] : memref<2x128xf32, #tpu.memory_space<vmem>>, vector<1x128xf32>
    %14 = arith.mulf %3, %3 : vector<128x128xf32>
    %cst_12 = arith.constant dense<0.000000e+00> : vector<128xf32>
    %15 = vector.multi_reduction <add>, %14, %cst_12 [0] : vector<128x128xf32> to vector<128xf32>
    %16 = vector.shape_cast %15 : vector<128xf32> to vector<1x128xf32>
    %17 = arith.addf %13, %16 : vector<1x128xf32>
    %c1_13 = arith.constant 1 : index
    %c0_14 = arith.constant 0 : index
    %18 = vector.load %arg9[%c1_13, %c0_14] : memref<2x128xf32, #tpu.memory_space<vmem>>, vector<1x128xf32>
    tpu.vector_store %arg9[%c1_13, %c0_14], %17 {strides = array<i32>} : memref<2x128xf32, #tpu.memory_space<vmem>>, vector<1x128xf32>,
    %c0_i32_15 = arith.constant 0 : i32
    %19 = arith.cmpi eq, %arg1, %c0_i32_15 : i32
    %20 = arith.extui %19 : i1 to i32
    %c0_i32_16 = arith.constant 0 : i32
    %21 = arith.cmpi ne, %20, %c0_i32_16 : i32
    scf.if %21 {
      %c0_17 = arith.constant 0 : index
      %c0_18 = arith.constant 0 : index
      %22 = vector.load %arg9[%c0_17, %c0_18] : memref<2x128xf32, #tpu.memory_space<vmem>>, vector<1x128xf32>
      %cst_19 = arith.constant 7.812500e-03 : f32
      %23 = vector.broadcast %cst_19 : f32 to vector<1x128xf32>
      %24 = arith.mulf %22, %23 : vector<1x128xf32>
      %c1_20 = arith.constant 1 : index
      %c0_21 = arith.constant 0 : index
      %25 = vector.load %arg9[%c1_20, %c0_21] : memref<2x128xf32, #tpu.memory_space<vmem>>, vector<1x128xf32>
      %cst_22 = arith.constant 7.812500e-03 : f32
      %26 = vector.broadcast %cst_22 : f32 to vector<1x128xf32>
      %27 = arith.mulf %25, %26 : vector<1x128xf32>
      %28 = arith.mulf %24, %24 : vector<1x128xf32>
      %29 = arith.subf %27, %28 : vector<1x128xf32>
      %cst_23 = arith.constant 0.000000e+00 : f32
      %30 = vector.broadcast %cst_23 : f32 to vector<1x128xf32>
      %31 = arith.maximumf %29, %30 : vector<1x128xf32>
      %c0_24 = arith.constant 0 : index
      %c0_25 = arith.constant 0 : index
      %32 = vector.load %arg5[%c0_24, %c0_25] : memref<1x128xf32, #tpu.memory_space<vmem>>, vector<1x128xf32>
      %cst_26 = arith.constant 9.99999974E-6 : f32
      %33 = vector.broadcast %cst_26 : f32 to vector<1x128xf32>
      %34 = arith.addf %31, %33 : vector<1x128xf32>
      %35 = math.rsqrt %34 : vector<1x128xf32>
      %36 = arith.mulf %32, %35 : vector<1x128xf32>
      %c0_27 = arith.constant 0 : index
      %c0_28 = arith.constant 0 : index
      %37 = vector.load %arg8[%c0_27, %c0_28] : memref<2x128xf32, #tpu.memory_space<vmem>>, vector<1x128xf32>
      tpu.vector_store %arg8[%c0_27, %c0_28], %36 {strides = array<i32>} : memref<2x128xf32, #tpu.memory_space<vmem>>, vector<1x128xf32>,
      %c0_29 = arith.constant 0 : index
      %c0_30 = arith.constant 0 : index
      %38 = vector.load %arg6[%c0_29, %c0_30] : memref<1x128xf32, #tpu.memory_space<vmem>>, vector<1x128xf32>
      %39 = arith.mulf %24, %36 : vector<1x128xf32>
      %40 = arith.subf %38, %39 : vector<1x128xf32>
      %c1_31 = arith.constant 1 : index
      %c0_32 = arith.constant 0 : index
      %41 = vector.load %arg8[%c1_31, %c0_32] : memref<2x128xf32, #tpu.memory_space<vmem>>, vector<1x128xf32>
      tpu.vector_store %arg8[%c1_31, %c0_32], %40 {strides = array<i32>} : memref<2x128xf32, #tpu.memory_space<vmem>>, vector<1x128xf32>,
    } else {
    }
    return
  }
  func.func @transform_0(%arg0: i32, %arg1: i32) -> (i32, i32) {
    %c0_i32 = arith.constant 0 : i32
    %c0_i32_0 = arith.constant 0 : i32
    return %arg1, %c0_i32 : i32, i32
  }
  func.func @transform_1(%arg0: i32, %arg1: i32) -> (i32, i32) {
    %c0_i32 = arith.constant 0 : i32
    %c0_i32_0 = arith.constant 0 : i32
    %c0_i32_1 = arith.constant 0 : i32
    return %c0_i32, %c0_i32_0 : i32, i32
  }
  func.func @transform_2(%arg0: i32, %arg1: i32) -> (i32, i32) {
    %c0_i32 = arith.constant 0 : i32
    %c0_i32_0 = arith.constant 0 : i32
    return %c0_i32, %arg0 : i32, i32
  }
  func.func @transform_3(%arg0: i32, %arg1: i32) -> (i32, i32) {
    %c0_i32 = arith.constant 0 : i32
    %c0_i32_0 = arith.constant 0 : i32
    return %c0_i32, %arg0 : i32, i32
  }
  func.func @transform_4(%arg0: i32, %arg1: i32) -> (i32, i32) {
    %c0_i32 = arith.constant 0 : i32
    %c0_i32_0 = arith.constant 0 : i32
    return %c0_i32, %arg0 : i32, i32
  }
  func.func @transform_5(%arg0: i32, %arg1: i32) -> (i32, i32) {
    %c0_i32 = arith.constant 0 : i32
    return %arg1, %arg0 : i32, i32
  }
  func.func @transform_6(%arg0: i32, %arg1: i32) -> (i32, i32) {
    %c0_i32 = arith.constant 0 : i32
    %c0_i32_0 = arith.constant 0 : i32
    return %c0_i32, %arg0 : i32, i32
  }
}

module attributes {stable_mosaic.version = 11 : i64} {
  func.func @_bn_add_relu_kernel(%arg0: i32, %arg1: i32, %arg2: memref<128x128xf32, #tpu.memory_space<vmem>>, %arg3: memref<2x128xf32, #tpu.memory_space<vmem>>, %arg4: memref<128x128xf32, #tpu.memory_space<vmem>>, %arg5: memref<2x128xf32, #tpu.memory_space<vmem>>, %arg6: memref<128x128xf32, #tpu.memory_space<vmem>>) attributes {dimension_semantics = [#tpu.dimension_semantics<parallel>, #tpu.dimension_semantics<parallel>], iteration_bounds = array<i64: 1, 1>, scalar_prefetch = 0 : i64, scratch_operands = 0 : i64, tpu.core_type = #tpu.core_type<tc>, window_params = [{transform_indices = @transform_0, window_bounds = array<i64: 128, 128>}, {transform_indices = @transform_1, window_bounds = array<i64: 2, 128>}, {transform_indices = @transform_2, window_bounds = array<i64: 128, 128>}, {transform_indices = @transform_3, window_bounds = array<i64: 2, 128>}, {transform_indices = @transform_4, window_bounds = array<i64: 128, 128>}]} {
    %c0 = arith.constant 0 : index
    %c0_0 = arith.constant 0 : index
    %0 = vector.load %arg2[%c0, %c0_0] : memref<128x128xf32, #tpu.memory_space<vmem>>, vector<128x128xf32>
    %c0_1 = arith.constant 0 : index
    %c0_2 = arith.constant 0 : index
    %1 = vector.load %arg3[%c0_1, %c0_2] : memref<2x128xf32, #tpu.memory_space<vmem>>, vector<1x128xf32>
    %2 = vector.broadcast %1 : vector<1x128xf32> to vector<128x128xf32>
    %3 = arith.mulf %0, %2 : vector<128x128xf32>
    %c1 = arith.constant 1 : index
    %c0_3 = arith.constant 0 : index
    %4 = vector.load %arg3[%c1, %c0_3] : memref<2x128xf32, #tpu.memory_space<vmem>>, vector<1x128xf32>
    %5 = vector.broadcast %4 : vector<1x128xf32> to vector<128x128xf32>
    %6 = arith.addf %3, %5 : vector<128x128xf32>
    %c0_4 = arith.constant 0 : index
    %c0_5 = arith.constant 0 : index
    %7 = vector.load %arg4[%c0_4, %c0_5] : memref<128x128xf32, #tpu.memory_space<vmem>>, vector<128x128xf32>
    %c0_6 = arith.constant 0 : index
    %c0_7 = arith.constant 0 : index
    %8 = vector.load %arg5[%c0_6, %c0_7] : memref<2x128xf32, #tpu.memory_space<vmem>>, vector<1x128xf32>
    %9 = vector.broadcast %8 : vector<1x128xf32> to vector<128x128xf32>
    %10 = arith.mulf %7, %9 : vector<128x128xf32>
    %c1_8 = arith.constant 1 : index
    %c0_9 = arith.constant 0 : index
    %11 = vector.load %arg5[%c1_8, %c0_9] : memref<2x128xf32, #tpu.memory_space<vmem>>, vector<1x128xf32>
    %12 = vector.broadcast %11 : vector<1x128xf32> to vector<128x128xf32>
    %13 = arith.addf %10, %12 : vector<128x128xf32>
    %14 = arith.addf %6, %13 : vector<128x128xf32>
    %cst = arith.constant 0.000000e+00 : f32
    %15 = vector.broadcast %cst : f32 to vector<128x128xf32>
    %16 = arith.maximumf %14, %15 : vector<128x128xf32>
    %c0_10 = arith.constant 0 : index
    %c0_11 = arith.constant 0 : index
    %17 = vector.load %arg6[%c0_10, %c0_11] : memref<128x128xf32, #tpu.memory_space<vmem>>, vector<128x128xf32>
    tpu.vector_store %arg6[%c0_10, %c0_11], %16 {strides = array<i32>} : memref<128x128xf32, #tpu.memory_space<vmem>>, vector<128x128xf32>,
    return
  }
  func.func @transform_0(%arg0: i32, %arg1: i32) -> (i32, i32) {
    %c0_i32 = arith.constant 0 : i32
    return %arg1, %arg0 : i32, i32
  }
  func.func @transform_1(%arg0: i32, %arg1: i32) -> (i32, i32) {
    %c0_i32 = arith.constant 0 : i32
    %c0_i32_0 = arith.constant 0 : i32
    return %c0_i32, %arg0 : i32, i32
  }
  func.func @transform_2(%arg0: i32, %arg1: i32) -> (i32, i32) {
    %c0_i32 = arith.constant 0 : i32
    return %arg1, %arg0 : i32, i32
  }
  func.func @transform_3(%arg0: i32, %arg1: i32) -> (i32, i32) {
    %c0_i32 = arith.constant 0 : i32
    %c0_i32_0 = arith.constant 0 : i32
    return %c0_i32, %arg0 : i32, i32
  }
  func.func @transform_4(%arg0: i32, %arg1: i32) -> (i32, i32) {
    %c0_i32 = arith.constant 0 : i32
    return %arg1, %arg0 : i32, i32
  }
}

</mosaic_0001>

<bundles_post_ra>
// kernel: bottleneck_forward.5
= control target key start
LH: loop header
LB: loop body
LE: loop exit
PB: predicated region body
PF: predicated region fallthrough
CT: control target
= control target key end

     0   :  { %s1124_s21 = smov 0   ;;  %s1126_s22 = smov 0   ;;  %s1405_s0 = inlined_call_operand.vmem [shape: f32[512,128], index: 0, kind: input, shape index: {}]   ;;  %s1406_s1 = inlined_call_operand.vmem [shape: f32[2,128], index: 1, kind: input, shape index: {}]   ;;  %s1407_s2 = inlined_call_operand.vmem [shape: bf16[128,128], index: 2, kind: input, shape index: {}]   ;;  %s1408_s3 = inlined_call_operand.vmem [shape: f32[1,128], index: 3, kind: input, shape index: {}]   ;;  %s1409_s4 = inlined_call_operand.vmem [shape: f32[1,128], index: 4, kind: input, shape index: {}]   ;;  %s1410_s5 = inlined_call_operand.vmem [shape: f32[512,128], index: 5, kind: output, shape index: {0}]   ;;  %s1411_s6 = inlined_call_operand.vmem [shape: f32[2,128], index: 6, kind: output, shape index: {1}]  }
   0x1   :  { %s1128_s1 = smov 0  }
   0x2 LB: > { %s26_s23 = sadd.s32 1, %s1082_s22  ;;  %p923_p0 = scmp.ge.s32.totalorder %s1086_s1, 1  ;;  %s1086_s1 = sphi %s1128_s1, %s17_s1   ;;  %s1082_s22 = sphi %s1126_s22, %s1413_s22   ;;  %s1078_s21 = sphi %s1124_s21, %s1412_s21  }
   0x3   : > { %p27_p1 = scmp.ge.s32.totalorder %s26_s23, 2  ;;  %p255_p2 = scmp.lt.s32.totalorder %s1086_s1, 3 }
   0x5   : > { %s1415_s23 = smov (%p27_p1, %s26_s23), 0  ;;  %p256_p3 = pnand %p923_p0, %p255_p2 }
   0x6   : > { %v1054_v0 = vld [vmem:[%s1407_s2] sm:$0xff] (!%p256_p3)   ;;  %s924_s26 = sshll.u32 (!%p256_p3), %s1078_s21, 5  ;;  %v1055_v1 = vld [vmem:[%s1407_s2 + $0x8] sm:$0xff] (!%p256_p3)   ;;  %v1056_v2 = vld [vmem:[%s1407_s2 + $0x10] sm:$0xff] (!%p256_p3)   ;;  %p936_p5 = scmp.ne.s32.totalorder (!%p256_p3), %s1078_s21, 0 }
   0x7   : > { %259 = sbr.rel (%p256_p3) target bundleno = 392 (0x188), region = 40  ;;  %p303_p4 = scmp.lt.s32.totalorder (!%p256_p3), %s924_s26, 63  ;;  %965 = vmatprep.subr.bf16.mxu0 (!%p256_p3), %v1054_v0  ;;  %1013 = vmatprep.subr.bf16.mxu1 (!%p256_p3), %v1054_v0  ;;  %v1057_v3 = vld [vmem:[%s1407_s2 + $0x18] sm:$0xff] (!%p256_p3)   ;;  %v1058_v10 = vld [vmem:[%s1407_s2 + $0x20] sm:$0xff] (!%p256_p3)   ;;  %v1059_v11 = vld [vmem:[%s1407_s2 + $0x28] sm:$0xff] (!%p256_p3)  }
   0x8   : > { %966 = vmatpush3.bf16.msra.mxu0 (!%p256_p3), %v1054_v0  ;;  %1021 = vmatpush3.bf16.msra.mxu1 (!%p256_p3), %v1054_v0  ;;  %v1060_v12 = vld [vmem:[%s1407_s2 + $0x30] sm:$0xff] (!%p256_p3)   ;;  %v1061_v13 = vld [vmem:[%s1407_s2 + $0x38] sm:$0xff] (!%p256_p3)  }
   0x9   : > { %967 = vmatprep.subr.bf16.mxu0 (!%p256_p3), %v1055_v1  ;;  %1014 = vmatprep.subr.bf16.mxu1 (!%p256_p3), %v1055_v1 }
   0xc   : > { %968 = vmatpush3.bf16.msra.mxu0 (!%p256_p3), %v1055_v1  ;;  %1022 = vmatpush3.bf16.msra.mxu1 (!%p256_p3), %v1055_v1 }
   0xd   : > { %969 = vmatprep.subr.bf16.mxu0 (!%p256_p3), %v1056_v2  ;;  %1015 = vmatprep.subr.bf16.mxu1 (!%p256_p3), %v1056_v2 }
   0xe   : > { %s1417_s26 = smov (!%p303_p4, %s924_s26), 63 }
   0xf   : > { %s925_s7 = sshll.u32 %s1417_s26, 3 }
  0x10   : > { %s1162_s10 = scalar_lea.vmem %s1405_s0, %s925_s7  ;;  %970 = vmatpush3.bf16.msra.mxu0 %v1056_v2  ;;  %1023 = vmatpush3.bf16.msra.mxu1 %v1056_v2  ;;  %s1216_s27 = scalar_lea.vmem %s1410_s5, %s925_s7 }
  0x11   : > { %v332_v4 = vld [vmem:[%s1162_s10] sm:$0xff]  ;;  %v333_v5 = vld [vmem:[%s1162_s10 + $0x8] sm:$0xff]  ;;  %971 = vmatprep.subr.bf16.mxu0 %v1057_v3  ;;  %1016 = vmatprep.subr.bf16.mxu1 %v1057_v3  ;;  %v334_v14 = vld [vmem:[%s1162_s10 + $0x10] sm:$0xff] }
  0x12   : > { %v348_v6 = vld [vmem:[%s1162_s10 + $0x80] sm:$0xff]  ;;  %v364_v7 = vpack.c.bf16 %v333_v5, %v332_v4  ;;  %v349_v8 = vld [vmem:[%s1162_s10 + $0x88] sm:$0xff]  ;;  %v335_v15 = vld [vmem:[%s1162_s10 + $0x18] sm:$0xff] }
  0x13   : > { %v372_v9 = vpack.c.bf16 %v349_v8, %v348_v6  ;;  %v350_v16 = vld [vmem:[%s1162_s10 + $0x90] sm:$0xff]  ;;  %v351_v17 = vld [vmem:[%s1162_s10 + $0x98] sm:$0xff]  ;;  %v336_v18 = vld [vmem:[%s1162_s10 + $0x20] sm:$0xff]  ;;  %v365_v22 = vpack.c.bf16 %v335_v15, %v334_v14 }
  0x14   : > { %981 = vmatprep.mubr.bf16.mxu0 %v364_v7  ;;  %972 = vmatpush3.bf16.msra.mxu0 %v1057_v3  ;;  %v337_v19 = vld [vmem:[%s1162_s10 + $0x28] sm:$0xff]  ;;  %v352_v20 = vld [vmem:[%s1162_s10 + $0xa0] sm:$0xff]  ;;  %v373_v23 = vpack.c.bf16 %v351_v17, %v350_v16  ;;  %v338_v26 = vld [vmem:[%s1162_s10 + $0x30] sm:$0xff] }
  0x15   : > { %997 = vmatprep.mubr.bf16.mxu1 %v372_v9  ;;  %1024 = vmatpush3.bf16.msra.mxu1 %v1057_v3  ;;  %v353_v21 = vld [vmem:[%s1162_s10 + $0xa8] sm:$0xff]  ;;  %v366_v24 = vpack.c.bf16 %v337_v19, %v336_v18  ;;  %v339_v27 = vld [vmem:[%s1162_s10 + $0x38] sm:$0xff]  ;;  %v354_v28 = vld [vmem:[%s1162_s10 + $0xb0] sm:$0xff] }
  0x16   : > { %973 = vmatprep.subr.bf16.mxu0 %v1058_v10  ;;  %1017 = vmatprep.subr.bf16.mxu1 %v1058_v10  ;;  %v374_v25 = vpack.c.bf16 %v353_v21, %v352_v20  ;;  %v355_v29 = vld [vmem:[%s1162_s10 + $0xb8] sm:$0xff]  ;;  %v340_v30 = vld [vmem:[%s1162_s10 + $0x40] sm:$0xff]  ;;  %v341_v31 = vld [vmem:[%s1162_s10 + $0x48] sm:$0xff]  ;;  %v367_v34 = vpack.c.bf16 %v339_v27, %v338_v26 }
  0x17   : > { %v356_v32 = vld [vmem:[%s1162_s10 + $0xc0] sm:$0xff]  ;;  %v357_v33 = vld [vmem:[%s1162_s10 + $0xc8] sm:$0xff]  ;;  %v375_v35 = vpack.c.bf16 %v355_v29, %v354_v28  ;;  %v368_v36 = vpack.c.bf16 %v341_v31, %v340_v30  ;;  %v342_v38 = vld [vmem:[%s1162_s10 + $0x50] sm:$0xff] }
  0x18   : > { %974 = vmatpush3.bf16.msra.mxu0 %v1058_v10  ;;  %v376_v37 = vpack.c.bf16 %v357_v33, %v356_v32  ;;  %v343_v39 = vld [vmem:[%s1162_s10 + $0x58] sm:$0xff]  ;;  %v358_v40 = vld [vmem:[%s1162_s10 + $0xd0] sm:$0xff]  ;;  %v344_v42 = vld [vmem:[%s1162_s10 + $0x60] sm:$0xff] }
  0x19   : > { %1025 = vmatpush3.bf16.msra.mxu1 %v1058_v10  ;;  %975 = vmatprep.subr.bf16.mxu0 %v1059_v11  ;;  %v359_v41 = vld [vmem:[%s1162_s10 + $0xd8] sm:$0xff]  ;;  %v345_v43 = vld [vmem:[%s1162_s10 + $0x68] sm:$0xff]  ;;  %v360_v44 = vld [vmem:[%s1162_s10 + $0xe0] sm:$0xff]  ;;  %v369_v46 = vpack.c.bf16 %v343_v39, %v342_v38 }
  0x1a   : > { %1018 = vmatprep.subr.bf16.mxu1 %v1059_v11  ;;  %v361_v45 = vld [vmem:[%s1162_s10 + $0xe8] sm:$0xff]  ;;  %v377_v47 = vpack.c.bf16 %v359_v41, %v358_v40  ;;  %v370_v48 = vpack.c.bf16 %v345_v43, %v344_v42  ;;  %v346_v50 = vld [vmem:[%s1162_s10 + $0x70] sm:$0xff]  ;;  %v347_v51 = vld [vmem:[%s1162_s10 + $0x78] sm:$0xff] }
  0x1b   : > { %v378_v49 = vpack.c.bf16 %v361_v45, %v360_v44  ;;  %v362_v52 = vld [vmem:[%s1162_s10 + $0xf0] sm:$0xff]  ;;  %v363_v53 = vld [vmem:[%s1162_s10 + $0xf8] sm:$0xff]  ;;  %v371_v54 = vpack.c.bf16 %v347_v51, %v346_v50 }
  0x1c   : > { %976 = vmatpush3.bf16.msra.mxu0 %v1059_v11  ;;  %v379_v55 = vpack.c.bf16 %v363_v53, %v362_v52 }
  0x1d   : > { %1026 = vmatpush3.bf16.msra.mxu1 %v1059_v11  ;;  %977 = vmatprep.subr.bf16.mxu0 %v1060_v12 }
  0x1e   : > { %1019 = vmatprep.subr.bf16.mxu1 %v1060_v12 }
  0x20   : > { %978 = vmatpush3.bf16.msra.mxu0 %v1060_v12 }
  0x21   : > { %1027 = vmatpush3.bf16.msra.mxu1 %v1060_v12  ;;  %979 = vmatprep.subr.bf16.mxu0 %v1061_v13 }
  0x22   : > { %1020 = vmatprep.subr.bf16.mxu1 %v1061_v13 }
  0x24   : > { %980 = vmatpush3.bf16.msra.mxu0 %v1061_v13 }
  0x25   : > { %1028 = vmatpush3.bf16.msra.mxu1 %v1061_v13 }
  0x27   : > { %982 = vmatmul.mubr.bf16.vlgmr.msra.gmra.mrb[0].mxu0 %v365_v22 }
  0x28   : > { %998 = vmatmul.mubr.bf16.vlgmr.msra.gmra.mrb[0].mxu1 %v373_v23  ;;  %985 = vmatprep.mubr.bf16.mxu0 %v366_v24  ;;  %v1088_v24 = vmov (!%p936_p5), 0.0  }
  0x29   : > { %1001 = vmatprep.mubr.bf16.mxu1 %v374_v25  ;;  %641 = vst [vmem:[#allocation2] sm:$0x3] (!%p936_p5), %v1088_v24 }
  0x2f   : > { %986 = vmatmul.mubr.bf16.gmra.mrb[4].mxu0 %v367_v34 }
  0x30   : > { %1002 = vmatmul.mubr.bf16.gmra.mrb[4].mxu1 %v375_v35  ;;  %989 = vmatprep.mubr.bf16.mxu0 %v368_v36 }
  0x31   : > { %1005 = vmatprep.mubr.bf16.mxu1 %v376_v37 }
  0x37   : > { %990 = vmatmul.mubr.bf16.gmra.mrb[8].mxu0 %v369_v46 }
  0x38   : > { %1006 = vmatmul.mubr.bf16.gmra.mrb[8].mxu1 %v377_v47  ;;  %993 = vmatprep.mubr.bf16.mxu0 %v370_v48 }
  0x39   : > { %1009 = vmatprep.mubr.bf16.mxu1 %v378_v49 }
  0x3f   : > { %994 = vmatmul.mubr.bf16.gmra.mrb[12].mxu0 %v371_v54 }
  0x40   : > { %1010 = vmatmul.mubr.bf16.gmra.mrb[12].mxu1 %v379_v55 }
  0xfa   : > { %v1218_v56 = vpop.f32.mrb[0].mxu0 }
  0xfb   : > { %v1220_v57 = vpop.f32.mrb[0].mxu1  ;;  %607 = vst [vmem:[%s1216_s27 + $0x10] sm:$0xff] %v1218_v56  ;;  %v1226_v58 = vpop.f32.mrb[1].mxu0 }
  0xfc   : > { %623 = vst [vmem:[%s1216_s27 + $0x90] sm:$0xff] %v1220_v57  ;;  %v1228_v59 = vpop.f32.mrb[1].mxu1  ;;  %605 = vst [vmem:[%s1216_s27] sm:$0xff] %v1226_v58  ;;  %v1234_v60 = vpop.f32.mrb[2].mxu0 }
  0xfd   : > { %621 = vst [vmem:[%s1216_s27 + $0x80] sm:$0xff] %v1228_v59  ;;  %v1236_v61 = vpop.f32.mrb[2].mxu1  ;;  %608 = vst [vmem:[%s1216_s27 + $0x18] sm:$0xff] %v1234_v60  ;;  %v481_v62 = vpop.f32.mrb[3].mxu0 }
  0xfe   : > { %624 = vst [vmem:[%s1216_s27 + $0x98] sm:$0xff] %v1236_v61  ;;  %v1242_v63 = vpop.f32.mrb[3].mxu1  ;;  %606 = vst [vmem:[%s1216_s27 + $0x8] sm:$0xff] %v481_v62 }
  0xff   : > { %622 = vst [vmem:[%s1216_s27 + $0x88] sm:$0xff] %v1242_v63 }
 0x102   : > { %v1247_v0 = vpop.f32.mrb[4].mxu0 }
 0x103   : > { %v1249_v1 = vpop.f32.mrb[4].mxu1  ;;  %611 = vst [vmem:[%s1216_s27 + $0x30] sm:$0xff] %v1247_v0  ;;  %v494_v2 = vpop.f32.mrb[5].mxu0 }
 0x104   : > { %627 = vst [vmem:[%s1216_s27 + $0xb0] sm:$0xff] %v1249_v1  ;;  %v1255_v3 = vpop.f32.mrb[5].mxu1  ;;  %609 = vst [vmem:[%s1216_s27 + $0x20] sm:$0xff] %v494_v2  ;;  %v1260_v4 = vpop.f32.mrb[6].mxu0 }
 0x105   : > { %625 = vst [vmem:[%s1216_s27 + $0xa0] sm:$0xff] %v1255_v3  ;;  %v1262_v5 = vpop.f32.mrb[6].mxu1  ;;  %612 = vst [vmem:[%s1216_s27 + $0x38] sm:$0xff] %v1260_v4  ;;  %v497_v6 = vpop.f32.mrb[7].mxu0 }
 0x106   : > { %628 = vst [vmem:[%s1216_s27 + $0xb8] sm:$0xff] %v1262_v5  ;;  %v1268_v7 = vpop.f32.mrb[7].mxu1  ;;  %610 = vst [vmem:[%s1216_s27 + $0x28] sm:$0xff] %v497_v6 }
 0x107   : > { %626 = vst [vmem:[%s1216_s27 + $0xa8] sm:$0xff] %v1268_v7 }
 0x10a   : > { %v1273_v8 = vpop.f32.mrb[8].mxu0 }
 0x10b   : > { %v1275_v9 = vpop.f32.mrb[8].mxu1  ;;  %615 = vst [vmem:[%s1216_s27 + $0x50] sm:$0xff] %v1273_v8  ;;  %v510_v10 = vpop.f32.mrb[9].mxu0 }
 0x10c   : > { %631 = vst [vmem:[%s1216_s27 + $0xd0] sm:$0xff] %v1275_v9  ;;  %v1281_v11 = vpop.f32.mrb[9].mxu1  ;;  %613 = vst [vmem:[%s1216_s27 + $0x40] sm:$0xff] %v510_v10  ;;  %v992_v12 = vpop.f32.mrb[10].mxu0 }
 0x10d   : > { %629 = vst [vmem:[%s1216_s27 + $0xc0] sm:$0xff] %v1281_v11  ;;  %v1286_v13 = vpop.f32.mrb[10].mxu1  ;;  %616 = vst [vmem:[%s1216_s27 + $0x58] sm:$0xff] %v992_v12  ;;  %v513_v14 = vpop.f32.mrb[11].mxu0 }
 0x10e   : > { %632 = vst [vmem:[%s1216_s27 + $0xd8] sm:$0xff] %v1286_v13  ;;  %v1291_v15 = vpop.f32.mrb[11].mxu1  ;;  %614 = vst [vmem:[%s1216_s27 + $0x48] sm:$0xff] %v513_v14 }
 0x10f   : > { %630 = vst [vmem:[%s1216_s27 + $0xc8] sm:$0xff] %v1291_v15 }
 0x111   : > { %640 = sbr.rel (%p936_p5) target bundleno = 280 (0x118), region = 44 }
 0x112   : > { %v995_v16 = vpop.f32.mrb[12].mxu0 }
 0x113   : > { %v1296_v17 = vpop.f32.mrb[12].mxu1  ;;  %619 = vst [vmem:[%s1216_s27 + $0x70] sm:$0xff] %v995_v16  ;;  %v526_v18 = vpop.f32.mrb[13].mxu0 }
 0x114   : > { %635 = vst [vmem:[%s1216_s27 + $0xf0] sm:$0xff] %v1296_v17  ;;  %v1301_v19 = vpop.f32.mrb[13].mxu1  ;;  %617 = vst [vmem:[%s1216_s27 + $0x60] sm:$0xff] %v526_v18  ;;  %v996_v20 = vpop.f32.mrb[14].mxu0 }
 0x115   : > { %633 = vst [vmem:[%s1216_s27 + $0xe0] sm:$0xff] %v1301_v19  ;;  %v1306_v21 = vpop.f32.mrb[14].mxu1  ;;  %620 = vst [vmem:[%s1216_s27 + $0x78] sm:$0xff] %v996_v20  ;;  %v529_v22 = vpop.f32.mrb[15].mxu0 }
 0x116   : > { %636 = vst [vmem:[%s1216_s27 + $0xf8] sm:$0xff] %v1306_v21  ;;  %v1311_v23 = vpop.f32.mrb[15].mxu1  ;;  %618 = vst [vmem:[%s1216_s27 + $0x68] sm:$0xff] %v529_v22 }
 0x117   : > { %634 = vst [vmem:[%s1216_s27 + $0xe8] sm:$0xff] %v1311_v23 }
 0x118 PF: > { %v643_v25 = vadd.f32 %v481_v62, %v1226_v58  ;;  %v683_v28 = vmul.f32 %v1226_v58, %v1226_v58  ;;  %v684_v29 = vmul.f32 %v481_v62, %v481_v62  ;;  %v685_v31 = vmul.f32 %v1218_v56, %v1218_v56  ;;  %p937_p6 = scmp.ne.s32.totalorder %s1078_s21, 1 }
 0x119   : > { %v686_v33 = vmul.f32 %v1234_v60, %v1234_v60  ;;  %v687_v36 = vmul.f32 %v494_v2, %v494_v2  ;;  %v688_v39 = vmul.f32 %v497_v6, %v497_v6  ;;  %v689_v42 = vmul.f32 %v1247_v0, %v1247_v0 }
 0x11a   : > { %v644_v26 = vadd.f32 %v1218_v56, %v643_v25  ;;  %v715_v34 = vadd.f32 %v684_v29, %v683_v28  ;;  %v690_v45 = vmul.f32 %v1260_v4, %v1260_v4  ;;  %v691_v48 = vmul.f32 %v510_v10, %v510_v10 }
 0x11b   : > { %v692_v51 = vmul.f32 %v513_v14, %v513_v14  ;;  %v693_v54 = vmul.f32 %v1273_v8, %v1273_v8  ;;  %v694_v58 = vmul.f32 %v992_v12, %v992_v12  ;;  %v697_v25 = vmul.f32 %v995_v16, %v995_v16 }
 0x11c   : > { %v645_v27 = vadd.f32 %v1234_v60, %v644_v26  ;;  %v716_v37 = vadd.f32 %v715_v34, %v685_v31 }
 0x11e   : > { %v646_v30 = vadd.f32 %v645_v27, %v494_v2  ;;  %v717_v40 = vadd.f32 %v716_v37, %v686_v33  ;;  %v698_v27 = vmul.f32 %v996_v20, %v996_v20  ;;  %v702_v33 = vmul.f32 %v1236_v61, %v1236_v61 }
 0x11f   : > { %v704_v37 = vmul.f32 %v1268_v7, %v1268_v7 }
 0x120   : > { %v647_v32 = vadd.f32 %v646_v30, %v497_v6  ;;  %v718_v43 = vadd.f32 %v717_v40, %v687_v36  ;;  %v696_v6 = vmul.f32 %v529_v22, %v529_v22 }
 0x122   : > { %v648_v35 = vadd.f32 %v1247_v0, %v647_v32  ;;  %v719_v46 = vadd.f32 %v718_v43, %v688_v39  ;;  %v695_v0 = vmul.f32 %v526_v18, %v526_v18  ;;  %v705_v39 = vmul.f32 %v1249_v1, %v1249_v1 }
 0x123   : > { %v707_v43 = vmul.f32 %v1281_v11, %v1281_v11 }
 0x124   : > { %v649_v38 = vadd.f32 %v1260_v4, %v648_v35  ;;  %v720_v49 = vadd.f32 %v719_v46, %v689_v42  ;;  %v703_v35 = vmul.f32 %v1255_v3, %v1255_v3 }
 0x126   : > { %v650_v41 = vadd.f32 %v649_v38, %v510_v10  ;;  %v721_v52 = vadd.f32 %v720_v49, %v690_v45  ;;  %v708_v45 = vmul.f32 %v1291_v15, %v1291_v15  ;;  %v710_v49 = vmul.f32 %v1286_v13, %v1286_v13 }
 0x128   : > { %v651_v44 = vadd.f32 %v650_v41, %v513_v14  ;;  %v722_v55 = vadd.f32 %v721_v52, %v691_v48  ;;  %v706_v41 = vmul.f32 %v1262_v5, %v1262_v5 }
 0x12a   : > { %v652_v47 = vadd.f32 %v1273_v8, %v651_v44  ;;  %v723_v60 = vadd.f32 %v722_v55, %v692_v51  ;;  %v711_v51 = vmul.f32 %v1301_v19, %v1301_v19  ;;  %v713_v55 = vmul.f32 %v1296_v17, %v1296_v17 }
 0x12c   : > { %v653_v50 = vadd.f32 %v992_v12, %v652_v47  ;;  %v724_v2 = vadd.f32 %v723_v60, %v693_v54  ;;  %v699_v12 = vmul.f32 %v1228_v59, %v1228_v59  ;;  %v709_v47 = vmul.f32 %v1275_v9, %v1275_v9 }
 0x12e   : > { %v654_v53 = vadd.f32 %v653_v50, %v526_v18  ;;  %v725_v24 = vadd.f32 %v724_v2, %v694_v58 }
 0x130   : > { %v655_v56 = vadd.f32 %v654_v53, %v529_v22  ;;  %v726_v26 = vadd.f32 %v725_v24, %v695_v0  ;;  %v700_v22 = vmul.f32 %v1242_v63, %v1242_v63  ;;  %v712_v53 = vmul.f32 %v1311_v23, %v1311_v23 }
 0x132   : > { %v656_v62 = vadd.f32 %v995_v16, %v655_v56  ;;  %v727_v28 = vadd.f32 %v726_v26, %v696_v6  ;;  %v701_v16 = vmul.f32 %v1220_v57, %v1220_v57  ;;  %v642_v6 = vld [vmem:[#allocation2] sm:$0x1] }
 0x134   : > { %v657_v4 = vadd.f32 %v996_v20, %v656_v62  ;;  %v728_v29 = vadd.f32 %v727_v28, %v697_v25 }
 0x136   : > { %v658_v10 = vadd.f32 %v657_v4, %v1228_v59  ;;  %v729_v30 = vadd.f32 %v728_v29, %v698_v27  ;;  %v682_v27 = vld [vmem:[#allocation2 + $0x1] sm:$0x1] }
 0x138   : > { %v659_v14 = vadd.f32 %v658_v10, %v1242_v63  ;;  %v730_v32 = vadd.f32 %v729_v30, %v699_v12 }
 0x13a   : > { %v660_v8 = vadd.f32 %v1220_v57, %v659_v14  ;;  %v731_v34 = vadd.f32 %v730_v32, %v700_v22  ;;  %v765_v32 = vld [vmem:[%s1408_s3] sm:$0x1] (!%p937_p6) }
 0x13c   : > { %v661_v18 = vadd.f32 %v1236_v61, %v660_v8  ;;  %v732_v36 = vadd.f32 %v731_v34, %v701_v16  ;;  %v770_v34 = vld [vmem:[%s1409_s4] sm:$0x1] (!%p937_p6) }
 0x13e   : > { %v662_v31 = vadd.f32 %v661_v18, %v1255_v3  ;;  %v733_v38 = vadd.f32 %v732_v36, %v702_v33 }
 0x140   : > { %v663_v20 = vadd.f32 %v662_v31, %v1268_v7  ;;  %v734_v40 = vadd.f32 %v733_v38, %v703_v35 }
 0x142   : > { %v664_v59 = vadd.f32 %v1249_v1, %v663_v20  ;;  %v735_v42 = vadd.f32 %v734_v40, %v704_v37 }
 0x144   : > { %v665_v63 = vadd.f32 %v1262_v5, %v664_v59  ;;  %v736_v44 = vadd.f32 %v735_v42, %v705_v39 }
 0x146   : > { %v666_v57 = vadd.f32 %v665_v63, %v1281_v11  ;;  %v737_v46 = vadd.f32 %v736_v44, %v706_v41 }
 0x148   : > { %v667_v61 = vadd.f32 %v666_v57, %v1291_v15  ;;  %v738_v48 = vadd.f32 %v737_v46, %v707_v43 }
 0x14a   : > { %v668_v3 = vadd.f32 %v1275_v9, %v667_v61  ;;  %v739_v50 = vadd.f32 %v738_v48, %v708_v45 }
 0x14c   : > { %v669_v7 = vadd.f32 %v1286_v13, %v668_v3  ;;  %v740_v52 = vadd.f32 %v739_v50, %v709_v47  ;;  %v714_v13 = vmul.f32 %v1306_v21, %v1306_v21 }
 0x14e   : > { %v670_v1 = vadd.f32 %v669_v7, %v1301_v19  ;;  %v741_v54 = vadd.f32 %v740_v52, %v710_v49 }
 0x150   : > { %v671_v5 = vadd.f32 %v670_v1, %v1311_v23  ;;  %v742_v56 = vadd.f32 %v741_v54, %v711_v51 }
 0x152   : > { %v672_v11 = vadd.f32 %v1296_v17, %v671_v5  ;;  %v743_v60 = vadd.f32 %v742_v56, %v712_v53 }
 0x154   : > { %v673_v15 = vadd.f32 %v1306_v21, %v672_v11  ;;  %v744_v0 = vadd.f32 %v743_v60, %v713_v55 }
 0x156   : > { %v674_v9 = vrot.slane %v673_v15, 4  ;;  %v745_v2 = vadd.f32 %v744_v0, %v714_v13 }
 0x158   : > { %v675_v58 = vadd.f32 %v674_v9, %v673_v15  ;;  %v746_v24 = vrot.slane %v745_v2, 4 }
 0x15a   : > { %v676_v62 = vrot.slane %v675_v58, 2  ;;  %v747_v23 = vadd.f32 %v746_v24, %v745_v2 }
 0x15c   : > { %v677_v19 = vadd.f32 %v676_v62, %v675_v58  ;;  %v748_v26 = vrot.slane %v747_v23, 2 }
 0x15e   : > { %v678_v4 = vrot.slane %v677_v19, 1  ;;  %v749_v14 = vadd.f32 %v748_v26, %v747_v23 }
 0x160   : > { %v679_v10 = vadd.f32 %v678_v4, %v677_v19  ;;  %v750_v17 = vrot.slane %v749_v14, 1  ;;  %757 = sbr.rel (%p937_p6) target bundleno = 392 (0x188), region = 48 }
 0x162   : > { %v680_v25 = vadd.f32 %v679_v10, %v642_v6  ;;  %v751_v28 = vadd.f32 %v750_v17, %v749_v14 }
 0x164   : > { %681 = vst [vmem:[#allocation2] sm:$0x1] %v680_v25  ;;  %v752_v8 = vadd.f32 %v751_v28, %v682_v27 }
 0x166   : > { %753 = vst [vmem:[#allocation2 + $0x1] sm:$0x1] %v752_v8 }
 0x16b   : > { %v758_v21 = vld [vmem:[#allocation2] sm:$0x1] }
 0x16c   : > { %v759_v29 = vmul.f32 0.001953125, %v758_v21 }
 0x16d   : > { %v760_v12 = vld [vmem:[#allocation2 + $0x1] sm:$0x1] }
 0x16e   : > { %v761_v18 = vmul.f32 0.001953125, %v760_v12  ;;  %v762_v22 = vmul.f32 %v759_v29, %v759_v29 }
 0x170   : > { %v763_v30 = vsub.f32 %v761_v18, %v762_v22 }
 0x172   : > { %v764_v31 = vmax.f32 %v763_v30, 0.0 }
 0x174   : > { %v766_v16 = vadd.f32 1e-05, %v764_v31 }
 0x176   : > { %1062 = vrsqrt.f32 %v766_v16 }
 0x180   : > { %v1063_v20 = vpop.eup %1062 }
 0x181   : > { %v768_v33 = vmul.f32 %v1063_v20, %v765_v32 }
 0x183   : > { %769 = vst [vmem:[%s1411_s6] sm:$0x1] %v768_v33  ;;  %v771_v59 = vmul.f32 %v768_v33, %v759_v29 }
 0x185   : > { %v772_v35 = vsub.f32 %v770_v34, %v771_v59 }
 0x187   : > { %773 = vst [vmem:[%s1411_s6 + $0x1] sm:$0x1] %v772_v35 }
 0x188 PF: > { %s17_s1 = sadd.s32 1, %s1086_s1   ;;  %s1412_s21 = smov %s1082_s22 }
 0x189   : > { %p14_p7 = scmp.ge.s32.totalorder %s17_s1, 4   ;;  %s1413_s22 = smov %s1415_s23 }
 0x18b   :  { %16 = sbr.rel (!%p14_p7) target bundleno = 2 (0x2), region = 99 }

// kernel: bottleneck_forward.7
= control target key start
LH: loop header
LB: loop body
LE: loop exit
PB: predicated region body
PF: predicated region fallthrough
CT: control target
= control target key end

     0   :  { %s673_s2 = inlined_call_operand.vmem [shape: bf16[128,128], index: 2, kind: input, shape index: {}]   ;;  %s674_s0 = inlined_call_operand.vmem [shape: f32[128,128], index: 0, kind: input, shape index: {}]   ;;  %s675_s1 = inlined_call_operand.vmem [shape: f32[2,128], index: 1, kind: input, shape index: {}]   ;;  %s676_s5 = inlined_call_operand.vmem [shape: f32[128,128], index: 5, kind: output, shape index: {0}]   ;;  %s677_s3 = inlined_call_operand.vmem [shape: f32[1,128], index: 3, kind: input, shape index: {}]   ;;  %s678_s4 = inlined_call_operand.vmem [shape: f32[1,128], index: 4, kind: input, shape index: {}]   ;;  %s679_s6 = inlined_call_operand.vmem [shape: f32[2,128], index: 6, kind: output, shape index: {1}]  }
   0x1   :  { %v453_v0 = vld [vmem:[%s673_s2] sm:$0xff]   ;;  %v454_v1 = vld [vmem:[%s673_s2 + $0x8] sm:$0xff]   ;;  %v455_v2 = vld [vmem:[%s673_s2 + $0x10] sm:$0xff]  }
   0x2   :  { %404 = vmatprep.subr.bf16.mxu0 %v453_v0  ;;  %436 = vmatprep.subr.bf16.mxu1 %v453_v0  ;;  %v456_v3 = vld [vmem:[%s673_s2 + $0x18] sm:$0xff]   ;;  %v23_v4 = vld [vmem:[%s674_s0] sm:$0xff]  ;;  %v24_v5 = vld [vmem:[%s674_s0 + $0x8] sm:$0xff] }
   0x3   :  { %405 = vmatpush3.bf16.msra.mxu0 %v453_v0  ;;  %444 = vmatpush3.bf16.msra.mxu1 %v453_v0  ;;  %v520_v6 = vld [vmem:[%s675_s1] ss:$0 sm:$0xff]  ;;  %v527_v9 = vld [vmem:[%s675_s1 + $0x1] ss:$0 sm:$0xff]  ;;  %v32_v16 = vld [vmem:[%s674_s0 + $0x48] sm:$0xff] }
   0x4   :  { %406 = vmatprep.subr.bf16.mxu0 %v454_v1  ;;  %437 = vmatprep.subr.bf16.mxu1 %v454_v1  ;;  %v44_v7 = vmul.f32 %v520_v6, %v23_v4  ;;  %v45_v8 = vmul.f32 %v520_v6, %v24_v5  ;;  %v457_v12 = vld [vmem:[%s673_s2 + $0x20] sm:$0xff]   ;;  %v458_v17 = vld [vmem:[%s673_s2 + $0x28] sm:$0xff]   ;;  %v25_v18 = vld [vmem:[%s674_s0 + $0x10] sm:$0xff]  ;;  %v53_v26 = vmul.f32 %v520_v6, %v32_v16 }
   0x5   :  { %v31_v13 = vld [vmem:[%s674_s0 + $0x40] sm:$0xff]  ;;  %v26_v19 = vld [vmem:[%s674_s0 + $0x18] sm:$0xff]  ;;  %v33_v23 = vld [vmem:[%s674_s0 + $0x50] sm:$0xff]  ;;  %v46_v29 = vmul.f32 %v520_v6, %v25_v18 }
   0x6   :  { %v65_v10 = vadd.f32 %v527_v9, %v44_v7  ;;  %v66_v11 = vadd.f32 %v527_v9, %v45_v8  ;;  %v27_v21 = vld [vmem:[%s674_s0 + $0x20] sm:$0xff]  ;;  %v52_v22 = vmul.f32 %v520_v6, %v31_v13  ;;  %v34_v24 = vld [vmem:[%s674_s0 + $0x58] sm:$0xff]  ;;  %v28_v25 = vld [vmem:[%s674_s0 + $0x28] sm:$0xff]  ;;  %v47_v30 = vmul.f32 %v520_v6, %v26_v19 }
   0x7   :  { %407 = vmatpush3.bf16.msra.mxu0 %v454_v1  ;;  %445 = vmatpush3.bf16.msra.mxu1 %v454_v1  ;;  %v35_v27 = vld [vmem:[%s674_s0 + $0x60] sm:$0xff]  ;;  %v36_v28 = vld [vmem:[%s674_s0 + $0x68] sm:$0xff]  ;;  %v48_v32 = vmul.f32 %v520_v6, %v27_v21  ;;  %v74_v33 = vadd.f32 %v527_v9, %v53_v26  ;;  %v54_v34 = vmul.f32 %v520_v6, %v33_v23  ;;  %v459_v40 = vld [vmem:[%s673_s2 + $0x30] sm:$0xff]   ;;  %v463_v19 = vmov 0.0  }
   0x8   :  { %408 = vmatprep.subr.bf16.mxu0 %v455_v2  ;;  %438 = vmatprep.subr.bf16.mxu1 %v455_v2  ;;  %v81_v14 = vmax.f32 %v65_v10, 0.0  ;;  %v82_v15 = vmax.f32 %v66_v11, 0.0  ;;  %v73_v31 = vadd.f32 %v527_v9, %v52_v22  ;;  %v55_v35 = vmul.f32 %v520_v6, %v34_v24  ;;  %v29_v45 = vld [vmem:[%s674_s0 + $0x30] sm:$0xff]  ;;  %v30_v46 = vld [vmem:[%s674_s0 + $0x38] sm:$0xff]  ;;  %286 = vst [vmem:[#allocation2] sm:$0x3] %v463_v19 }
   0x9   :  { %v49_v36 = vmul.f32 %v520_v6, %v28_v25  ;;  %v56_v38 = vmul.f32 %v520_v6, %v35_v27  ;;  %v57_v39 = vmul.f32 %v520_v6, %v36_v28  ;;  %v90_v41 = vmax.f32 %v74_v33, 0.0  ;;  %v37_v53 = vld [vmem:[%s674_s0 + $0x70] sm:$0xff]  ;;  %v38_v54 = vld [vmem:[%s674_s0 + $0x78] sm:$0xff] }
   0xa   :  { %v97_v20 = vpack.c.bf16 %v82_v15, %v81_v14  ;;  %v89_v37 = vmax.f32 %v73_v31, 0.0  ;;  %v67_v42 = vadd.f32 %v527_v9, %v46_v29  ;;  %v68_v43 = vadd.f32 %v527_v9, %v47_v30  ;;  %v460_v55 = vld [vmem:[%s673_s2 + $0x38] sm:$0xff]  }
   0xb   :  { %409 = vmatpush3.bf16.msra.mxu0 %v455_v2  ;;  %446 = vmatpush3.bf16.msra.mxu1 %v455_v2  ;;  %v69_v44 = vadd.f32 %v527_v9, %v48_v32  ;;  %v75_v48 = vadd.f32 %v527_v9, %v54_v34  ;;  %v76_v49 = vadd.f32 %v527_v9, %v55_v35 }
   0xc   :  { %410 = vmatprep.subr.bf16.mxu0 %v456_v3  ;;  %439 = vmatprep.subr.bf16.mxu1 %v456_v3  ;;  %v101_v47 = vpack.c.bf16 %v90_v41, %v89_v37  ;;  %v70_v50 = vadd.f32 %v527_v9, %v49_v36  ;;  %v77_v51 = vadd.f32 %v527_v9, %v56_v38  ;;  %v83_v56 = vmax.f32 %v67_v42, 0.0 }
   0xd   :  { %420 = vmatprep.mubr.bf16.mxu0 %v97_v20  ;;  %v78_v52 = vadd.f32 %v527_v9, %v57_v39  ;;  %v84_v57 = vmax.f32 %v68_v43, 0.0  ;;  %v50_v58 = vmul.f32 %v520_v6, %v29_v45  ;;  %v51_v59 = vmul.f32 %v520_v6, %v30_v46 }
   0xe   :  { %428 = vmatprep.mubr.bf16.mxu1 %v101_v47  ;;  %v91_v60 = vmax.f32 %v75_v48, 0.0  ;;  %v92_v61 = vmax.f32 %v76_v49, 0.0  ;;  %v58_v62 = vmul.f32 %v520_v6, %v37_v53  ;;  %v59_v63 = vmul.f32 %v520_v6, %v38_v54 }
   0xf   :  { %411 = vmatpush3.bf16.msra.mxu0 %v456_v3  ;;  %447 = vmatpush3.bf16.msra.mxu1 %v456_v3  ;;  %v85_v0 = vmax.f32 %v69_v44, 0.0  ;;  %v86_v1 = vmax.f32 %v70_v50, 0.0  ;;  %v93_v2 = vmax.f32 %v77_v51, 0.0  ;;  %v94_v3 = vmax.f32 %v78_v52, 0.0 }
  0x10   :  { %412 = vmatprep.subr.bf16.mxu0 %v457_v12  ;;  %440 = vmatprep.subr.bf16.mxu1 %v457_v12  ;;  %v98_v4 = vpack.c.bf16 %v84_v57, %v83_v56  ;;  %v71_v5 = vadd.f32 %v527_v9, %v50_v58  ;;  %v72_v7 = vadd.f32 %v527_v9, %v51_v59 }
  0x11   :  { %v102_v8 = vpack.c.bf16 %v92_v61, %v91_v60  ;;  %v79_v10 = vadd.f32 %v527_v9, %v58_v62  ;;  %v80_v11 = vadd.f32 %v527_v9, %v59_v63  ;;  %v99_v6 = vpack.c.bf16 %v86_v1, %v85_v0 }
  0x12   :  { %v87_v13 = vmax.f32 %v71_v5, 0.0  ;;  %v88_v14 = vmax.f32 %v72_v7, 0.0 }
  0x13   :  { %413 = vmatpush3.bf16.msra.mxu0 %v457_v12  ;;  %448 = vmatpush3.bf16.msra.mxu1 %v457_v12  ;;  %v103_v12 = vpack.c.bf16 %v94_v3, %v93_v2  ;;  %v95_v15 = vmax.f32 %v79_v10, 0.0  ;;  %v96_v16 = vmax.f32 %v80_v11, 0.0 }
  0x14   :  { %414 = vmatprep.subr.bf16.mxu0 %v458_v17  ;;  %441 = vmatprep.subr.bf16.mxu1 %v458_v17 }
  0x15   :  { %v104_v18 = vpack.c.bf16 %v96_v16, %v95_v15 }
  0x17   :  { %415 = vmatpush3.bf16.msra.mxu0 %v458_v17  ;;  %449 = vmatpush3.bf16.msra.mxu1 %v458_v17  ;;  %v100_v17 = vpack.c.bf16 %v88_v14, %v87_v13 }
  0x18   :  { %416 = vmatprep.subr.bf16.mxu0 %v459_v40  ;;  %442 = vmatprep.subr.bf16.mxu1 %v459_v40 }
  0x1b   :  { %417 = vmatpush3.bf16.msra.mxu0 %v459_v40  ;;  %450 = vmatpush3.bf16.msra.mxu1 %v459_v40 }
  0x1c   :  { %418 = vmatprep.subr.bf16.mxu0 %v460_v55  ;;  %443 = vmatprep.subr.bf16.mxu1 %v460_v55 }
  0x1f   :  { %419 = vmatpush3.bf16.msra.mxu0 %v460_v55  ;;  %451 = vmatpush3.bf16.msra.mxu1 %v460_v55 }
  0x22   :  { %421 = vmatmul.mubr.bf16.vlgmr.msra.gmra.mrb[0].mxu0 %v98_v4  ;;  %429 = vmatmul.mubr.bf16.vlgmr.msra.gmra.mrb[0].mxu1 %v102_v8 }
  0x23   :  { %424 = vmatprep.mubr.bf16.mxu0 %v99_v6  ;;  %432 = vmatprep.mubr.bf16.mxu1 %v103_v12 }
  0x2a   :  { %425 = vmatmul.mubr.bf16.gmra.mrb[4].mxu0 %v100_v17  ;;  %433 = vmatmul.mubr.bf16.gmra.mrb[4].mxu1 %v104_v18 }
  0xf5   :  { %v422_v20 = vpop.f32.mrb[0].mxu0  ;;  %v430_v9 = vpop.f32.mrb[0].mxu1 }
  0xf6   :  { %268 = vst [vmem:[%s676_s5 + $0x10] sm:$0xff] %v422_v20  ;;  %v203_v21 = vpop.f32.mrb[1].mxu0  ;;  %276 = vst [vmem:[%s676_s5 + $0x50] sm:$0xff] %v430_v9  ;;  %v235_v22 = vpop.f32.mrb[1].mxu1  ;;  %v314_v30 = vmul.f32 %v422_v20, %v422_v20  ;;  %v322_v62 = vmul.f32 %v430_v9, %v430_v9 }
  0xf7   :  { %266 = vst [vmem:[%s676_s5] sm:$0xff] %v203_v21  ;;  %v423_v23 = vpop.f32.mrb[2].mxu0  ;;  %274 = vst [vmem:[%s676_s5 + $0x40] sm:$0xff] %v235_v22  ;;  %v431_v24 = vpop.f32.mrb[2].mxu1  ;;  %v312_v27 = vmul.f32 %v203_v21, %v203_v21  ;;  %v320_v56 = vmul.f32 %v235_v22, %v235_v22 }
  0xf8   :  { %269 = vst [vmem:[%s676_s5 + $0x18] sm:$0xff] %v423_v23  ;;  %v206_v25 = vpop.f32.mrb[3].mxu0  ;;  %277 = vst [vmem:[%s676_s5 + $0x58] sm:$0xff] %v431_v24  ;;  %v238_v26 = vpop.f32.mrb[3].mxu1  ;;  %v315_v33 = vmul.f32 %v423_v23, %v423_v23  ;;  %v323_v1 = vmul.f32 %v431_v24, %v431_v24 }
  0xf9   :  { %267 = vst [vmem:[%s676_s5 + $0x8] sm:$0xff] %v206_v25  ;;  %v288_v28 = vadd.f32 %v206_v25, %v203_v21  ;;  %v313_v29 = vmul.f32 %v206_v25, %v206_v25  ;;  %275 = vst [vmem:[%s676_s5 + $0x48] sm:$0xff] %v238_v26  ;;  %v321_v61 = vmul.f32 %v238_v26, %v238_v26 }
  0xfb   :  { %v289_v31 = vadd.f32 %v422_v20, %v288_v28  ;;  %v328_v32 = vadd.f32 %v313_v29, %v312_v27  ;;  %v311_v29 = vld [vmem:[#allocation2 + $0x1] sm:$0x1] }
  0xfd   :  { %v329_v34 = vadd.f32 %v328_v32, %v314_v30  ;;  %v426_v35 = vpop.f32.mrb[4].mxu0  ;;  %v290_v36 = vadd.f32 %v423_v23, %v289_v31  ;;  %v434_v37 = vpop.f32.mrb[4].mxu1 }
  0xfe   :  { %272 = vst [vmem:[%s676_s5 + $0x30] sm:$0xff] %v426_v35  ;;  %v219_v38 = vpop.f32.mrb[5].mxu0  ;;  %280 = vst [vmem:[%s676_s5 + $0x70] sm:$0xff] %v434_v37  ;;  %v251_v39 = vpop.f32.mrb[5].mxu1  ;;  %v318_v50 = vmul.f32 %v426_v35, %v426_v35  ;;  %v326_v6 = vmul.f32 %v434_v37, %v434_v37 }
  0xff   :  { %270 = vst [vmem:[%s676_s5 + $0x20] sm:$0xff] %v219_v38  ;;  %v291_v40 = vadd.f32 %v290_v36, %v219_v38  ;;  %v316_v41 = vmul.f32 %v219_v38, %v219_v38  ;;  %v330_v42 = vadd.f32 %v329_v34, %v315_v33  ;;  %v427_v43 = vpop.f32.mrb[6].mxu0  ;;  %278 = vst [vmem:[%s676_s5 + $0x60] sm:$0xff] %v251_v39  ;;  %v435_v44 = vpop.f32.mrb[6].mxu1 }
 0x100   :  { %273 = vst [vmem:[%s676_s5 + $0x38] sm:$0xff] %v427_v43  ;;  %v222_v45 = vpop.f32.mrb[7].mxu0  ;;  %281 = vst [vmem:[%s676_s5 + $0x78] sm:$0xff] %v435_v44  ;;  %v254_v46 = vpop.f32.mrb[7].mxu1  ;;  %v319_v53 = vmul.f32 %v427_v43, %v427_v43  ;;  %v324_v4 = vmul.f32 %v251_v39, %v251_v39  ;;  %v327_v14 = vmul.f32 %v435_v44, %v435_v44 }
 0x101   :  { %v331_v47 = vadd.f32 %v330_v42, %v316_v41  ;;  %271 = vst [vmem:[%s676_s5 + $0x28] sm:$0xff] %v222_v45  ;;  %v292_v48 = vadd.f32 %v291_v40, %v222_v45  ;;  %v317_v49 = vmul.f32 %v222_v45, %v222_v45  ;;  %279 = vst [vmem:[%s676_s5 + $0x68] sm:$0xff] %v254_v46  ;;  %v361_v41 = vld [vmem:[%s677_s3] sm:$0x1] }
 0x102   :  { %v325_v11 = vmul.f32 %v254_v46, %v254_v46 }
 0x103   :  { %v293_v51 = vadd.f32 %v426_v35, %v292_v48  ;;  %v332_v52 = vadd.f32 %v331_v47, %v317_v49 }
 0x105   :  { %v333_v54 = vadd.f32 %v332_v52, %v318_v50  ;;  %v294_v55 = vadd.f32 %v427_v43, %v293_v51 }
 0x107   :  { %v295_v57 = vadd.f32 %v294_v55, %v235_v22  ;;  %v334_v58 = vadd.f32 %v333_v54, %v319_v53 }
 0x109   :  { %v335_v59 = vadd.f32 %v334_v58, %v320_v56  ;;  %v296_v60 = vadd.f32 %v295_v57, %v238_v26  ;;  %v287_v26 = vld [vmem:[#allocation2] sm:$0x1] }
 0x10b   :  { %v297_v63 = vadd.f32 %v430_v9, %v296_v60  ;;  %v336_v0 = vadd.f32 %v335_v59, %v321_v61 }
 0x10d   :  { %v337_v2 = vadd.f32 %v336_v0, %v322_v62  ;;  %v298_v3 = vadd.f32 %v431_v24, %v297_v63 }
 0x10f   :  { %v299_v5 = vadd.f32 %v298_v3, %v251_v39  ;;  %v338_v7 = vadd.f32 %v337_v2, %v323_v1 }
 0x111   :  { %v339_v8 = vadd.f32 %v338_v7, %v324_v4  ;;  %v300_v10 = vadd.f32 %v299_v5, %v254_v46 }
 0x113   :  { %v301_v12 = vadd.f32 %v434_v37, %v300_v10  ;;  %v340_v13 = vadd.f32 %v339_v8, %v325_v11 }
 0x115   :  { %v302_v15 = vadd.f32 %v435_v44, %v301_v12  ;;  %v341_v16 = vadd.f32 %v340_v13, %v326_v6  ;;  %v366_v44 = vld [vmem:[%s678_s4] sm:$0x1] }
 0x117   :  { %v303_v17 = vrot.slane %v302_v15, 4  ;;  %v342_v18 = vadd.f32 %v341_v16, %v327_v14 }
 0x119   :  { %v304_v19 = vadd.f32 %v303_v17, %v302_v15  ;;  %v343_v20 = vrot.slane %v342_v18, 4 }
 0x11b   :  { %v305_v9 = vrot.slane %v304_v19, 2  ;;  %v344_v21 = vadd.f32 %v343_v20, %v342_v18 }
 0x11d   :  { %v306_v22 = vadd.f32 %v305_v9, %v304_v19  ;;  %v345_v23 = vrot.slane %v344_v21, 2 }
 0x11f   :  { %v307_v24 = vrot.slane %v306_v22, 1  ;;  %v346_v25 = vadd.f32 %v345_v23, %v344_v21 }
 0x121   :  { %v308_v27 = vadd.f32 %v307_v24, %v306_v22  ;;  %v347_v28 = vrot.slane %v346_v25, 1 }
 0x123   :  { %v309_v30 = vadd.f32 %v308_v27, %v287_v26  ;;  %v348_v31 = vadd.f32 %v347_v28, %v346_v25 }
 0x125   :  { %310 = vst [vmem:[#allocation2] sm:$0x1] %v309_v30  ;;  %v349_v32 = vadd.f32 %v348_v31, %v311_v29 }
 0x127   :  { %350 = vst [vmem:[#allocation2 + $0x1] sm:$0x1] %v349_v32 }
 0x12c   :  { %v354_v33 = vld [vmem:[#allocation2] sm:$0x1] }
 0x12d   :  { %v355_v34 = vmul.f32 0.0078125, %v354_v33 }
 0x12e   :  { %v356_v35 = vld [vmem:[#allocation2 + $0x1] sm:$0x1] }
 0x12f   :  { %v357_v36 = vmul.f32 0.0078125, %v356_v35  ;;  %v358_v37 = vmul.f32 %v355_v34, %v355_v34 }
 0x131   :  { %v359_v38 = vsub.f32 %v357_v36, %v358_v37 }
 0x133   :  { %v360_v39 = vmax.f32 %v359_v38, 0.0 }
 0x135   :  { %v362_v40 = vadd.f32 1e-05, %v360_v39 }
 0x137   :  { %461 = vrsqrt.f32 %v362_v40 }
 0x141   :  { %v462_v42 = vpop.eup %461 }
 0x142   :  { %v364_v43 = vmul.f32 %v462_v42, %v361_v41 }
 0x144   :  { %365 = vst [vmem:[%s679_s6] sm:$0x1] %v364_v43  ;;  %v367_v45 = vmul.f32 %v364_v43, %v355_v34 }
 0x146   :  { %v368_v46 = vsub.f32 %v366_v44, %v367_v45 }
 0x148   :  { %369 = vst [vmem:[%s679_s6 + $0x1] sm:$0x1] %v368_v46 }

// kernel: bottleneck_forward.6
= control target key start
LH: loop header
LB: loop body
LE: loop exit
PB: predicated region body
PF: predicated region fallthrough
CT: control target
= control target key end

     0   :  { %s3458_s18 = smov 0   ;;  %s3460_s19 = smov 0   ;;  %s3854_s0 = inlined_call_operand.vmem [shape: bf16[2,36,9,128], index: 0, kind: input, shape index: {}]   ;;  %s3855_s1 = inlined_call_operand.vmem [shape: bf16[9,128,128], index: 1, kind: input, shape index: {}]   ;;  %s3856_s2 = inlined_call_operand.vmem [shape: f32[1,128], index: 2, kind: input, shape index: {}]   ;;  %s3857_s3 = inlined_call_operand.vmem [shape: f32[1,128], index: 3, kind: input, shape index: {}]   ;;  %s3858_s4 = inlined_call_operand.vmem [shape: f32[128,128], index: 4, kind: output, shape index: {0}]   ;;  %s3859_s5 = inlined_call_operand.vmem [shape: f32[2,128], index: 5, kind: output, shape index: {1}]  }
   0x1   :  { %s3462_s20 = smov 0  }
   0x2 LB: > { %s25_s21 = sadd.s32 1, %s3421_s19  ;;  %p2558_p0 = scmp.ge.s32.totalorder %s3425_s20, 1  ;;  %s3425_s20 = sphi %s3462_s20, %s16_s20   ;;  %s3421_s19 = sphi %s3460_s19, %s3863_s19   ;;  %s3417_s18 = sphi %s3458_s18, %s3862_s18  }
   0x3   : > { %p26_p1 = scmp.ge.s32.totalorder %s25_s21, 2  ;;  %p229_p2 = scmp.lt.s32.totalorder %s3425_s20, 3 }
   0x5   : > { %s3865_s21 = smov (%p26_p1, %s25_s21), 0  ;;  %p230_p3 = pnand %p2558_p0, %p229_p2 }
   0x6   : > { %v3305_v0 = vld [vmem:[%s3855_s1] sm:$0xff] (!%p230_p3)   ;;  %p274_p4 = scmp.lt.s32.totalorder (!%p230_p3), %s3417_s18, 1  ;;  %v3307_v2 = vld [vmem:[%s3855_s1 + $0x8] sm:$0xff] (!%p230_p3)   ;;  %v3309_v4 = vld [vmem:[%s3855_s1 + $0x10] sm:$0xff] (!%p230_p3)   ;;  %vm699_vm0 = vsmask.f32 (!%p230_p3), 3328 }
   0x7   : > { %233 = sbr.rel (%p230_p3) target bundleno = 450 (0x1c2), region = 36  ;;  %v3306_v1 = vld [vmem:[%s3855_s1 + $0x100] sm:$0xff] (!%p230_p3)   ;;  %2983 = vmatprep.subr.bf16.mxu1 (!%p230_p3), %v3305_v0  ;;  %v3308_v3 = vld [vmem:[%s3855_s1 + $0x108] sm:$0xff] (!%p230_p3)   ;;  %v3310_v5 = vld [vmem:[%s3855_s1 + $0x110] sm:$0xff] (!%p230_p3)   ;;  %vm700_vm1 = vsmask.f32 (!%p230_p3), 7440 }
   0x8   : > { %3079 = vmatprep.subr.bf16.mxu0 (!%p230_p3), %v3306_v1  ;;  %2984 = vmatpush3.bf16.msra.mxu1 (!%p230_p3), %v3305_v0  ;;  %v3311_v6 = vld [vmem:[%s3855_s1 + $0x18] sm:$0xff] (!%p230_p3)   ;;  %v3313_v8 = vld [vmem:[%s3855_s1 + $0x20] sm:$0xff] (!%p230_p3)   ;;  %v3315_v10 = vld [vmem:[%s3855_s1 + $0x28] sm:$0xff] (!%p230_p3)   ;;  %s2560_s29 = sshll.u32 (!%p230_p3), %s3417_s18, 3  ;;  %p2870_p6 = scmp.ne.s32.totalorder (!%p230_p3), %s3417_s18, 0 }
   0x9   : > { %3080 = vmatpush3.bf16.msra.mxu0 (!%p230_p3), %v3306_v1  ;;  %2985 = vmatprep.subr.bf16.mxu1 (!%p230_p3), %v3307_v2  ;;  %v3312_v7 = vld [vmem:[%s3855_s1 + $0x118] sm:$0xff] (!%p230_p3)   ;;  %v3314_v9 = vld [vmem:[%s3855_s1 + $0x120] sm:$0xff] (!%p230_p3)   ;;  %v3316_v12 = vld [vmem:[%s3855_s1 + $0x128] sm:$0xff] (!%p230_p3)   ;;  %p290_p5 = scmp.lt.s32.totalorder (!%p230_p3), %s2560_s29, 15 }
   0xa   : > { %3081 = vmatprep.subr.bf16.mxu0 (!%p230_p3), %v3308_v3  ;;  %v3317_v14 = vld [vmem:[%s3855_s1 + $0x30] sm:$0xff] (!%p230_p3)   ;;  %v3319_v16 = vld [vmem:[%s3855_s1 + $0x38] sm:$0xff] (!%p230_p3)   ;;  %v3322_v18 = vld [vmem:[%s3855_s1 + $0x40] sm:$0xff] (!%p230_p3)  }
   0xb   : > { %v3318_v15 = vld [vmem:[%s3855_s1 + $0x130] sm:$0xff] (!%p230_p3)   ;;  %v3320_v17 = vld [vmem:[%s3855_s1 + $0x138] sm:$0xff] (!%p230_p3)   ;;  %v3324_v19 = vld [vmem:[%s3855_s1 + $0x140] sm:$0xff] (!%p230_p3)  }
   0xc   : > { %2986 = vmatpush3.bf16.msra.mxu1 (!%p230_p3), %v3307_v2  ;;  %v3327_v22 = vld [vmem:[%s3855_s1 + $0x48] sm:$0xff] (!%p230_p3)   ;;  %v3329_v26 = vld [vmem:[%s3855_s1 + $0x50] sm:$0xff] (!%p230_p3)   ;;  %v3331_v28 = vld [vmem:[%s3855_s1 + $0x58] sm:$0xff] (!%p230_p3)  }
   0xd   : > { %3082 = vmatpush3.bf16.msra.mxu0 (!%p230_p3), %v3308_v3  ;;  %2987 = vmatprep.subr.bf16.mxu1 (!%p230_p3), %v3309_v4  ;;  %v3328_v23 = vld [vmem:[%s3855_s1 + $0x148] sm:$0xff] (!%p230_p3)   ;;  %v3330_v27 = vld [vmem:[%s3855_s1 + $0x150] sm:$0xff] (!%p230_p3)   ;;  %v3332_v31 = vld [vmem:[%s3855_s1 + $0x158] sm:$0xff] (!%p230_p3)  }
   0xe   : > { %s275_s9 = scalar_select %p274_p4, %s3417_s18, 1  ;;  %3083 = vmatprep.subr.bf16.mxu0 %v3310_v5  ;;  %v3333_v38 = vld [vmem:[%s3855_s1 + $0x60] sm:$0xff]   ;;  %v3335_v47 = vld [vmem:[%s3855_s1 + $0x68] sm:$0xff]   ;;  %vm3584_vm2 = vmor %vm699_vm0, %vm700_vm1 }
   0xf   : > { %v3334_v43 = vld [vmem:[%s3855_s1 + $0x160] sm:$0xff]   ;;  %v3336_v50 = vld [vmem:[%s3855_s1 + $0x168] sm:$0xff]   ;;  %v3338_v2 = vld [vmem:[%s3855_s1 + $0x70] sm:$0xff]   ;;  %s3867_s29 = smov (!%p290_p5, %s2560_s29), 15 }
  0x10   : > { %s3279_s14 = smul.u32 288, %s275_s9  ;;  %2988 = vmatpush3.bf16.msra.mxu1 %v3309_v4  ;;  %s2561_s30 = sshll.u32 %s3867_s29, 3 }
  0x11   : > { %3084 = vmatpush3.bf16.msra.mxu0 %v3310_v5  ;;  %2989 = vmatprep.subr.bf16.mxu1 %v3311_v6  ;;  %s296_s8 = scalar_lea.vmem %s3858_s4, %s2561_s30 }
  0x12   : > { %3085 = vmatprep.subr.bf16.mxu0 %v3312_v7  ;;  %s3513_s25 = scalar_lea.vmem %s3854_s0, %s3279_s14 }
  0x13   : > { %v3321_v11 = vld [vmem:[%s3513_s25] ss:$8 sps:$4 sm:$0xff]   ;;  %v3325_v20 = vld [vmem:[%s3513_s25 + $0x10] ss:$8 sps:$4 sm:$0xff]   ;;  %v2711_v34 = vld [vmem:[%s3513_s25 + $0x94] sm:$0x1] }
  0x14   : > { %2990 = vmatpush3.bf16.msra.mxu1 %v3311_v6  ;;  %2999 = vmatprep.mubr.bf16.mxu1 %v3321_v11  ;;  %v3323_v13 = vld [vmem:[%s3513_s25 + $0xd8] ss:$8 sps:$4 sm:$0xff]   ;;  %v3326_v21 = vld [vmem:[%s3513_s25 + $0xe8] ss:$8 sps:$4 sm:$0xff]   ;;  %v2713_v39 = vld [vmem:[%s3513_s25 + $0x9c] sm:$0x1] }
  0x15   : > { %3086 = vmatpush3.bf16.msra.mxu0 %v3312_v7  ;;  %2991 = vmatprep.subr.bf16.mxu1 %v3313_v8  ;;  %v3337_v24 = vld [vmem:[%s3513_s25 + $0x20] ss:$8 sps:$4 sm:$0xff]   ;;  %v3341_v29 = vld [vmem:[%s3513_s25 + $0x30] ss:$8 sps:$4 sm:$0xff]   ;;  %v1384_v40 = vshll.u32 %v2711_v34, 16  ;;  %v1398_v46 = vshll.u32 %v2713_v39, 16 }
  0x16   : > { %3087 = vmatprep.subr.bf16.mxu0 %v3314_v9  ;;  %3095 = vmatprep.mubr.bf16.mxu0 %v3323_v13  ;;  %v3339_v25 = vld [vmem:[%s3513_s25 + $0xf8] ss:$8 sps:$4 sm:$0xff]   ;;  %v3342_v30 = vld [vmem:[%s3513_s25 + $0x108] ss:$8 sps:$4 sm:$0xff]   ;;  %v2715_v57 = vld [vmem:[%s3513_s25 + $0xa4] sm:$0x1] }
  0x17   : > { %v3345_v32 = vld [vmem:[%s3513_s25 + $0x48] ss:$8 sps:$4 sm:$0xff]   ;;  %v2712_v35 = vld [vmem:[%s3513_s25 + $0x98] sm:$0xf]  ;;  %v1386_v52 = vrot.slane %v1384_v40, 5  ;;  %v1400_v55 = vrot.slane %v1398_v46, 5 }
  0x18   : > { %2992 = vmatpush3.bf16.msra.mxu1 %v3313_v8  ;;  %v2710_v33 = vld [vmem:[%s3513_s25 + $0x90] sm:$0xf]  ;;  %v1389_v41 = vshrl.u32 %v2712_v35, 16  ;;  %v1392_v42 = vshll.u32 %v2712_v35, 16  ;;  %v2714_v56 = vld [vmem:[%s3513_s25 + $0xa0] sm:$0xf] }
  0x19   : > { %3088 = vmatpush3.bf16.msra.mxu0 %v3314_v9  ;;  %2993 = vmatprep.subr.bf16.mxu1 %v3315_v10  ;;  %v1375_v36 = vshrl.u32 %v2710_v33, 16  ;;  %v1378_v37 = vshll.u32 %v2710_v33, 16  ;;  %v2716_v59 = vld [vmem:[%s3513_s25 + $0xa8] sm:$0xf]  ;;  %v2717_v60 = vld [vmem:[%s3513_s25 + $0xac] sm:$0x1] }
  0x1a   : > { %3089 = vmatprep.subr.bf16.mxu0 %v3316_v12  ;;  %v1391_v48 = vrot.slane %v1389_v41, 4  ;;  %v1394_v49 = vrot.slane %v1392_v42, 5  ;;  %v1403_v61 = vshrl.u32 %v2714_v56, 16  ;;  %v1406_v63 = vshll.u32 %v2714_v56, 16  ;;  %v3340_v6 = vld [vmem:[%s3855_s1 + $0x170] sm:$0xff]  }
  0x1b   : > { %v1377_v44 = vrot.slane %v1375_v36, 4  ;;  %v1380_v45 = vrot.slane %v1378_v37, 5  ;;  %v1412_v0 = vshll.u32 %v2715_v57, 16  ;;  %v1417_v1 = vshrl.u32 %v2716_v59, 16  ;;  %v3359_v37 = vld [vmem:[%s3513_s25 + $0x68] ss:$8 sps:$4 sm:$0xff]  }
  0x1c   : > { %2994 = vmatpush3.bf16.msra.mxu1 %v3315_v10  ;;  %v1395_v54 = vor.u32 %v1394_v49, %v1391_v48  ;;  %v1405_v4 = vrot.slane %v1403_v61, 4  ;;  %v1420_v5 = vshll.u32 %v2716_v59, 16  ;;  %v1408_v8 = vrot.slane %v1406_v63, 5  ;;  %v3362_v48 = vld [vmem:[%s3513_s25 + $0x78] ss:$8 sps:$4 sm:$0xff]  }
  0x1d   : > { %3090 = vmatpush3.bf16.msra.mxu0 %v3316_v12  ;;  %2995 = vmatprep.subr.bf16.mxu1 %v3317_v14  ;;  %v1381_v51 = vor.u32 %v1380_v45, %v1377_v44  ;;  %v1419_v9 = vrot.slane %v1417_v1, 4  ;;  %v1426_v10 = vshll.u32 %v2717_v60, 16  ;;  %v1414_v12 = vrot.slane %v1412_v0, 5  ;;  %v2722_v49 = vld [vmem:[%s3513_s25 + $0xc0] sm:$0xf]  ;;  %v3353_v59 = vld [vmem:[%s3855_s1 + $0x98] sm:$0xff]  }
  0x1e   : > { %3091 = vmatprep.subr.bf16.mxu0 %v3318_v15  ;;  %v1396_v62 = vrot.slane %v1395_v54, 4  ;;  %v1422_v13 = vrot.slane %v1420_v5, 5  ;;  %v1459_v56 = vshrl.u32 %v2722_v49, 16  ;;  %v1462_v57 = vshll.u32 %v2722_v49, 16 }
  0x1f   : > { %v1382_v58 = vrot.slane %v1381_v51, 4  ;;  %v2724_v51 = vld [vmem:[%s3513_s25 + $0xc8] sm:$0xf] }
  0x20   : > { %2996 = vmatpush3.bf16.msra.mxu1 %v3317_v14  ;;  %v1401_v7 = vsel %vm3584_vm2, %v1396_v62, %v1400_v55  ;;  %v3343_v14 = vld [vmem:[%s3855_s1 + $0x78] sm:$0xff]   ;;  %v2725_v55 = vld [vmem:[%s3513_s25 + $0xcc] sm:$0x1]  ;;  %v1473_v61 = vshrl.u32 %v2724_v51, 16  ;;  %v1476_v62 = vshll.u32 %v2724_v51, 16  ;;  %v1461_v1 = vrot.slane %v1459_v56, 4 }
  0x21   : > { %3092 = vmatpush3.bf16.msra.mxu0 %v3318_v15  ;;  %2997 = vmatprep.subr.bf16.mxu1 %v3319_v16  ;;  %v1387_v3 = vsel %vm3584_vm2, %v1382_v58, %v1386_v52  ;;  %v1409_v15 = vor.u32 %v1408_v8, %v1405_v4  ;;  %v3352_v52 = vld [vmem:[%s3855_s1 + $0x190] sm:$0xff]   ;;  %v1482_v63 = vshll.u32 %v2725_v55, 16  ;;  %v3354_v4 = vld [vmem:[%s3855_s1 + $0x198] sm:$0xff]  }
  0x22   : > { %3093 = vmatprep.subr.bf16.mxu0 %v3320_v17  ;;  %v2742_v11 = vcombine.low %v1387_v3, %v1401_v7  ;;  %v1478_v7 = vrot.slane %v1476_v62, 5 }
  0x23   : > { %v1484_v8 = vrot.slane %v1482_v63, 5 }
  0x24   : > { %2998 = vmatpush3.bf16.msra.mxu1 %v3319_v16  ;;  %v1423_v16 = vor.u32 %v1422_v13, %v1419_v9  ;;  %v3355_v13 = vld [vmem:[%s3855_s1 + $0xa0] sm:$0xff]  }
  0x25   : > { %3094 = vmatpush3.bf16.msra.mxu0 %v3320_v17  ;;  %3007 = vmatprep.subr.bf16.mxu1 %v3322_v18  ;;  %v1410_v17 = vrot.slane %v1409_v15, 4 }
  0x26   : > { %3103 = vmatprep.subr.bf16.mxu0 %v3324_v19 }
  0x27   : > { %3000 = vmatmul.mubr.bf16.vlgmr.msra.gmra.mrb[0].mxu1 %v3325_v20  ;;  %v1424_v20 = vrot.slane %v1423_v16, 4  ;;  %v685_v16 = vld [vmem:[%s3513_s25 + $0x8] sm:$0xf] }
  0x28   : > { %3008 = vmatpush3.bf16.msra.mxu1 %v3322_v18  ;;  %3096 = vmatmul.mubr.bf16.vlgmr.msra.gmra.mrb[0].mxu0 %v3326_v21  ;;  %v1428_v18 = vrot.slane %v1426_v10, 5  ;;  %v3346_v21 = vld [vmem:[%s3855_s1 + $0x80] sm:$0xff]  }
  0x29   : > { %3104 = vmatpush3.bf16.msra.mxu0 %v3324_v19  ;;  %3009 = vmatprep.subr.bf16.mxu1 %v3327_v22  ;;  %v3344_v19 = vld [vmem:[%s3855_s1 + $0x178] sm:$0xff]  }
  0x2a   : > { %3105 = vmatprep.subr.bf16.mxu0 %v3328_v23  ;;  %3003 = vmatprep.mubr.bf16.mxu1 %v3337_v24  ;;  %v3347_v24 = vld [vmem:[%s3855_s1 + $0x180] sm:$0xff]  }
  0x2b   : > { %3099 = vmatprep.mubr.bf16.mxu0 %v3339_v25  ;;  %v3348_v25 = vld [vmem:[%s3513_s25 + $0x58] ss:$8 sps:$4 sm:$0xff]  }
  0x2c   : > { %3010 = vmatpush3.bf16.msra.mxu1 %v3327_v22  ;;  %v1415_v22 = vsel %vm3584_vm2, %v1410_v17, %v1414_v12  ;;  %v684_v12 = vld [vmem:[%s3513_s25 + $0x4] sm:$0x1]  ;;  %v686_v17 = vld [vmem:[%s3513_s25 + $0xc] sm:$0x1] }
  0x2d   : > { %3106 = vmatpush3.bf16.msra.mxu0 %v3328_v23  ;;  %3011 = vmatprep.subr.bf16.mxu1 %v3329_v26  ;;  %v1429_v23 = vsel %vm3584_vm2, %v1424_v20, %v1428_v18 }
  0x2e   : > { %3107 = vmatprep.subr.bf16.mxu0 %v3330_v27 }
  0x2f   : > { %3004 = vmatmul.mubr.bf16.gmra.mrb[4].mxu1 %v3341_v29  ;;  %v3350_v29 = vld [vmem:[%s3855_s1 + $0x188] sm:$0xff]  }
  0x30   : > { %3012 = vmatpush3.bf16.msra.mxu1 %v3329_v26  ;;  %3100 = vmatmul.mubr.bf16.gmra.mrb[4].mxu0 %v3342_v30  ;;  %v3349_v26 = vld [vmem:[%s3855_s1 + $0x88] sm:$0xff]   ;;  %v2719_v30 = vld [vmem:[%s3513_s25 + $0xb4] sm:$0x1] }
  0x31   : > { %3108 = vmatpush3.bf16.msra.mxu0 %v3330_v27  ;;  %3013 = vmatprep.subr.bf16.mxu1 %v3331_v28  ;;  %v2718_v27 = vld [vmem:[%s3513_s25 + $0xb0] sm:$0xf]  ;;  %v1440_v35 = vshll.u32 %v2719_v30, 16 }
  0x32   : > { %3109 = vmatprep.subr.bf16.mxu0 %v3332_v31  ;;  %3023 = vmatprep.mubr.bf16.mxu1 %v3345_v32  ;;  %v2721_v32 = vld [vmem:[%s3513_s25 + $0xbc] sm:$0x1]  ;;  %v1431_v33 = vshrl.u32 %v2718_v27, 16  ;;  %v1434_v34 = vshll.u32 %v2718_v27, 16  ;;  %v726_v27 = vshll.u32 %v686_v17, 16 }
  0x33   : > { %3119 = vmatprep.mubr.bf16.mxu0 %v2742_v11  ;;  %v1454_v39 = vshll.u32 %v2721_v32, 16  ;;  %v1442_v44 = vrot.slane %v1440_v35, 5  ;;  %v683_v11 = vld [vmem:[%s3513_s25] sm:$0xf]  ;;  %v3357_v32 = vld [vmem:[%s3855_s1 + $0xa8] sm:$0xff]  }
  0x34   : > { %3014 = vmatpush3.bf16.msra.mxu1 %v3331_v28  ;;  %v2743_v28 = vcombine.low %v1415_v22, %v1429_v23  ;;  %v1433_v40 = vrot.slane %v1431_v33, 4  ;;  %v1436_v41 = vrot.slane %v1434_v34, 5  ;;  %v703_v18 = vshrl.u32 %v683_v11, 16  ;;  %v694_v17 = vld [vmem:[%s3513_s25 + $0x2c] sm:$0x1] }
  0x35   : > { %3110 = vmatpush3.bf16.msra.mxu0 %v3332_v31  ;;  %3015 = vmatprep.subr.bf16.mxu1 %v3333_v38  ;;  %v2720_v31 = vld [vmem:[%s3513_s25 + $0xb8] sm:$0xf]  ;;  %v1456_v46 = vrot.slane %v1454_v39, 5  ;;  %v717_v22 = vshrl.u32 %v685_v16, 16  ;;  %v720_v23 = vshll.u32 %v685_v16, 16 }
  0x36   : > { %3111 = vmatprep.subr.bf16.mxu0 %v3334_v43  ;;  %v1445_v36 = vshrl.u32 %v2720_v31, 16  ;;  %v693_v16 = vld [vmem:[%s3513_s25 + $0x28] sm:$0xf] }
  0x37   : > { %v719_v30 = vrot.slane %v717_v22, 4  ;;  %v773_v22 = vshrl.u32 %v693_v16, 16 }
  0x38   : > { %3016 = vmatpush3.bf16.msra.mxu1 %v3333_v38  ;;  %v1448_v38 = vshll.u32 %v2720_v31, 16  ;;  %v1447_v42 = vrot.slane %v1445_v36, 4  ;;  %v722_v31 = vrot.slane %v720_v23, 5  ;;  %v728_v36 = vrot.slane %v726_v27, 5 }
  0x39   : > { %3112 = vmatpush3.bf16.msra.mxu0 %v3334_v43  ;;  %3017 = vmatprep.subr.bf16.mxu1 %v3335_v47  ;;  %v3351_v43 = vld [vmem:[%s3855_s1 + $0x90] sm:$0xff]   ;;  %v776_v23 = vshll.u32 %v693_v16, 16  ;;  %v2827_v16 = vld [vmem:[%s3513_s25 + $0xc] sm:$0x1] }
  0x3a   : > { %3113 = vmatprep.subr.bf16.mxu0 %v3336_v50  ;;  %v1450_v45 = vrot.slane %v1448_v38, 5  ;;  %v3358_v38 = vld [vmem:[%s3855_s1 + $0x1a8] sm:$0xff]  }
  0x3c   : > { %3018 = vmatpush3.bf16.msra.mxu1 %v3335_v47  ;;  %v1437_v47 = vor.u32 %v1436_v41, %v1433_v40  ;;  %v1451_v54 = vor.u32 %v1450_v45, %v1447_v42  ;;  %v723_v40 = vor.u32 %v722_v31, %v719_v30  ;;  %v687_v41 = vld [vmem:[%s3513_s25 + $0x10] sm:$0xf]  ;;  %v778_v31 = vrot.slane %v776_v23, 5 }
  0x3d   : > { %3114 = vmatpush3.bf16.msra.mxu0 %v3336_v50  ;;  %3019 = vmatprep.subr.bf16.mxu1 %v3338_v2  ;;  %v2723_v50 = vld [vmem:[%s3513_s25 + $0xc4] sm:$0x1]  ;;  %v731_v45 = vshrl.u32 %v687_v41, 16  ;;  %v695_v30 = vld [vmem:[%s3513_s25 + $0x30] sm:$0xf] }
  0x3e   : > { %3115 = vmatprep.subr.bf16.mxu0 %v3340_v6  ;;  %v1468_v58 = vshll.u32 %v2723_v50, 16  ;;  %v1438_v60 = vrot.slane %v1437_v47, 4  ;;  %v1452_v0 = vrot.slane %v1451_v54, 4  ;;  %v690_v47 = vld [vmem:[%s3513_s25 + $0x1c] sm:$0x1] }
  0x40   : > { %3020 = vmatpush3.bf16.msra.mxu1 %v3338_v2  ;;  %v1464_v2 = vrot.slane %v1462_v57, 5  ;;  %v1470_v3 = vrot.slane %v1468_v58, 5  ;;  %v1443_v5 = vsel %vm3584_vm2, %v1438_v60, %v1442_v44  ;;  %v1457_v9 = vsel %vm3584_vm2, %v1452_v0, %v1456_v46  ;;  %v689_v44 = vld [vmem:[%s3513_s25 + $0x18] sm:$0xf]  ;;  %v3361_v60 = vld [vmem:[%s3855_s1 + $0x1b0] sm:$0xff]  }
  0x41   : > { %3116 = vmatpush3.bf16.msra.mxu0 %v3340_v6  ;;  %3021 = vmatprep.subr.bf16.mxu1 %v3343_v14  ;;  %v1475_v6 = vrot.slane %v1473_v61, 4  ;;  %v724_v46 = vrot.slane %v723_v40, 4  ;;  %v745_v50 = vshrl.u32 %v689_v44, 16  ;;  %v748_v54 = vshll.u32 %v689_v44, 16 }
  0x42   : > { %3117 = vmatprep.subr.bf16.mxu0 %v3344_v19  ;;  %v1465_v10 = vor.u32 %v1464_v2, %v1461_v1  ;;  %v754_v58 = vshll.u32 %v690_v47, 16 }
  0x43   : > { %v1479_v15 = vor.u32 %v1478_v7, %v1475_v6  ;;  %v729_v55 = vsel %vm3584_vm2, %v724_v46, %v728_v36  ;;  %v747_v57 = vrot.slane %v745_v50, 4  ;;  %v750_v63 = vrot.slane %v748_v54, 5  ;;  %v3364_v6 = vld [vmem:[%s3855_s1 + $0x1b8] sm:$0xff]   ;;  %v3365_v7 = vld [vmem:[%s3855_s1 + $0xc0] sm:$0xff]  }
  0x44   : > { %3022 = vmatpush3.bf16.msra.mxu1 %v3343_v14  ;;  %v2744_v14 = vcombine.low %v1443_v5, %v1457_v9  ;;  %v1466_v20 = vrot.slane %v1465_v10, 4  ;;  %v3367_v10 = vld [vmem:[%s3855_s1 + $0x1c0] sm:$0xff]   ;;  %v3373_v50 = vld [vmem:[%s3855_s1 + $0xd8] sm:$0xff]  }
  0x45   : > { %3118 = vmatpush3.bf16.msra.mxu0 %v3344_v19  ;;  %3031 = vmatprep.subr.bf16.mxu1 %v3346_v21  ;;  %v706_v19 = vshll.u32 %v683_v11, 16  ;;  %v751_v1 = vor.u32 %v750_v63, %v747_v57  ;;  %v3368_v11 = vld [vmem:[%s3513_s25 + $0x18] ss:$8 sps:$4 sm:$0xff]  }
  0x46   : > { %3127 = vmatprep.subr.bf16.mxu0 %v3347_v24 }
  0x47   : > { %3024 = vmatmul.mubr.bf16.vlgmr.msra.gmra.mrb[0].mxu1 %v3348_v25  ;;  %v705_v25 = vrot.slane %v703_v18, 4  ;;  %v752_v5 = vrot.slane %v751_v1, 4  ;;  %v3370_v18 = vld [vmem:[%s3855_s1 + $0x1c8] sm:$0xff]   ;;  %v3375_v1 = vld [vmem:[%s3855_s1 + $0xe0] sm:$0xff]  }
  0x48   : > { %3032 = vmatpush3.bf16.msra.mxu1 %v3346_v21  ;;  %3120 = vmatmul.mubr.bf16.vlgmr.msra.gmra.mrb[0].mxu0 %v2743_v28  ;;  %v712_v21 = vshll.u32 %v684_v12, 16  ;;  %v3356_v28 = vld [vmem:[%s3855_s1 + $0x1a0] sm:$0xff]  }
  0x49   : > { %3128 = vmatpush3.bf16.msra.mxu0 %v3347_v24  ;;  %3033 = vmatprep.subr.bf16.mxu1 %v3349_v26  ;;  %v1480_v24 = vrot.slane %v1479_v15, 4  ;;  %v691_v12 = vld [vmem:[%s3513_s25 + $0x20] sm:$0xf]  ;;  %v692_v15 = vld [vmem:[%s3513_s25 + $0x24] sm:$0x1] }
  0x4a   : > { %3129 = vmatprep.subr.bf16.mxu0 %v3350_v29  ;;  %3027 = vmatprep.mubr.bf16.mxu1 %v3359_v37  ;;  %v714_v35 = vrot.slane %v712_v21, 5  ;;  %v3366_v37 = vld [vmem:[%s3513_s25 + $0x8] ss:$8 sps:$4 sm:$0xff]   ;;  %v768_v21 = vshll.u32 %v692_v15, 16 }
  0x4b   : > { %3123 = vmatprep.mubr.bf16.mxu0 %v2744_v14  ;;  %v1485_v33 = vsel %vm3584_vm2, %v1480_v24, %v1484_v8  ;;  %v3369_v14 = vld [vmem:[%s3855_s1 + $0xc8] sm:$0xff]   ;;  %v782_v24 = vshll.u32 %v694_v17, 16  ;;  %v2828_v17 = vld [vmem:[%s3513_s25 + $0x10] sm:$0xf] }
  0x4c   : > { %3034 = vmatpush3.bf16.msra.mxu1 %v3349_v26  ;;  %v708_v26 = vrot.slane %v706_v19, 5  ;;  %v759_v19 = vshrl.u32 %v691_v12, 16  ;;  %v2826_v15 = vld [vmem:[%s3513_s25 + $0x8] sm:$0xf]  ;;  %v2064_v23 = vshll.u32 %v2828_v17, 16 }
  0x4d   : > { %3130 = vmatpush3.bf16.msra.mxu0 %v3350_v29  ;;  %3035 = vmatprep.subr.bf16.mxu1 %v3351_v43  ;;  %v1471_v29 = vsel %vm3584_vm2, %v1466_v20, %v1470_v3  ;;  %v756_v3 = vrot.slane %v754_v58, 5  ;;  %v762_v20 = vshll.u32 %v691_v12, 16  ;;  %v3381_v58 = vld [vmem:[%s3513_s25 + $0x38] ss:$8 sps:$4 sm:$0xff]  }
  0x4e   : > { %3131 = vmatprep.subr.bf16.mxu0 %v3352_v52  ;;  %v709_v34 = vor.u32 %v708_v26, %v705_v25  ;;  %v2745_v39 = vcombine.low %v1471_v29, %v1485_v33  ;;  %v3379_v25 = vld [vmem:[%s3513_s25 + $0x28] ss:$8 sps:$4 sm:$0xff]   ;;  %v761_v26 = vrot.slane %v759_v19, 4  ;;  %v775_v29 = vrot.slane %v773_v22, 4  ;;  %v696_v33 = vld [vmem:[%s3513_s25 + $0x34] sm:$0x1] }
  0x4f   : > { %3028 = vmatmul.mubr.bf16.gmra.mrb[4].mxu1 %v3362_v48  ;;  %v734_v48 = vshll.u32 %v687_v41, 16  ;;  %v757_v9 = vsel %vm3584_vm2, %v752_v5, %v756_v3  ;;  %v764_v27 = vrot.slane %v762_v20, 5  ;;  %v796_v40 = vshll.u32 %v696_v33, 16  ;;  %v3372_v41 = vld [vmem:[%s3855_s1 + $0x1d0] sm:$0xff]   ;;  %v3376_v5 = vld [vmem:[%s3855_s1 + $0x1e0] sm:$0xff]   ;;  %v3383_v12 = vld [vmem:[%s3855_s1 + $0xf8] sm:$0xff]  }
  0x50   : > { %3036 = vmatpush3.bf16.msra.mxu1 %v3351_v43  ;;  %v710_v42 = vrot.slane %v709_v34, 4  ;;  %v688_v43 = vld [vmem:[%s3513_s25 + $0x14] sm:$0x1]  ;;  %3124 = vmatmul.mubr.bf16.gmra.mrb[4].mxu0 %v2745_v39  ;;  %v697_v34 = vld [vmem:[%s3513_s25 + $0x38] sm:$0xf]  ;;  %v790_v39 = vshll.u32 %v695_v30, 16 }
  0x51   : > { %3132 = vmatpush3.bf16.msra.mxu0 %v3352_v52  ;;  %3037 = vmatprep.subr.bf16.mxu1 %v3353_v59  ;;  %v740_v49 = vshll.u32 %v688_v43, 16  ;;  %v733_v52 = vrot.slane %v731_v45, 4  ;;  %v736_v56 = vrot.slane %v734_v48, 5  ;;  %v765_v36 = vor.u32 %v764_v27, %v761_v26  ;;  %v2837_v33 = vld [vmem:[%s3513_s25 + $0x34] sm:$0x1] }
  0x52   : > { %3133 = vmatprep.subr.bf16.mxu0 %v3354_v4  ;;  %v715_v51 = vsel %vm3584_vm2, %v710_v42, %v714_v35  ;;  %3143 = vmatprep.mubr.bf16.mxu0 %v3366_v37  ;;  %v3371_v35 = vld [vmem:[%s3855_s1 + $0xd0] sm:$0xff]   ;;  %v698_v37 = vld [vmem:[%s3513_s25 + $0x3c] sm:$0x1]  ;;  %v779_v42 = vor.u32 %v778_v31, %v775_v29  ;;  %v801_v43 = vshrl.u32 %v697_v34, 16  ;;  %v804_v44 = vshll.u32 %v697_v34, 16 }
  0x53   : > { %v2626_v61 = vcombine.low %v715_v51, %v729_v55  ;;  %v742_v62 = vrot.slane %v740_v49, 5  ;;  %v737_v0 = vor.u32 %v736_v56, %v733_v52  ;;  %v810_v45 = vshll.u32 %v698_v37, 16  ;;  %v2836_v29 = vld [vmem:[%s3513_s25 + $0x30] sm:$0xf]  ;;  %v3388_v34 = vld [vmem:[%s3513_s25 + $0x60] ss:$8 sps:$4 sm:$0xff]  }
  0x54   : > { %3038 = vmatpush3.bf16.msra.mxu1 %v3353_v59  ;;  %v3360_v59 = vld [vmem:[%s3855_s1 + $0xb0] sm:$0xff]   ;;  %v766_v46 = vrot.slane %v765_v36, 4  ;;  %v792_v48 = vrot.slane %v790_v39, 5  ;;  %v798_v49 = vrot.slane %v796_v40, 5  ;;  %v780_v51 = vrot.slane %v779_v42, 4  ;;  %v3390_v39 = vld [vmem:[%s3855_s1 + $0x208] sm:$0xff]  }
  0x55   : > { %3134 = vmatpush3.bf16.msra.mxu0 %v3354_v4  ;;  %3039 = vmatprep.subr.bf16.mxu1 %v3355_v13  ;;  %v738_v2 = vrot.slane %v737_v0, 4  ;;  %v3363_v4 = vld [vmem:[%s3855_s1 + $0xb8] sm:$0xff]   ;;  %v803_v52 = vrot.slane %v801_v43, 4  ;;  %v806_v54 = vrot.slane %v804_v44, 5  ;;  %v812_v55 = vrot.slane %v810_v45, 5 }
  0x56   : > { %3135 = vmatprep.subr.bf16.mxu0 %v3356_v28  ;;  %3047 = vmatprep.mubr.bf16.mxu1 %v2626_v61  ;;  %v3374_v61 = vld [vmem:[%s3855_s1 + $0x1d8] sm:$0xff]   ;;  %v2047_v19 = vshrl.u32 %v2826_v15, 16  ;;  %v2050_v20 = vshll.u32 %v2826_v15, 16  ;;  %v2061_v22 = vshrl.u32 %v2828_v17, 16  ;;  %v2120_v42 = vshll.u32 %v2836_v29, 16  ;;  %v3397_v15 = vld [vmem:[%s3855_s1 + $0x220] sm:$0xff]  }
  0x57   : > { %v743_v8 = vsel %vm3584_vm2, %v738_v2, %v742_v62  ;;  %v2126_v43 = vshll.u32 %v2837_v33, 16  ;;  %v3391_v44 = vld [vmem:[%s3513_s25 + $0xb0] ss:$8 sps:$4 sm:$0xff]  }
  0x58   : > { %3040 = vmatpush3.bf16.msra.mxu1 %v3355_v13  ;;  %v2627_v13 = vcombine.low %v743_v8, %v757_v9  ;;  %v3377_v8 = vld [vmem:[%s3855_s1 + $0xe8] sm:$0xff]   ;;  %v2049_v26 = vrot.slane %v2047_v19, 4  ;;  %v2052_v27 = vrot.slane %v2050_v20, 5  ;;  %v2063_v31 = vrot.slane %v2061_v22, 4 }
  0x59   : > { %3136 = vmatpush3.bf16.msra.mxu0 %v3356_v28  ;;  %3041 = vmatprep.subr.bf16.mxu1 %v3357_v32  ;;  %v770_v28 = vrot.slane %v768_v21, 5  ;;  %v3378_v9 = vld [vmem:[%s3855_s1 + $0x1e8] sm:$0xff]   ;;  %v2056_v21 = vshll.u32 %v2827_v16, 16 }
  0x5a   : > { %3137 = vmatprep.subr.bf16.mxu0 %v3358_v38  ;;  %v3398_v20 = vld [vmem:[%s3855_s1 + $0x228] sm:$0xff]  }
  0x5b   : > { %v771_v56 = vsel %vm3584_vm2, %v766_v46, %v770_v28  ;;  %v2835_v28 = vld [vmem:[%s3513_s25 + $0x2c] sm:$0x1]  ;;  %v2058_v45 = vrot.slane %v2056_v21, 5  ;;  %v2839_v21 = vld [vmem:[%s3513_s25 + $0x3c] sm:$0x1] }
  0x5c   : > { %3042 = vmatpush3.bf16.msra.mxu1 %v3357_v32  ;;  %v784_v32 = vrot.slane %v782_v24, 5 }
  0x5d   : > { %3138 = vmatpush3.bf16.msra.mxu0 %v3358_v38  ;;  %3043 = vmatprep.subr.bf16.mxu1 %v3360_v59  ;;  %v787_v38 = vshrl.u32 %v695_v30, 16  ;;  %v3387_v30 = vld [vmem:[%s3513_s25 + $0xa0] ss:$8 sps:$4 sm:$0xff]  }
  0x5e   : > { %3139 = vmatprep.subr.bf16.mxu0 %v3361_v60 }
  0x5f   : > { %v789_v47 = vrot.slane %v787_v38, 4  ;;  %v2112_v38 = vshll.u32 %v2835_v28, 16 }
  0x60   : > { %3044 = vmatpush3.bf16.msra.mxu1 %v3360_v59  ;;  %v785_v59 = vsel %vm3584_vm2, %v780_v51, %v784_v32  ;;  %v2066_v32 = vrot.slane %v2064_v23, 5 }
  0x61   : > { %3140 = vmatpush3.bf16.msra.mxu0 %v3361_v60  ;;  %3045 = vmatprep.subr.bf16.mxu1 %v3363_v4  ;;  %v793_v57 = vor.u32 %v792_v48, %v789_v47  ;;  %v807_v60 = vor.u32 %v806_v54, %v803_v52  ;;  %v2628_v62 = vcombine.low %v771_v56, %v785_v59  ;;  %v2122_v54 = vrot.slane %v2120_v42, 5 }
  0x62   : > { %3141 = vmatprep.subr.bf16.mxu0 %v3364_v6  ;;  %v2067_v40 = vor.u32 %v2066_v32, %v2063_v31  ;;  %v2114_v56 = vrot.slane %v2112_v38, 5  ;;  %v2128_v59 = vrot.slane %v2126_v43, 5  ;;  %v2831_v31 = vld [vmem:[%s3513_s25 + $0x1c] sm:$0x1]  ;;  %v2833_v32 = vld [vmem:[%s3513_s25 + $0x24] sm:$0x1] }
  0x63   : > { %v794_v63 = vrot.slane %v793_v57, 4  ;;  %v808_v0 = vrot.slane %v807_v60, 4  ;;  %v3395_v57 = vld [vmem:[%s3855_s1 + $0x210] sm:$0xff]  }
  0x64   : > { %3046 = vmatpush3.bf16.msra.mxu1 %v3363_v4  ;;  %v3386_v4 = vld [vmem:[%s3513_s25 + $0x50] ss:$8 sps:$4 sm:$0xff]   ;;  %v2068_v51 = vrot.slane %v2067_v40, 4 }
  0x65   : > { %3142 = vmatpush3.bf16.msra.mxu0 %v3364_v6  ;;  %3055 = vmatprep.subr.bf16.mxu1 %v3365_v7  ;;  %v799_v2 = vsel %vm3584_vm2, %v794_v63, %v798_v49  ;;  %v813_v3 = vsel %vm3584_vm2, %v808_v0, %v812_v55  ;;  %v3392_v49 = vld [vmem:[%s3513_s25 + $0x70] ss:$8 sps:$4 sm:$0xff]  }
  0x66   : > { %3151 = vmatprep.subr.bf16.mxu0 %v3367_v10  ;;  %v2629_v6 = vcombine.low %v799_v2, %v813_v3  ;;  %v3396_v3 = vld [vmem:[%s3855_s1 + $0x218] sm:$0xff]  }
  0x67   : > { %3048 = vmatmul.mubr.bf16.vlgmr.msra.gmra.mrb[0].mxu1 %v2627_v13  ;;  %v3384_v13 = vld [vmem:[%s3855_s1 + $0x1f8] sm:$0xff]  }
  0x68   : > { %3056 = vmatpush3.bf16.msra.mxu1 %v3365_v7  ;;  %3144 = vmatmul.mubr.bf16.vlgmr.msra.gmra.mrb[0].mxu0 %v3368_v11  ;;  %v3385_v7 = vld [vmem:[%s3513_s25 + $0x90] ss:$8 sps:$4 sm:$0xff]  }
  0x69   : > { %3152 = vmatpush3.bf16.msra.mxu0 %v3367_v10  ;;  %3057 = vmatprep.subr.bf16.mxu1 %v3369_v14  ;;  %v3380_v10 = vld [vmem:[%s3855_s1 + $0xf0] sm:$0xff]  }
  0x6a   : > { %3153 = vmatprep.subr.bf16.mxu0 %v3370_v18  ;;  %3147 = vmatprep.mubr.bf16.mxu0 %v3379_v25  ;;  %v3382_v11 = vld [vmem:[%s3855_s1 + $0x1f0] sm:$0xff]   ;;  %v2834_v25 = vld [vmem:[%s3513_s25 + $0x28] sm:$0xf] }
  0x6b   : > { %3051 = vmatprep.mubr.bf16.mxu1 %v2628_v62  ;;  %v2103_v36 = vshrl.u32 %v2834_v25, 16  ;;  %v2106_v37 = vshll.u32 %v2834_v25, 16 }
  0x6c   : > { %3058 = vmatpush3.bf16.msra.mxu1 %v3369_v14  ;;  %v3389_v14 = vld [vmem:[%s3855_s1 + $0x200] sm:$0xff]  }
  0x6d   : > { %3154 = vmatpush3.bf16.msra.mxu0 %v3370_v18  ;;  %3059 = vmatprep.subr.bf16.mxu1 %v3371_v35  ;;  %v2829_v18 = vld [vmem:[%s3513_s25 + $0x14] sm:$0x1]  ;;  %v2105_v47 = vrot.slane %v2103_v36, 4  ;;  %v2108_v48 = vrot.slane %v2106_v37, 5 }
  0x6e   : > { %3155 = vmatprep.subr.bf16.mxu0 %v3372_v41  ;;  %v2070_v24 = vshll.u32 %v2829_v18, 16  ;;  %v3399_v37 = vld [vmem:[%s3855_s1 + $0x230] sm:$0xff]  }
  0x6f   : > { %3052 = vmatmul.mubr.bf16.gmra.mrb[4].mxu1 %v2629_v6  ;;  %v2109_v55 = vor.u32 %v2108_v48, %v2105_v47  ;;  %v2840_v6 = vld [vmem:[%s3513_s25 + $0x40] sm:$0xf] }
  0x70   : > { %3060 = vmatpush3.bf16.msra.mxu1 %v3371_v35  ;;  %3148 = vmatmul.mubr.bf16.gmra.mrb[4].mxu0 %v3381_v58  ;;  %v2053_v35 = vor.u32 %v2052_v27, %v2049_v26  ;;  %v2072_v46 = vrot.slane %v2070_v24, 5 }
  0x71   : > { %3156 = vmatpush3.bf16.msra.mxu0 %v3372_v41  ;;  %3061 = vmatprep.subr.bf16.mxu1 %v3373_v50  ;;  %v2117_v41 = vshrl.u32 %v2836_v29, 16  ;;  %v2110_v60 = vrot.slane %v2109_v55, 4 }
  0x72   : > { %3157 = vmatprep.subr.bf16.mxu0 %v3374_v61  ;;  %3167 = vmatprep.mubr.bf16.mxu0 %v3386_v4  ;;  %v2073_v63 = vsel %vm3584_vm2, %v2068_v51, %v2072_v46  ;;  %v3400_v46 = vld [vmem:[%s3855_s1 + $0x238] sm:$0xff]  }
  0x73   : > { %3071 = vmatprep.mubr.bf16.mxu1 %v3385_v7  ;;  %v2119_v52 = vrot.slane %v2117_v41, 4  ;;  %v2115_v2 = vsel %vm3584_vm2, %v2110_v60, %v2114_v56  ;;  %v2098_v41 = vshll.u32 %v2833_v32, 16 }
  0x74   : > { %3062 = vmatpush3.bf16.msra.mxu1 %v3373_v50  ;;  %v2054_v50 = vrot.slane %v2053_v35, 4 }
  0x75   : > { %3158 = vmatpush3.bf16.msra.mxu0 %v3374_v61  ;;  %3063 = vmatprep.subr.bf16.mxu1 %v3375_v1  ;;  %v2123_v58 = vor.u32 %v2122_v54, %v2119_v52  ;;  %v3393_v61 = vld [vmem:[%s3513_s25 + $0xc0] ss:$8 sps:$4 sm:$0xff]  }
  0x76   : > { %3159 = vmatprep.subr.bf16.mxu0 %v3376_v5  ;;  %v2059_v62 = vsel %vm3584_vm2, %v2054_v50, %v2058_v45  ;;  %v2100_v50 = vrot.slane %v2098_v41, 5 }
  0x77   : > { %v2124_v0 = vrot.slane %v2123_v58, 4  ;;  %v2858_v7 = vcombine.low %v2059_v62, %v2073_v63 }
  0x78   : > { %3064 = vmatpush3.bf16.msra.mxu1 %v3375_v1  ;;  %v3394_v1 = vld [vmem:[%s3513_s25 + $0x80] ss:$8 sps:$4 sm:$0xff]  }
  0x79   : > { %3160 = vmatpush3.bf16.msra.mxu0 %v3376_v5  ;;  %3065 = vmatprep.subr.bf16.mxu1 %v3377_v8  ;;  %v2129_v4 = vsel %vm3584_vm2, %v2124_v0, %v2128_v59  ;;  %v2838_v5 = vld [vmem:[%s3513_s25 + $0x38] sm:$0xf] }
  0x7a   : > { %3161 = vmatprep.subr.bf16.mxu0 %v3378_v9 }
  0x7c   : > { %3066 = vmatpush3.bf16.msra.mxu1 %v3377_v8  ;;  %v2830_v8 = vld [vmem:[%s3513_s25 + $0x18] sm:$0xf] }
  0x7d   : > { %3162 = vmatpush3.bf16.msra.mxu0 %v3378_v9  ;;  %3067 = vmatprep.subr.bf16.mxu1 %v3380_v10  ;;  %v2832_v9 = vld [vmem:[%s3513_s25 + $0x20] sm:$0xf]  ;;  %v2075_v16 = vshrl.u32 %v2830_v8, 16  ;;  %v2078_v17 = vshll.u32 %v2830_v8, 16 }
  0x7e   : > { %3163 = vmatprep.subr.bf16.mxu0 %v3382_v11  ;;  %v2089_v18 = vshrl.u32 %v2832_v9, 16  ;;  %v2092_v19 = vshll.u32 %v2832_v9, 16 }
  0x7f   : > { %v2077_v26 = vrot.slane %v2075_v16, 4  ;;  %v2080_v27 = vrot.slane %v2078_v17, 5 }
  0x80   : > { %3068 = vmatpush3.bf16.msra.mxu1 %v3380_v10  ;;  %v2860_v10 = vcombine.low %v2115_v2, %v2129_v4  ;;  %v2091_v28 = vrot.slane %v2089_v18, 4  ;;  %v2094_v29 = vrot.slane %v2092_v19, 5 }
  0x81   : > { %3164 = vmatpush3.bf16.msra.mxu0 %v3382_v11  ;;  %3069 = vmatprep.subr.bf16.mxu1 %v3383_v12  ;;  %v2131_v11 = vshrl.u32 %v2838_v5, 16  ;;  %v2081_v38 = vor.u32 %v2080_v27, %v2077_v26 }
  0x82   : > { %3165 = vmatprep.subr.bf16.mxu0 %v3384_v13  ;;  %v2095_v40 = vor.u32 %v2094_v29, %v2091_v28 }
  0x83   : > { %v2133_v22 = vrot.slane %v2131_v11, 4  ;;  %v2082_v47 = vrot.slane %v2081_v38, 4 }
  0x84   : > { %3070 = vmatpush3.bf16.msra.mxu1 %v3383_v12  ;;  %v2134_v12 = vshll.u32 %v2838_v5, 16 }
  0x85   : > { %3166 = vmatpush3.bf16.msra.mxu0 %v3384_v13  ;;  %3199 = vmatprep.subr.bf16.mxu1 %v3389_v14  ;;  %v2145_v13 = vshrl.u32 %v2840_v6, 16 }
  0x86   : > { %3175 = vmatprep.subr.bf16.mxu0 %v3389_v14  ;;  %v2136_v23 = vrot.slane %v2134_v12, 5 }
  0x87   : > { %3072 = vmatmul.mubr.bf16.vlgmr.msra.gmra.mrb[0].mxu1 %v3387_v30  ;;  %v2147_v24 = vrot.slane %v2145_v13, 4  ;;  %v2841_v30 = vld [vmem:[%s3513_s25 + $0x44] sm:$0x1] }
  0x88   : > { %3168 = vmatmul.mubr.bf16.vlgmr.msra.gmra.mrb[0].mxu0 %v3388_v34  ;;  %3207 = vmatpush3.bf16.msra.mxu1 %v3389_v14  ;;  %v2137_v33 = vor.u32 %v2136_v23, %v2133_v22  ;;  %v2140_v34 = vshll.u32 %v2839_v21, 16  ;;  %v2154_v36 = vshll.u32 %v2841_v30, 16 }
  0x89   : > { %3176 = vmatpush3.bf16.msra.mxu0 %v3389_v14  ;;  %3200 = vmatprep.subr.bf16.mxu1 %v3390_v39  ;;  %v2148_v14 = vshll.u32 %v2840_v6, 16 }
  0x8a   : > { %3177 = vmatprep.subr.bf16.mxu0 %v3390_v39  ;;  %3075 = vmatprep.mubr.bf16.mxu1 %v3391_v44  ;;  %v2138_v42 = vrot.slane %v2137_v33, 4  ;;  %v2142_v43 = vrot.slane %v2140_v34, 5  ;;  %v2156_v45 = vrot.slane %v2154_v36, 5 }
  0x8b   : > { %3171 = vmatprep.mubr.bf16.mxu0 %v3392_v49  ;;  %v2150_v25 = vrot.slane %v2148_v14, 5  ;;  %v2096_v49 = vrot.slane %v2095_v40, 4 }
  0x8c   : > { %3208 = vmatpush3.bf16.msra.mxu1 %v3390_v39  ;;  %v2143_v51 = vsel %vm3584_vm2, %v2138_v42, %v2142_v43 }
  0x8d   : > { %3178 = vmatpush3.bf16.msra.mxu0 %v3390_v39  ;;  %3201 = vmatprep.subr.bf16.mxu1 %v3395_v57  ;;  %v2151_v35 = vor.u32 %v2150_v25, %v2147_v24  ;;  %v2084_v39 = vshll.u32 %v2831_v31, 16  ;;  %v2101_v55 = vsel %vm3584_vm2, %v2096_v49, %v2100_v50  ;;  %v3427_v25 = vmov (!%p2870_p6), 0.0  }
  0x8e   : > { %3179 = vmatprep.subr.bf16.mxu0 %v3395_v57  ;;  %2348 = vst [vmem:[#allocation3] sm:$0x3] (!%p2870_p6), %v3427_v25 }
  0x8f   : > { %3076 = vmatmul.mubr.bf16.gmra.mrb[4].mxu1 %v3393_v61  ;;  %v2152_v44 = vrot.slane %v2151_v35, 4  ;;  %v2086_v48 = vrot.slane %v2084_v39, 5 }
  0x90   : > { %3172 = vmatmul.mubr.bf16.gmra.mrb[4].mxu0 %v3394_v1  ;;  %3209 = vmatpush3.bf16.msra.mxu1 %v3395_v57 }
  0x91   : > { %3180 = vmatpush3.bf16.msra.mxu0 %v3395_v57  ;;  %3202 = vmatprep.subr.bf16.mxu1 %v3396_v3  ;;  %v2157_v52 = vsel %vm3584_vm2, %v2152_v44, %v2156_v45  ;;  %v2087_v54 = vsel %vm3584_vm2, %v2082_v47, %v2086_v48 }
  0x92   : > { %3181 = vmatprep.subr.bf16.mxu0 %v3396_v3  ;;  %3191 = vmatprep.mubr.bf16.mxu0 %v2858_v7  ;;  %v2861_v56 = vcombine.low %v2143_v51, %v2157_v52  ;;  %v2859_v57 = vcombine.low %v2087_v54, %v2101_v55 }
  0x93   : > { %3195 = vmatprep.mubr.bf16.mxu1 %v2860_v10 }
  0x94   : > { %3210 = vmatpush3.bf16.msra.mxu1 %v3396_v3 }
  0x95   : > { %3182 = vmatpush3.bf16.msra.mxu0 %v3396_v3  ;;  %3203 = vmatprep.subr.bf16.mxu1 %v3397_v15 }
  0x96   : > { %3183 = vmatprep.subr.bf16.mxu0 %v3397_v15 }
  0x98   : > { %3211 = vmatpush3.bf16.msra.mxu1 %v3397_v15 }
  0x99   : > { %3184 = vmatpush3.bf16.msra.mxu0 %v3397_v15  ;;  %3204 = vmatprep.subr.bf16.mxu1 %v3398_v20 }
  0x9a   : > { %3185 = vmatprep.subr.bf16.mxu0 %v3398_v20 }
  0x9c   : > { %3212 = vmatpush3.bf16.msra.mxu1 %v3398_v20 }
  0x9d   : > { %3186 = vmatpush3.bf16.msra.mxu0 %v3398_v20  ;;  %3205 = vmatprep.subr.bf16.mxu1 %v3399_v37 }
  0x9e   : > { %3187 = vmatprep.subr.bf16.mxu0 %v3399_v37 }
  0xa0   : > { %3213 = vmatpush3.bf16.msra.mxu1 %v3399_v37 }
  0xa1   : > { %3188 = vmatpush3.bf16.msra.mxu0 %v3399_v37  ;;  %3206 = vmatprep.subr.bf16.mxu1 %v3400_v46 }
  0xa2   : > { %3189 = vmatprep.subr.bf16.mxu0 %v3400_v46 }
  0xa4   : > { %3214 = vmatpush3.bf16.msra.mxu1 %v3400_v46 }
  0xa5   : > { %3190 = vmatpush3.bf16.msra.mxu0 %v3400_v46 }
  0xa7   : > { %3196 = vmatmul.mubr.bf16.vlgmr.msra.gmra.mrb[8].mxu1 %v2861_v56 }
  0xa8   : > { %3192 = vmatmul.mubr.bf16.vlgmr.msra.gmra.mrb[0].mxu0 %v2859_v57 }
 0x15a   : > { %v3073_v58 = vpop.f32.mrb[0].mxu1 }
 0x15b   : > { %v1124_v59 = vpop.f32.mrb[1].mxu1 }
 0x15c   : > { %v3074_v60 = vpop.f32.mrb[2].mxu1 }
 0x15d   : > { %v1127_v61 = vpop.f32.mrb[3].mxu1 }
 0x162   : > { %v3077_v62 = vpop.f32.mrb[4].mxu1 }
 0x163   : > { %v3173_v63 = vpop.f32.mrb[4].mxu0  ;;  %v1140_v0 = vpop.f32.mrb[5].mxu1 }
 0x164   : > { %v3219_v1 = vadd.f32 %v3173_v63, %v3077_v62  ;;  %v1999_v2 = vpop.f32.mrb[5].mxu0  ;;  %v3078_v3 = vpop.f32.mrb[6].mxu1 }
 0x165   : > { %v3221_v53 = vadd.f32 %v1999_v2, %v1140_v0  ;;  %v3174_v4 = vpop.f32.mrb[6].mxu0  ;;  %v1143_v5 = vpop.f32.mrb[7].mxu1 }
 0x166   : > { %v3223_v6 = vadd.f32 %v3174_v4, %v3078_v3  ;;  %v2002_v7 = vpop.f32.mrb[7].mxu0 }
 0x167   : > { %v3225_v8 = vadd.f32 %v2002_v7, %v1143_v5 }
 0x17a   : > { %v3197_v9 = vpop.f32.mrb[8].mxu1 }
 0x17b   : > { %v3193_v10 = vpop.f32.mrb[0].mxu0  ;;  %v3220_v11 = vadd.f32 %v3219_v1, %v3197_v9  ;;  %v2297_v12 = vpop.f32.mrb[9].mxu1  ;;  %2347 = sbr.rel (%p2870_p6) target bundleno = 386 (0x182), region = 40 }
 0x17c   : > { %v3215_v13 = vadd.f32 %v3193_v10, %v3073_v58  ;;  %v2281_v14 = vpop.f32.mrb[1].mxu0  ;;  %v3222_v15 = vadd.f32 %v3221_v53, %v2297_v12  ;;  %v3198_v16 = vpop.f32.mrb[10].mxu1 }
 0x17d   : > { %2342 = vst [vmem:[%s296_s8 + $0x30] sm:$0xff] %v3220_v11  ;;  %v3216_v17 = vadd.f32 %v2281_v14, %v1124_v59  ;;  %v3194_v18 = vpop.f32.mrb[2].mxu0  ;;  %v3224_v19 = vadd.f32 %v3223_v6, %v3198_v16  ;;  %v2300_v20 = vpop.f32.mrb[11].mxu1 }
 0x17e   : > { %2338 = vst [vmem:[%s296_s8 + $0x10] sm:$0xff] %v3215_v13  ;;  %2340 = vst [vmem:[%s296_s8 + $0x20] sm:$0xff] %v3222_v15  ;;  %v3217_v21 = vadd.f32 %v3194_v18, %v3074_v60  ;;  %v2284_v22 = vpop.f32.mrb[3].mxu0  ;;  %v3226_v23 = vadd.f32 %v3225_v8, %v2300_v20 }
 0x17f   : > { %2336 = vst [vmem:[%s296_s8] sm:$0xff] %v3216_v17  ;;  %2343 = vst [vmem:[%s296_s8 + $0x38] sm:$0xff] %v3224_v19  ;;  %v3218_v24 = vadd.f32 %v2284_v22, %v1127_v61 }
 0x180   : > { %2339 = vst [vmem:[%s296_s8 + $0x18] sm:$0xff] %v3217_v21  ;;  %2341 = vst [vmem:[%s296_s8 + $0x28] sm:$0xff] %v3226_v23 }
 0x181   : > { %2337 = vst [vmem:[%s296_s8 + $0x8] sm:$0xff] %v3218_v24 }
 0x182 PF: > { %v2350_v26 = vadd.f32 %v3218_v24, %v3216_v17  ;;  %v2366_v27 = vmul.f32 %v3216_v17, %v3216_v17  ;;  %v2367_v28 = vmul.f32 %v3218_v24, %v3218_v24  ;;  %v2368_v29 = vmul.f32 %v3215_v13, %v3215_v13  ;;  %v2349_v58 = vld [vmem:[#allocation3] sm:$0x1]  ;;  %v2365_v61 = vld [vmem:[#allocation3 + $0x1] sm:$0x1]  ;;  %p2871_p7 = scmp.ne.s32.totalorder %s3417_s18, 1 }
 0x183   : > { %v2369_v31 = vmul.f32 %v3217_v21, %v3217_v21  ;;  %v2370_v34 = vmul.f32 %v3222_v15, %v3222_v15  ;;  %v2371_v37 = vmul.f32 %v3226_v23, %v3226_v23  ;;  %v2372_v40 = vmul.f32 %v3220_v11, %v3220_v11  ;;  %v2400_v8 = vld [vmem:[%s3856_s2] sm:$0x1] (!%p2871_p7) }
 0x184   : > { %v2351_v30 = vadd.f32 %v3215_v13, %v2350_v26  ;;  %v2374_v32 = vadd.f32 %v2367_v28, %v2366_v27  ;;  %v2373_v43 = vmul.f32 %v3224_v19, %v3224_v19 }
 0x186   : > { %v2352_v33 = vadd.f32 %v3217_v21, %v2351_v30  ;;  %v2375_v35 = vadd.f32 %v2374_v32, %v2368_v29 }
 0x188   : > { %v2353_v36 = vadd.f32 %v3222_v15, %v2352_v33  ;;  %v2376_v38 = vadd.f32 %v2375_v35, %v2369_v31 }
 0x18a   : > { %v2354_v39 = vadd.f32 %v3226_v23, %v2353_v36  ;;  %v2377_v41 = vadd.f32 %v2376_v38, %v2370_v34 }
 0x18c   : > { %v2355_v42 = vadd.f32 %v3220_v11, %v2354_v39  ;;  %v2378_v44 = vadd.f32 %v2377_v41, %v2371_v37  ;;  %v2405_v11 = vld [vmem:[%s3857_s3] sm:$0x1] (!%p2871_p7) }
 0x18e   : > { %v2356_v45 = vadd.f32 %v3224_v19, %v2355_v42  ;;  %v2379_v46 = vadd.f32 %v2378_v44, %v2372_v40 }
 0x190   : > { %v2357_v47 = vrot.slane %v2356_v45, 4  ;;  %v2380_v48 = vadd.f32 %v2379_v46, %v2373_v43 }
 0x192   : > { %v2358_v49 = vadd.f32 %v2357_v47, %v2356_v45  ;;  %v2381_v50 = vrot.slane %v2380_v48, 4 }
 0x194   : > { %v2359_v51 = vrot.slane %v2358_v49, 2  ;;  %v2382_v52 = vadd.f32 %v2381_v50, %v2380_v48 }
 0x196   : > { %v2360_v54 = vadd.f32 %v2359_v51, %v2358_v49  ;;  %v2383_v55 = vrot.slane %v2382_v52, 2 }
 0x198   : > { %v2361_v56 = vrot.slane %v2360_v54, 1  ;;  %v2384_v57 = vadd.f32 %v2383_v55, %v2382_v52 }
 0x19a   : > { %v2362_v59 = vadd.f32 %v2361_v56, %v2360_v54  ;;  %v2385_v60 = vrot.slane %v2384_v57, 1  ;;  %2392 = sbr.rel (%p2871_p7) target bundleno = 450 (0x1c2), region = 44 }
 0x19c   : > { %v2363_v62 = vadd.f32 %v2362_v59, %v2349_v58  ;;  %v2386_v63 = vadd.f32 %v2385_v60, %v2384_v57 }
 0x19e   : > { %2364 = vst [vmem:[#allocation3] sm:$0x1] %v2363_v62  ;;  %v2387_v0 = vadd.f32 %v2386_v63, %v2365_v61 }
 0x1a0   : > { %2388 = vst [vmem:[#allocation3 + $0x1] sm:$0x1] %v2387_v0 }
 0x1a5   : > { %v2393_v1 = vld [vmem:[#allocation3] sm:$0x1] }
 0x1a6   : > { %v2394_v3 = vmul.f32 0.0078125, %v2393_v1 }
 0x1a7   : > { %v2395_v2 = vld [vmem:[#allocation3 + $0x1] sm:$0x1] }
 0x1a8   : > { %v2396_v53 = vmul.f32 0.0078125, %v2395_v2  ;;  %v2397_v4 = vmul.f32 %v2394_v3, %v2394_v3 }
 0x1aa   : > { %v2398_v5 = vsub.f32 %v2396_v53, %v2397_v4 }
 0x1ac   : > { %v2399_v6 = vmax.f32 %v2398_v5, 0.0 }
 0x1ae   : > { %v2401_v7 = vadd.f32 1e-05, %v2399_v6 }
 0x1b0   : > { %3401 = vrsqrt.f32 %v2401_v7 }
 0x1ba   : > { %v3402_v9 = vpop.eup %3401 }
 0x1bb   : > { %v2403_v10 = vmul.f32 %v3402_v9, %v2400_v8 }
 0x1bd   : > { %2404 = vst [vmem:[%s3859_s5] sm:$0x1] %v2403_v10  ;;  %v2406_v12 = vmul.f32 %v2403_v10, %v2394_v3 }
 0x1bf   : > { %v2407_v13 = vsub.f32 %v2405_v11, %v2406_v12 }
 0x1c1   : > { %2408 = vst [vmem:[%s3859_s5 + $0x1] sm:$0x1] %v2407_v13 }
 0x1c2 PF: > { %s16_s20 = sadd.s32 1, %s3425_s20   ;;  %s3862_s18 = smov %s3421_s19 }
 0x1c3   : > { %p13_p8 = scmp.ge.s32.totalorder %s16_s20, 4   ;;  %s3863_s19 = smov %s3865_s21 }
 0x1c5   :  { %15 = sbr.rel (!%p13_p8) target bundleno = 2 (0x2), region = 108 }

// kernel: bottleneck_forward.8
= control target key start
LH: loop header
LB: loop body
LE: loop exit
PB: predicated region body
PF: predicated region fallthrough
CT: control target
= control target key end

     0   :  { %v403_v32 = vmov 0.0   ;;  %s571_s1 = inlined_call_operand.vmem [shape: f32[2,128], index: 1, kind: input, shape index: {}]   ;;  %s572_s2 = inlined_call_operand.vmem [shape: bf16[128,128], index: 2, kind: input, shape index: {}]   ;;  %s573_s0 = inlined_call_operand.vmem [shape: f32[128,128], index: 0, kind: input, shape index: {}]   ;;  %s574_s5 = inlined_call_operand.vmem [shape: f32[128,128], index: 5, kind: output, shape index: {0}]   ;;  %s575_s3 = inlined_call_operand.vmem [shape: f32[1,128], index: 3, kind: input, shape index: {}]   ;;  %s576_s4 = inlined_call_operand.vmem [shape: f32[1,128], index: 4, kind: input, shape index: {}]   ;;  %s577_s6 = inlined_call_operand.vmem [shape: f32[2,128], index: 6, kind: output, shape index: {1}]  }
   0x1   :  { %v393_v0 = vld [vmem:[%s572_s2] sm:$0xff]   ;;  %v394_v1 = vld [vmem:[%s572_s2 + $0x8] sm:$0xff]   ;;  %v395_v2 = vld [vmem:[%s572_s2 + $0x10] sm:$0xff]   ;;  %228 = vst [vmem:[#allocation2] sm:$0x3] %v403_v32 }
   0x2   :  { %344 = vmatprep.subr.bf16.mxu0 %v393_v0  ;;  %376 = vmatprep.subr.bf16.mxu1 %v393_v0  ;;  %v396_v3 = vld [vmem:[%s572_s2 + $0x18] sm:$0xff]   ;;  %v23_v4 = vld [vmem:[%s573_s0] sm:$0xff]  ;;  %v24_v5 = vld [vmem:[%s573_s0 + $0x8] sm:$0xff] }
   0x3   :  { %345 = vmatpush3.bf16.msra.mxu0 %v393_v0  ;;  %384 = vmatpush3.bf16.msra.mxu1 %v393_v0  ;;  %v39_v6 = vpack.c.bf16 %v24_v5, %v23_v4  ;;  %v31_v7 = vld [vmem:[%s573_s0 + $0x40] sm:$0xff]  ;;  %v32_v8 = vld [vmem:[%s573_s0 + $0x48] sm:$0xff]  ;;  %v399_v12 = vld [vmem:[%s572_s2 + $0x30] sm:$0xff]  }
   0x4   :  { %346 = vmatprep.subr.bf16.mxu0 %v394_v1  ;;  %377 = vmatprep.subr.bf16.mxu1 %v394_v1  ;;  %v397_v9 = vld [vmem:[%s572_s2 + $0x20] sm:$0xff]   ;;  %v43_v10 = vpack.c.bf16 %v32_v8, %v31_v7  ;;  %v398_v11 = vld [vmem:[%s572_s2 + $0x28] sm:$0xff]   ;;  %v400_v13 = vld [vmem:[%s572_s2 + $0x38] sm:$0xff]  }
   0x5   :  { %360 = vmatprep.mubr.bf16.mxu0 %v39_v6  ;;  %v25_v14 = vld [vmem:[%s573_s0 + $0x10] sm:$0xff]  ;;  %v26_v15 = vld [vmem:[%s573_s0 + $0x18] sm:$0xff]  ;;  %v27_v16 = vld [vmem:[%s573_s0 + $0x20] sm:$0xff] }
   0x6   :  { %368 = vmatprep.mubr.bf16.mxu1 %v43_v10  ;;  %v33_v17 = vld [vmem:[%s573_s0 + $0x50] sm:$0xff]  ;;  %v34_v18 = vld [vmem:[%s573_s0 + $0x58] sm:$0xff]  ;;  %v28_v19 = vld [vmem:[%s573_s0 + $0x28] sm:$0xff]  ;;  %v40_v22 = vpack.c.bf16 %v26_v15, %v25_v14 }
   0x7   :  { %347 = vmatpush3.bf16.msra.mxu0 %v394_v1  ;;  %385 = vmatpush3.bf16.msra.mxu1 %v394_v1  ;;  %v35_v20 = vld [vmem:[%s573_s0 + $0x60] sm:$0xff]  ;;  %v36_v21 = vld [vmem:[%s573_s0 + $0x68] sm:$0xff]  ;;  %v44_v23 = vpack.c.bf16 %v34_v18, %v33_v17  ;;  %v41_v24 = vpack.c.bf16 %v28_v19, %v27_v16  ;;  %v29_v26 = vld [vmem:[%s573_s0 + $0x30] sm:$0xff] }
   0x8   :  { %348 = vmatprep.subr.bf16.mxu0 %v395_v2  ;;  %378 = vmatprep.subr.bf16.mxu1 %v395_v2  ;;  %v45_v25 = vpack.c.bf16 %v36_v21, %v35_v20  ;;  %v30_v27 = vld [vmem:[%s573_s0 + $0x38] sm:$0xff]  ;;  %v37_v28 = vld [vmem:[%s573_s0 + $0x70] sm:$0xff] }
   0x9   :  { %v38_v29 = vld [vmem:[%s573_s0 + $0x78] sm:$0xff]  ;;  %v42_v30 = vpack.c.bf16 %v30_v27, %v29_v26 }
   0xa   :  { %v46_v31 = vpack.c.bf16 %v38_v29, %v37_v28 }
   0xb   :  { %349 = vmatpush3.bf16.msra.mxu0 %v395_v2  ;;  %386 = vmatpush3.bf16.msra.mxu1 %v395_v2 }
   0xc   :  { %350 = vmatprep.subr.bf16.mxu0 %v396_v3  ;;  %379 = vmatprep.subr.bf16.mxu1 %v396_v3 }
   0xf   :  { %351 = vmatpush3.bf16.msra.mxu0 %v396_v3  ;;  %387 = vmatpush3.bf16.msra.mxu1 %v396_v3 }
  0x10   :  { %352 = vmatprep.subr.bf16.mxu0 %v397_v9  ;;  %380 = vmatprep.subr.bf16.mxu1 %v397_v9 }
  0x13   :  { %353 = vmatpush3.bf16.msra.mxu0 %v397_v9  ;;  %388 = vmatpush3.bf16.msra.mxu1 %v397_v9 }
  0x14   :  { %354 = vmatprep.subr.bf16.mxu0 %v398_v11  ;;  %381 = vmatprep.subr.bf16.mxu1 %v398_v11 }
  0x17   :  { %355 = vmatpush3.bf16.msra.mxu0 %v398_v11  ;;  %389 = vmatpush3.bf16.msra.mxu1 %v398_v11 }
  0x18   :  { %356 = vmatprep.subr.bf16.mxu0 %v399_v12  ;;  %382 = vmatprep.subr.bf16.mxu1 %v399_v12 }
  0x1b   :  { %357 = vmatpush3.bf16.msra.mxu0 %v399_v12  ;;  %390 = vmatpush3.bf16.msra.mxu1 %v399_v12 }
  0x1c   :  { %358 = vmatprep.subr.bf16.mxu0 %v400_v13  ;;  %383 = vmatprep.subr.bf16.mxu1 %v400_v13 }
  0x1f   :  { %359 = vmatpush3.bf16.msra.mxu0 %v400_v13  ;;  %391 = vmatpush3.bf16.msra.mxu1 %v400_v13 }
  0x22   :  { %361 = vmatmul.mubr.bf16.vlgmr.msra.gmra.mrb[0].mxu0 %v40_v22  ;;  %369 = vmatmul.mubr.bf16.vlgmr.msra.gmra.mrb[0].mxu1 %v44_v23 }
  0x23   :  { %364 = vmatprep.mubr.bf16.mxu0 %v41_v24  ;;  %372 = vmatprep.mubr.bf16.mxu1 %v45_v25 }
  0x2a   :  { %365 = vmatmul.mubr.bf16.gmra.mrb[4].mxu0 %v42_v30  ;;  %373 = vmatmul.mubr.bf16.gmra.mrb[4].mxu1 %v46_v31 }
  0xf5   :  { %v362_v33 = vpop.f32.mrb[0].mxu0  ;;  %v370_v34 = vpop.f32.mrb[0].mxu1 }
  0xf6   :  { %210 = vst [vmem:[%s574_s5 + $0x10] sm:$0xff] %v362_v33  ;;  %v145_v35 = vpop.f32.mrb[1].mxu0  ;;  %218 = vst [vmem:[%s574_s5 + $0x50] sm:$0xff] %v370_v34  ;;  %v177_v36 = vpop.f32.mrb[1].mxu1  ;;  %v256_v44 = vmul.f32 %v362_v33, %v362_v33  ;;  %v264_v12 = vmul.f32 %v370_v34, %v370_v34 }
  0xf7   :  { %208 = vst [vmem:[%s574_s5] sm:$0xff] %v145_v35  ;;  %v363_v37 = vpop.f32.mrb[2].mxu0  ;;  %216 = vst [vmem:[%s574_s5 + $0x40] sm:$0xff] %v177_v36  ;;  %v371_v38 = vpop.f32.mrb[2].mxu1  ;;  %v254_v41 = vmul.f32 %v145_v35, %v145_v35  ;;  %v262_v6 = vmul.f32 %v177_v36, %v177_v36 }
  0xf8   :  { %211 = vst [vmem:[%s574_s5 + $0x18] sm:$0xff] %v363_v37  ;;  %v148_v39 = vpop.f32.mrb[3].mxu0  ;;  %219 = vst [vmem:[%s574_s5 + $0x58] sm:$0xff] %v371_v38  ;;  %v180_v40 = vpop.f32.mrb[3].mxu1  ;;  %v257_v47 = vmul.f32 %v363_v37, %v363_v37  ;;  %v265_v15 = vmul.f32 %v371_v38, %v371_v38 }
  0xf9   :  { %209 = vst [vmem:[%s574_s5 + $0x8] sm:$0xff] %v148_v39  ;;  %v230_v42 = vadd.f32 %v148_v39, %v145_v35  ;;  %v255_v43 = vmul.f32 %v148_v39, %v148_v39  ;;  %217 = vst [vmem:[%s574_s5 + $0x48] sm:$0xff] %v180_v40  ;;  %v263_v11 = vmul.f32 %v180_v40, %v180_v40 }
  0xfb   :  { %v231_v45 = vadd.f32 %v362_v33, %v230_v42  ;;  %v270_v46 = vadd.f32 %v255_v43, %v254_v41  ;;  %v253_v43 = vld [vmem:[#allocation2 + $0x1] sm:$0x1] }
  0xfd   :  { %v271_v48 = vadd.f32 %v270_v46, %v256_v44  ;;  %v366_v49 = vpop.f32.mrb[4].mxu0  ;;  %v232_v50 = vadd.f32 %v363_v37, %v231_v45  ;;  %v374_v51 = vpop.f32.mrb[4].mxu1 }
  0xfe   :  { %214 = vst [vmem:[%s574_s5 + $0x30] sm:$0xff] %v366_v49  ;;  %v161_v52 = vpop.f32.mrb[5].mxu0  ;;  %222 = vst [vmem:[%s574_s5 + $0x70] sm:$0xff] %v374_v51  ;;  %v193_v53 = vpop.f32.mrb[5].mxu1  ;;  %v260_v0 = vmul.f32 %v366_v49, %v366_v49  ;;  %v268_v24 = vmul.f32 %v374_v51, %v374_v51 }
  0xff   :  { %212 = vst [vmem:[%s574_s5 + $0x20] sm:$0xff] %v161_v52  ;;  %v233_v54 = vadd.f32 %v232_v50, %v161_v52  ;;  %v258_v55 = vmul.f32 %v161_v52, %v161_v52  ;;  %v272_v56 = vadd.f32 %v271_v48, %v257_v47  ;;  %v367_v57 = vpop.f32.mrb[6].mxu0  ;;  %220 = vst [vmem:[%s574_s5 + $0x60] sm:$0xff] %v193_v53  ;;  %v375_v58 = vpop.f32.mrb[6].mxu1 }
 0x100   :  { %215 = vst [vmem:[%s574_s5 + $0x38] sm:$0xff] %v367_v57  ;;  %v164_v59 = vpop.f32.mrb[7].mxu0  ;;  %223 = vst [vmem:[%s574_s5 + $0x78] sm:$0xff] %v375_v58  ;;  %v196_v60 = vpop.f32.mrb[7].mxu1  ;;  %v261_v3 = vmul.f32 %v367_v57, %v367_v57  ;;  %v266_v18 = vmul.f32 %v193_v53, %v193_v53  ;;  %v269_v27 = vmul.f32 %v375_v58, %v375_v58 }
 0x101   :  { %v273_v61 = vadd.f32 %v272_v56, %v258_v55  ;;  %213 = vst [vmem:[%s574_s5 + $0x28] sm:$0xff] %v164_v59  ;;  %v234_v62 = vadd.f32 %v233_v54, %v164_v59  ;;  %v259_v63 = vmul.f32 %v164_v59, %v164_v59  ;;  %221 = vst [vmem:[%s574_s5 + $0x68] sm:$0xff] %v196_v60  ;;  %v303_v55 = vld [vmem:[%s575_s3] sm:$0x1] }
 0x102   :  { %v267_v23 = vmul.f32 %v196_v60, %v196_v60 }
 0x103   :  { %v235_v1 = vadd.f32 %v366_v49, %v234_v62  ;;  %v274_v2 = vadd.f32 %v273_v61, %v259_v63 }
 0x105   :  { %v275_v4 = vadd.f32 %v274_v2, %v260_v0  ;;  %v236_v5 = vadd.f32 %v367_v57, %v235_v1 }
 0x107   :  { %v237_v7 = vadd.f32 %v236_v5, %v177_v36  ;;  %v276_v8 = vadd.f32 %v275_v4, %v261_v3 }
 0x109   :  { %v277_v9 = vadd.f32 %v276_v8, %v262_v6  ;;  %v238_v10 = vadd.f32 %v237_v7, %v180_v40  ;;  %v229_v40 = vld [vmem:[#allocation2] sm:$0x1] }
 0x10b   :  { %v239_v13 = vadd.f32 %v370_v34, %v238_v10  ;;  %v278_v14 = vadd.f32 %v277_v9, %v263_v11 }
 0x10d   :  { %v279_v16 = vadd.f32 %v278_v14, %v264_v12  ;;  %v240_v17 = vadd.f32 %v371_v38, %v239_v13 }
 0x10f   :  { %v241_v19 = vadd.f32 %v240_v17, %v193_v53  ;;  %v280_v20 = vadd.f32 %v279_v16, %v265_v15 }
 0x111   :  { %v281_v21 = vadd.f32 %v280_v20, %v266_v18  ;;  %v242_v22 = vadd.f32 %v241_v19, %v196_v60 }
 0x113   :  { %v243_v25 = vadd.f32 %v374_v51, %v242_v22  ;;  %v282_v26 = vadd.f32 %v281_v21, %v267_v23 }
 0x115   :  { %v244_v28 = vadd.f32 %v375_v58, %v243_v25  ;;  %v283_v29 = vadd.f32 %v282_v26, %v268_v24  ;;  %v308_v58 = vld [vmem:[%s576_s4] sm:$0x1] }
 0x117   :  { %v245_v30 = vrot.slane %v244_v28, 4  ;;  %v284_v31 = vadd.f32 %v283_v29, %v269_v27 }
 0x119   :  { %v246_v32 = vadd.f32 %v245_v30, %v244_v28  ;;  %v285_v33 = vrot.slane %v284_v31, 4 }
 0x11b   :  { %v247_v34 = vrot.slane %v246_v32, 2  ;;  %v286_v35 = vadd.f32 %v285_v33, %v284_v31 }
 0x11d   :  { %v248_v36 = vadd.f32 %v247_v34, %v246_v32  ;;  %v287_v37 = vrot.slane %v286_v35, 2 }
 0x11f   :  { %v249_v38 = vrot.slane %v248_v36, 1  ;;  %v288_v39 = vadd.f32 %v287_v37, %v286_v35 }
 0x121   :  { %v250_v41 = vadd.f32 %v249_v38, %v248_v36  ;;  %v289_v42 = vrot.slane %v288_v39, 1 }
 0x123   :  { %v251_v44 = vadd.f32 %v250_v41, %v229_v40  ;;  %v290_v45 = vadd.f32 %v289_v42, %v288_v39 }
 0x125   :  { %252 = vst [vmem:[#allocation2] sm:$0x1] %v251_v44  ;;  %v291_v46 = vadd.f32 %v290_v45, %v253_v43 }
 0x127   :  { %292 = vst [vmem:[#allocation2 + $0x1] sm:$0x1] %v291_v46 }
 0x12c   :  { %v296_v47 = vld [vmem:[#allocation2] sm:$0x1] }
 0x12d   :  { %v297_v48 = vmul.f32 0.0078125, %v296_v47 }
 0x12e   :  { %v298_v49 = vld [vmem:[#allocation2 + $0x1] sm:$0x1] }
 0x12f   :  { %v299_v50 = vmul.f32 0.0078125, %v298_v49  ;;  %v300_v51 = vmul.f32 %v297_v48, %v297_v48 }
 0x131   :  { %v301_v52 = vsub.f32 %v299_v50, %v300_v51 }
 0x133   :  { %v302_v53 = vmax.f32 %v301_v52, 0.0 }
 0x135   :  { %v304_v54 = vadd.f32 1e-05, %v302_v53 }
 0x137   :  { %401 = vrsqrt.f32 %v304_v54 }
 0x141   :  { %v402_v56 = vpop.eup %401 }
 0x142   :  { %v306_v57 = vmul.f32 %v402_v56, %v303_v55 }
 0x144   :  { %307 = vst [vmem:[%s577_s6] sm:$0x1] %v306_v57  ;;  %v309_v59 = vmul.f32 %v306_v57, %v297_v48 }
 0x146   :  { %v310_v60 = vsub.f32 %v308_v58, %v309_v59 }
 0x148   :  { %311 = vst [vmem:[%s577_s6 + $0x1] sm:$0x1] %v310_v60 }

// kernel: bottleneck_forward.9
= control target key start
LH: loop header
LB: loop body
LE: loop exit
PB: predicated region body
PF: predicated region fallthrough
CT: control target
= control target key end

     0   :  { %s442_s0 = inlined_call_operand.vmem [shape: f32[128,128], index: 0, kind: input, shape index: {}]   ;;  %s443_s1 = inlined_call_operand.vmem [shape: f32[2,128], index: 1, kind: input, shape index: {}]   ;;  %s444_s2 = inlined_call_operand.vmem [shape: f32[128,128], index: 2, kind: input, shape index: {}, may-alias: {2,4}]   ;;  %s445_s3 = inlined_call_operand.vmem [shape: f32[2,128], index: 3, kind: input, shape index: {}]   ;;  %s446_s4 = inlined_call_operand.vmem [shape: f32[128,128], index: 4, kind: output, shape index: {}, may-alias: {2,4}]  }
   0x1   :  { %v17_v0 = vld [vmem:[%s442_s0] sm:$0xff]  ;;  %v18_v8 = vld [vmem:[%s442_s0 + $0x8] sm:$0xff]  ;;  %v19_v10 = vld [vmem:[%s442_s0 + $0x10] sm:$0xff] }
   0x2   :  { %v220_v1 = vld [vmem:[%s443_s1] ss:$0 sm:$0xff]  ;;  %v225_v2 = vld [vmem:[%s443_s1 + $0x1] ss:$0 sm:$0xff]  ;;  %v76_v9 = vld [vmem:[%s444_s2 + $0x8] sm:$0xff] }
   0x3   :  { %v38_v3 = vmul.f32 %v220_v1, %v17_v0  ;;  %v75_v4 = vld [vmem:[%s444_s2] sm:$0xff]  ;;  %v39_v12 = vmul.f32 %v220_v1, %v18_v8  ;;  %v40_v14 = vmul.f32 %v220_v1, %v19_v10  ;;  %v77_v15 = vld [vmem:[%s444_s2 + $0x10] sm:$0xff]  ;;  %v20_v16 = vld [vmem:[%s442_s0 + $0x18] sm:$0xff] }
   0x4   :  { %v234_v5 = vld [vmem:[%s445_s3] ss:$0 sm:$0xff]  ;;  %v239_v6 = vld [vmem:[%s445_s3 + $0x1] ss:$0 sm:$0xff]  ;;  %v78_v17 = vld [vmem:[%s444_s2 + $0x18] sm:$0xff]  ;;  %v41_v20 = vmul.f32 %v220_v1, %v20_v16 }
   0x5   :  { %v96_v7 = vmul.f32 %v234_v5, %v75_v4  ;;  %v59_v11 = vadd.f32 %v225_v2, %v38_v3  ;;  %v97_v13 = vmul.f32 %v234_v5, %v76_v9  ;;  %v98_v19 = vmul.f32 %v234_v5, %v77_v15  ;;  %v21_v22 = vld [vmem:[%s442_s0 + $0x20] sm:$0xff]  ;;  %v22_v24 = vld [vmem:[%s442_s0 + $0x28] sm:$0xff]  ;;  %v23_v34 = vld [vmem:[%s442_s0 + $0x30] sm:$0xff] }
   0x6   :  { %v99_v21 = vmul.f32 %v234_v5, %v78_v17  ;;  %v79_v23 = vld [vmem:[%s444_s2 + $0x20] sm:$0xff]  ;;  %v60_v25 = vadd.f32 %v225_v2, %v39_v12  ;;  %v61_v27 = vadd.f32 %v225_v2, %v40_v14  ;;  %v42_v28 = vmul.f32 %v220_v1, %v21_v22  ;;  %v80_v29 = vld [vmem:[%s444_s2 + $0x28] sm:$0xff]  ;;  %v81_v39 = vld [vmem:[%s444_s2 + $0x30] sm:$0xff] }
   0x7   :  { %v117_v18 = vadd.f32 %v239_v6, %v96_v7  ;;  %v118_v26 = vadd.f32 %v239_v6, %v97_v13  ;;  %v119_v31 = vadd.f32 %v239_v6, %v98_v19  ;;  %v62_v32 = vadd.f32 %v225_v2, %v41_v20  ;;  %v24_v44 = vld [vmem:[%s442_s0 + $0x38] sm:$0xff]  ;;  %v25_v50 = vld [vmem:[%s442_s0 + $0x40] sm:$0xff]  ;;  %v26_v56 = vld [vmem:[%s442_s0 + $0x48] sm:$0xff] }
   0x8   :  { %v120_v33 = vadd.f32 %v239_v6, %v99_v21  ;;  %v63_v36 = vadd.f32 %v225_v2, %v42_v28  ;;  %v100_v37 = vmul.f32 %v234_v5, %v79_v23  ;;  %v43_v38 = vmul.f32 %v220_v1, %v22_v24  ;;  %v82_v45 = vld [vmem:[%s444_s2 + $0x38] sm:$0xff]  ;;  %v83_v51 = vld [vmem:[%s444_s2 + $0x40] sm:$0xff]  ;;  %v27_v4 = vld [vmem:[%s442_s0 + $0x50] sm:$0xff] }
   0x9   :  { %v133_v30 = vadd.f32 %v117_v18, %v59_v11  ;;  %v134_v35 = vadd.f32 %v118_v26, %v60_v25  ;;  %v135_v41 = vadd.f32 %v119_v31, %v61_v27  ;;  %v101_v43 = vmul.f32 %v234_v5, %v80_v29  ;;  %v28_v12 = vld [vmem:[%s442_s0 + $0x58] sm:$0xff]  ;;  %v29_v22 = vld [vmem:[%s442_s0 + $0x60] sm:$0xff]  ;;  %v30_v28 = vld [vmem:[%s442_s0 + $0x68] sm:$0xff] }
   0xa   :  { %v136_v42 = vadd.f32 %v120_v33, %v62_v32  ;;  %v121_v47 = vadd.f32 %v239_v6, %v100_v37  ;;  %v64_v48 = vadd.f32 %v225_v2, %v43_v38  ;;  %v44_v49 = vmul.f32 %v220_v1, %v23_v34  ;;  %v31_v34 = vld [vmem:[%s442_s0 + $0x70] sm:$0xff] }
   0xb   :  { %v149_v40 = vmax.f32 %v133_v30, 0.0  ;;  %v150_v46 = vmax.f32 %v134_v35, 0.0  ;;  %v151_v52 = vmax.f32 %v135_v41, 0.0  ;;  %v122_v54 = vadd.f32 %v239_v6, %v101_v43 }
   0xc   :  { %v152_v53 = vmax.f32 %v136_v42, 0.0  ;;  %v102_v55 = vmul.f32 %v234_v5, %v81_v39  ;;  %v137_v57 = vadd.f32 %v121_v47, %v63_v36  ;;  %v65_v58 = vadd.f32 %v225_v2, %v44_v49 }
   0xd   :  { %165 = vst [vmem:[%s446_s4] sm:$0xff] %v149_v40  ;;  %166 = vst [vmem:[%s446_s4 + $0x8] sm:$0xff] %v150_v46  ;;  %v45_v59 = vmul.f32 %v220_v1, %v24_v44  ;;  %v103_v60 = vmul.f32 %v234_v5, %v82_v45  ;;  %v138_v61 = vadd.f32 %v122_v54, %v64_v48  ;;  %v32_v48 = vld [vmem:[%s442_s0 + $0x78] sm:$0xff] }
   0xe   :  { %167 = vst [vmem:[%s446_s4 + $0x10] sm:$0xff] %v151_v52  ;;  %168 = vst [vmem:[%s446_s4 + $0x18] sm:$0xff] %v152_v53  ;;  %v123_v62 = vadd.f32 %v239_v6, %v102_v55  ;;  %v46_v63 = vmul.f32 %v220_v1, %v25_v50  ;;  %v104_v0 = vmul.f32 %v234_v5, %v83_v51  ;;  %v153_v7 = vmax.f32 %v137_v57, 0.0 }
   0xf   :  { %v66_v8 = vadd.f32 %v225_v2, %v45_v59  ;;  %v124_v9 = vadd.f32 %v239_v6, %v103_v60  ;;  %v47_v10 = vmul.f32 %v220_v1, %v26_v56  ;;  %v154_v13 = vmax.f32 %v138_v61, 0.0 }
  0x10   :  { %v139_v14 = vadd.f32 %v123_v62, %v65_v58  ;;  %v67_v15 = vadd.f32 %v225_v2, %v46_v63  ;;  %v125_v16 = vadd.f32 %v239_v6, %v104_v0  ;;  %v48_v21 = vmul.f32 %v220_v1, %v27_v4 }
  0x11   :  { %v140_v18 = vadd.f32 %v124_v9, %v66_v8  ;;  %v68_v19 = vadd.f32 %v225_v2, %v47_v10  ;;  %v49_v26 = vmul.f32 %v220_v1, %v28_v12  ;;  %v50_v38 = vmul.f32 %v220_v1, %v29_v22 }
  0x12   :  { %v155_v23 = vmax.f32 %v139_v14, 0.0  ;;  %v141_v24 = vadd.f32 %v125_v16, %v67_v15  ;;  %v69_v31 = vadd.f32 %v225_v2, %v48_v21  ;;  %v51_v42 = vmul.f32 %v220_v1, %v30_v28 }
  0x13   :  { %v156_v29 = vmax.f32 %v140_v18, 0.0  ;;  %v70_v37 = vadd.f32 %v225_v2, %v49_v26  ;;  %v71_v45 = vadd.f32 %v225_v2, %v50_v38  ;;  %v52_v47 = vmul.f32 %v220_v1, %v31_v34 }
  0x14   :  { %v157_v35 = vmax.f32 %v141_v24, 0.0  ;;  %v72_v53 = vadd.f32 %v225_v2, %v51_v42  ;;  %v53_v60 = vmul.f32 %v220_v1, %v32_v48 }
  0x15   :  { %v84_v3 = vld [vmem:[%s444_s2 + $0x48] sm:$0xff]  ;;  %v85_v11 = vld [vmem:[%s444_s2 + $0x50] sm:$0xff]  ;;  %v86_v17 = vld [vmem:[%s444_s2 + $0x58] sm:$0xff]  ;;  %v73_v56 = vadd.f32 %v225_v2, %v52_v47 }
  0x16   :  { %169 = vst [vmem:[%s446_s4 + $0x20] sm:$0xff] %v153_v7  ;;  %v105_v20 = vmul.f32 %v234_v5, %v84_v3  ;;  %170 = vst [vmem:[%s446_s4 + $0x28] sm:$0xff] %v154_v13  ;;  %v106_v25 = vmul.f32 %v234_v5, %v85_v11  ;;  %v107_v32 = vmul.f32 %v234_v5, %v86_v17 }
  0x17   :  { %v74_v3 = vadd.f32 %v225_v2, %v53_v60 }
  0x18   :  { %v126_v30 = vadd.f32 %v239_v6, %v105_v20  ;;  %v127_v36 = vadd.f32 %v239_v6, %v106_v25  ;;  %v128_v40 = vadd.f32 %v239_v6, %v107_v32 }
  0x1a   :  { %v142_v39 = vadd.f32 %v126_v30, %v68_v19  ;;  %v143_v44 = vadd.f32 %v127_v36, %v69_v31  ;;  %v144_v51 = vadd.f32 %v128_v40, %v70_v37 }
  0x1c   :  { %v158_v50 = vmax.f32 %v142_v39, 0.0  ;;  %v159_v54 = vmax.f32 %v143_v44, 0.0  ;;  %v160_v58 = vmax.f32 %v144_v51, 0.0 }
  0x1d   :  { %v87_v27 = vld [vmem:[%s444_s2 + $0x60] sm:$0xff]  ;;  %v88_v33 = vld [vmem:[%s444_s2 + $0x68] sm:$0xff] }
  0x1e   :  { %171 = vst [vmem:[%s446_s4 + $0x30] sm:$0xff] %v155_v23  ;;  %172 = vst [vmem:[%s446_s4 + $0x38] sm:$0xff] %v156_v29  ;;  %v108_v41 = vmul.f32 %v234_v5, %v87_v27  ;;  %v109_v46 = vmul.f32 %v234_v5, %v88_v33 }
  0x20   :  { %v129_v52 = vadd.f32 %v239_v6, %v108_v41  ;;  %v130_v55 = vadd.f32 %v239_v6, %v109_v46 }
  0x22   :  { %v145_v59 = vadd.f32 %v129_v52, %v71_v45  ;;  %v146_v62 = vadd.f32 %v130_v55, %v72_v53 }
  0x24   :  { %v161_v0 = vmax.f32 %v145_v59, 0.0  ;;  %v162_v7 = vmax.f32 %v146_v62, 0.0 }
  0x25   :  { %v89_v43 = vld [vmem:[%s444_s2 + $0x70] sm:$0xff] }
  0x26   :  { %173 = vst [vmem:[%s446_s4 + $0x40] sm:$0xff] %v157_v35  ;;  %v110_v57 = vmul.f32 %v234_v5, %v89_v43 }
  0x28   :  { %v131_v63 = vadd.f32 %v239_v6, %v110_v57 }
  0x2a   :  { %v147_v1 = vadd.f32 %v131_v63, %v73_v56 }
  0x2c   :  { %v163_v8 = vmax.f32 %v147_v1, 0.0 }
  0x2d   :  { %v90_v49 = vld [vmem:[%s444_s2 + $0x78] sm:$0xff] }
  0x2e   :  { %174 = vst [vmem:[%s446_s4 + $0x48] sm:$0xff] %v158_v50  ;;  %v111_v61 = vmul.f32 %v234_v5, %v90_v49  ;;  %175 = vst [vmem:[%s446_s4 + $0x50] sm:$0xff] %v159_v54 }
  0x2f   :  { %176 = vst [vmem:[%s446_s4 + $0x58] sm:$0xff] %v160_v58  ;;  %177 = vst [vmem:[%s446_s4 + $0x60] sm:$0xff] %v161_v0 }
  0x30   :  { %v132_v4 = vadd.f32 %v239_v6, %v111_v61  ;;  %178 = vst [vmem:[%s446_s4 + $0x68] sm:$0xff] %v162_v7  ;;  %179 = vst [vmem:[%s446_s4 + $0x70] sm:$0xff] %v163_v8 }
  0x32   :  { %v148_v5 = vadd.f32 %v132_v4, %v74_v3 }
  0x34   :  { %v164_v9 = vmax.f32 %v148_v5, 0.0 }
  0x36   :  { %180 = vst [vmem:[%s446_s4 + $0x78] sm:$0xff] %v164_v9 }

</bundles_post_ra>
